<compile_context>
chip_gen: v7x
topology: tpu7x:2x2x1
jax: 0.10.0
libtpu: 0.0.40
codegen_flags: <defaults>
</compile_context>

<pallas_src>
import functools

import jax
import jax.numpy as jnp
from jax import lax
from jax.experimental import pallas as pl
from jax.experimental.pallas import tpu as pltpu

_VMEM_LIMIT = 64 * 1024 * 1024  # fits v7x (64 MiB / TC) as well as v5e / v6e


# ----------------------------- math helpers (in-kernel and reference) ----------------

def _layernorm(x, eps=1e-6):
    mu = jnp.mean(x, axis=-1, keepdims=True)
    xc = x - mu
    var = jnp.mean(xc * xc, axis=-1, keepdims=True)
    return xc * lax.rsqrt(var + eps)


def _gelu_tanh(x):
    c = 0.7978845608028654  # sqrt(2/pi)
    return 0.5 * x * (1.0 + jnp.tanh(c * (x + 0.044715 * x * x * x)))


def _silu(x):
    return x * jax.nn.sigmoid(x)


# ----------------------------- Pallas kernels ----------------------------------------

def _modulation_kernel(temb_ref, wa_ref, ba_ref, wb_ref, bb_ref, moda_ref, modb_ref):
    # SiLU in f32, cast only the matmul operand to bf16 (f32 accumulation).
    t = _silu(temb_ref[...]).astype(jnp.bfloat16)
    moda_ref[...] = jnp.dot(t, wa_ref[...],
                            preferred_element_type=jnp.float32) + ba_ref[...]
    modb_ref[...] = jnp.dot(t, wb_ref[...],
                            preferred_element_type=jnp.float32) + bb_ref[...]


def _norm_qkv_kernel(x_ref, mod_ref, w_ref, b_ref, qkv_ref):
    # One (batch, seq-tile) grid step: AdaLN-modulated LayerNorm + QKV projection.
    x = x_ref[0]            # (T, D) f32
    mod = mod_ref[0]        # (6, D) f32: [shift_msa, scale_msa, gate_msa,
                            #              shift_mlp, scale_mlp, gate_mlp]
    xn = _layernorm(x) * (1.0 + mod[1:2]) + mod[0:1]
    qkv = jnp.dot(xn.astype(jnp.bfloat16), w_ref[...],
                  preferred_element_type=jnp.float32) + b_ref[...]
    qkv_ref[0] = qkv.astype(qkv_ref.dtype)


def _flash_attn_kernel(scale, q_ref, k_ref, v_ref, o_ref, m_sc, l_sc, acc_sc):
    # Flash attention over the joint (a+b) sequence: grid (B, H, Q-tiles, KV-tiles),
    # KV axis is last ("arbitrary"); online-softmax state lives in VMEM scratch.
    ki = pl.program_id(3)

    @pl.when(ki == 0)
    def _():
        m_sc[...] = jnp.full(m_sc.shape, -jnp.inf, m_sc.dtype)
        l_sc[...] = jnp.zeros(l_sc.shape, l_sc.dtype)
        acc_sc[...] = jnp.zeros(acc_sc.shape, acc_sc.dtype)

    # Apply the softmax scale to the (tq, hd) Q tile (bf16 * weak float stays bf16),
    # cheaper than scaling the (tq, tk) score tile every KV step.
    q = q_ref[0, 0] * scale  # (tq, hd) bf16
    k = k_ref[0, 0]          # (tk, hd) bf16
    v = v_ref[0, 0]          # (tk, hd) bf16

    # Contract head dim of both operands directly -> no explicit K transpose.
    s = lax.dot_general(q, k, (((1,), (1,)), ((), ())),
                        preferred_element_type=jnp.float32)

    m_prev = m_sc[...]
    m_new = jnp.maximum(m_prev, jnp.max(s, axis=-1, keepdims=True))
    alpha = jnp.exp(m_prev - m_new)
    p = jnp.exp(s - m_new)
    l_sc[...] = alpha * l_sc[...] + jnp.sum(p, axis=-1, keepdims=True)
    acc_sc[...] = alpha * acc_sc[...] + jnp.dot(p.astype(jnp.bfloat16), v,
                                                preferred_element_type=jnp.float32)
    m_sc[...] = m_new

    @pl.when(ki == pl.num_programs(3) - 1)
    def _():
        inv_l = pl.reciprocal(l_sc[...], approx=True)   # EUP, not a VALU divide
        o_ref[0, 0] = (acc_sc[...] * inv_l).astype(o_ref.dtype)


def _out_ff_kernel(x_ref, attn_ref, mod_ref, ow_ref, ob_ref,
                   w1_ref, b1_ref, w2_ref, b2_ref, o_ref):
    # One (batch, seq-tile) grid step: attention out-proj + gated residual,
    # LayerNorm2 + modulation, tanh-GELU MLP + gated residual.
    x = x_ref[0]            # (T, D) f32 residual stream (aliased to the output)
    mod = mod_ref[0]        # (6, D) f32
    gate_msa, shift_mlp = mod[2:3], mod[3:4]
    scale_mlp, gate_mlp = mod[4:5], mod[5:6]

    proj = jnp.dot(attn_ref[0], ow_ref[...],
                   preferred_element_type=jnp.float32) + ob_ref[...]
    x = x + gate_msa * proj

    n2 = _layernorm(x) * (1.0 + scale_mlp) + shift_mlp
    h = _gelu_tanh(jnp.dot(n2.astype(jnp.bfloat16), w1_ref[...],
                           preferred_element_type=jnp.float32) + b1_ref[...])
    ff = jnp.dot(h.astype(jnp.bfloat16), w2_ref[...],
                 preferred_element_type=jnp.float32) + b2_ref[...]
    x = x + gate_mlp * ff

    o_ref[0] = x


# ----------------------------- wrapper ------------------------------------------------

def _resident(arr):
    """Full-array block whose index map is constant across the grid (fetched once)."""
    n = arr.ndim
    return pl.BlockSpec(arr.shape, lambda *_: (0,) * n)


def _pick_tile(n, pref):
    """Largest tile <= pref that divides n and is a multiple of 8 (else the full n)."""
    if n <= pref:
        return n
    t = (min(pref, n) // 8) * 8
    while t >= 8:
        if n % t == 0:
            return t
        t -= 8
    return n


def joint_transformer_block(xa, xb, temb, params, num_heads,
                            seq_tile=256, q_tile=256, kv_tile=512):
    B, Sa, D = xa.shape
    Sb = xb.shape[1]
    S = Sa + Sb
    H = num_heads
    hd = D // H
    f32, bf16 = jnp.float32, jnp.bfloat16

    wp = lambda n: params[n].astype(bf16)   # weights -> bf16 MXU inputs
    bp = lambda n: params[n].astype(f32)    # biases stay f32 (added post-accumulation)

    ada_a_w, ada_a_b = wp("ada_a_w"), bp("ada_a_b")
    ada_b_w, ada_b_b = wp("ada_b_w"), bp("ada_b_b")

    # ---------------- AdaLayerNorm modulation (tiny; computed once per batch) --------
    mod_a, mod_b = pl.pallas_call(
        _modulation_kernel,
        grid=(1,),
        in_specs=[_resident(temb),
                  _resident(ada_a_w), _resident(ada_a_b),
                  _resident(ada_b_w), _resident(ada_b_b)],
        out_specs=[pl.BlockSpec((B, 6 * D), lambda i: (0, 0))] * 2,
        out_shape=[jax.ShapeDtypeStruct((B, 6 * D), f32)] * 2,
        compiler_params=pltpu.CompilerParams(
            dimension_semantics=("arbitrary",), vmem_limit_bytes=_VMEM_LIMIT),
    )(temb, ada_a_w, ada_a_b, ada_b_w, ada_b_b)
    mod_a = mod_a.reshape(B, 6, D)   # [shift_msa, scale_msa, gate_msa,
    mod_b = mod_b.reshape(B, 6, D)   #  shift_mlp, scale_mlp, gate_mlp]

    # ---------------- norm1 + QKV projection (sequence-tiled) ------------------------
    def norm_qkv(x, mod3, w, b, tile):
        Bx, Sx, Dx = x.shape
        return pl.pallas_call(
            _norm_qkv_kernel,
            grid=(Bx, Sx // tile),
            in_specs=[pl.BlockSpec((1, tile, Dx), lambda bi, si: (bi, si, 0)),
                      pl.BlockSpec((1, 6, Dx), lambda bi, si: (bi, 0, 0)),
                      _resident(w), _resident(b)],
            out_specs=pl.BlockSpec((1, tile, 3 * Dx), lambda bi, si: (bi, si, 0)),
            out_shape=jax.ShapeDtypeStruct((Bx, Sx, 3 * Dx), bf16),
            compiler_params=pltpu.CompilerParams(
                dimension_semantics=("parallel", "parallel"),
                vmem_limit_bytes=_VMEM_LIMIT),
        )(x, mod3, w, b)

    ta = _pick_tile(Sa, seq_tile)
    tb = _pick_tile(Sb, seq_tile)
    qkv_a = norm_qkv(xa, mod_a, wp("aqkv_w"), bp("aqkv_b"), ta)
    qkv_b = norm_qkv(xb, mod_b, wp("bqkv_w"), bp("bqkv_b"), tb)

    # Head split / joint-sequence concat: wrapper-level XLA layout plumbing
    # (kept out of the kernels; no lane-sliced head loop, no in-kernel concat).
    def split_heads(qkv, Sx):
        def pick(i):
            return (qkv[..., i * D:(i + 1) * D]
                    .reshape(B, Sx, H, hd).transpose(0, 2, 1, 3))
        return pick(0), pick(1), pick(2)

    qa, ka, va = split_heads(qkv_a, Sa)
    qb, kb, vb = split_heads(qkv_b, Sb)
    q = jnp.concatenate([qa, qb], axis=2)   # (B, H, S, hd)
    k = jnp.concatenate([ka, kb], axis=2)
    v = jnp.concatenate([va, vb], axis=2)

    # ---------------- joint flash attention ------------------------------------------
    tq = _pick_tile(S, q_tile)
    tk = _pick_tile(S, kv_tile)
    attn = pl.pallas_call(
        functools.partial(_flash_attn_kernel, 1.0 / (hd ** 0.5)),
        grid=(B, H, S // tq, S // tk),
        in_specs=[pl.BlockSpec((1, 1, tq, hd), lambda bi, hi, qi, ki: (bi, hi, qi, 0)),
                  pl.BlockSpec((1, 1, tk, hd), lambda bi, hi, qi, ki: (bi, hi, ki, 0)),
                  pl.BlockSpec((1, 1, tk, hd), lambda bi, hi, qi, ki: (bi, hi, ki, 0))],
        out_specs=pl.BlockSpec((1, 1, tq, hd), lambda bi, hi, qi, ki: (bi, hi, qi, 0)),
        out_shape=jax.ShapeDtypeStruct((B, H, S, hd), bf16),
        scratch_shapes=[pltpu.VMEM((tq, 1), f32),    # running max
                        pltpu.VMEM((tq, 1), f32),    # running sum
                        pltpu.VMEM((tq, hd), f32)],  # output accumulator
        compiler_params=pltpu.CompilerParams(
            dimension_semantics=("parallel", "parallel", "parallel", "arbitrary"),
            vmem_limit_bytes=_VMEM_LIMIT),
    )(q, k, v)

    attn = attn.transpose(0, 2, 1, 3).reshape(B, S, D)
    attn_a, attn_b = attn[:, :Sa], attn[:, Sa:]

    # ---------------- out-proj + residual + norm2 + MLP (sequence-tiled) -------------
    # TODO(synk): at production D (=1536) stream the FF / out-proj weight K-tiles from
    # HBM (memory_space=pl.ANY + pltpu.emit_pipeline) instead of keeping them resident.
    def out_ff(x, attn_x, mod3, ow, ob, w1, b1, w2, b2, tile):
        Bx, Sx, Dx = x.shape
        return pl.pallas_call(
            _out_ff_kernel,
            grid=(Bx, Sx // tile),
            in_specs=[pl.BlockSpec((1, tile, Dx), lambda bi, si: (bi, si, 0)),
                      pl.BlockSpec((1, tile, Dx), lambda bi, si: (bi, si, 0)),
                      pl.BlockSpec((1, 6, Dx), lambda bi, si: (bi, 0, 0)),
                      _resident(ow), _resident(ob),
                      _resident(w1), _resident(b1),
                      _resident(w2), _resident(b2)],
            out_specs=pl.BlockSpec((1, tile, Dx), lambda bi, si: (bi, si, 0)),
            out_shape=jax.ShapeDtypeStruct((Bx, Sx, Dx), f32),
            input_output_aliases={0: 0},   # residual stream updated in place
            compiler_params=pltpu.CompilerParams(
                dimension_semantics=("parallel", "parallel"),
                vmem_limit_bytes=_VMEM_LIMIT),
        )(x, attn_x, mod3, ow, ob, w1, b1, w2, b2)

    out_a = out_ff(xa, attn_a, mod_a, wp("aout_w"), bp("aout_b"),
                   wp("ffa_w1"), bp("ffa_b1"), wp("ffa_w2"), bp("ffa_b2"), ta)
    out_b = out_ff(xb, attn_b, mod_b, wp("bout_w"), bp("bout_b"),
                   wp("ffb_w1"), bp("ffb_b1"), wp("ffb_w2"), bp("ffb_b2"), tb)
    return out_a, out_b


# ----------------------------- pure-JAX reference (f32) -------------------------------

def reference(xa, xb, temb, p, num_heads):
    B, Sa, D = xa.shape
    Sb = xb.shape[1]
    hd = D // num_heads

    silu_t = _silu(temb)
    mod_a = silu_t @ p["ada_a_w"] + p["ada_a_b"]
    mod_b = silu_t @ p["ada_b_w"] + p["ada_b_b"]

    def chunk6(m):
        return [m[:, None, i * D:(i + 1) * D] for i in range(6)]

    (sh_msa_a, sc_msa_a, g_msa_a, sh_mlp_a, sc_mlp_a, g_mlp_a) = chunk6(mod_a)
    (sh_msa_b, sc_msa_b, g_msa_b, sh_mlp_b, sc_mlp_b, g_mlp_b) = chunk6(mod_b)

    norm_a = _layernorm(xa) * (1.0 + sc_msa_a) + sh_msa_a
    norm_b = _layernorm(xb) * (1.0 + sc_msa_b) + sh_msa_b

    qkv = jnp.concatenate([norm_a @ p["aqkv_w"] + p["aqkv_b"],
                           norm_b @ p["bqkv_w"] + p["bqkv_b"]], axis=1)
    S = Sa + Sb
    q = qkv[..., 0 * D:1 * D].reshape(B, S, num_heads, hd).transpose(0, 2, 1, 3)
    k = qkv[..., 1 * D:2 * D].reshape(B, S, num_heads, hd).transpose(0, 2, 1, 3)
    v = qkv[..., 2 * D:3 * D].reshape(B, S, num_heads, hd).transpose(0, 2, 1, 3)
    scores = jnp.einsum("bhqd,bhkd->bhqk", q, k) / (hd ** 0.5)
    attn = jax.nn.softmax(scores, axis=-1)
    o = jnp.einsum("bhqk,bhkd->bhqd", attn, v).transpose(0, 2, 1, 3).reshape(B, S, D)

    out_a = o[:, :Sa] @ p["aout_w"] + p["aout_b"]
    out_b = o[:, Sa:] @ p["bout_w"] + p["bout_b"]

    xa = xa + g_msa_a * out_a
    xb = xb + g_msa_b * out_b

    n2a = _layernorm(xa) * (1.0 + sc_mlp_a) + sh_mlp_a
    n2b = _layernorm(xb) * (1.0 + sc_mlp_b) + sh_mlp_b
    xa = xa + g_mlp_a * (_gelu_tanh(n2a @ p["ffa_w1"] + p["ffa_b1"]) @ p["ffa_w2"] + p["ffa_b2"])
    xb = xb + g_mlp_b * (_gelu_tanh(n2b @ p["ffb_w1"] + p["ffb_b1"]) @ p["ffb_w2"] + p["ffb_b2"])
    return xa, xb


# ----------------------------- deterministic param init -------------------------------

def init_params(key, dim):
    # nn.Linear weights stored transposed: (in_features, out_features); y = x @ W + b.
    def linear(k, din, dout):
        k1, k2 = jax.random.split(k)
        w = jax.random.normal(k1, (din, dout), jnp.float32) * 0.05
        b = jax.random.normal(k2, (1, dout), jnp.float32) * 0.05
        return w, b

    keys = jax.random.split(key, 10)
    p = {}
    p["ada_a_w"], p["ada_a_b"] = linear(keys[0], dim, 6 * dim)
    p["ada_b_w"], p["ada_b_b"] = linear(keys[1], dim, 6 * dim)
    p["aqkv_w"], p["aqkv_b"] = linear(keys[2], dim, 3 * dim)
    p["bqkv_w"], p["bqkv_b"] = linear(keys[3], dim, 3 * dim)
    p["aout_w"], p["aout_b"] = linear(keys[4], dim, dim)
    p["bout_w"], p["bout_b"] = linear(keys[5], dim, dim)
    p["ffa_w1"], p["ffa_b1"] = linear(keys[6], dim, 4 * dim)
    p["ffa_w2"], p["ffa_b2"] = linear(keys[7], 4 * dim, dim)
    p["ffb_w1"], p["ffb_b1"] = linear(keys[8], dim, 4 * dim)
    p["ffb_w2"], p["ffb_b2"] = linear(keys[9], 4 * dim, dim)
    return p


# ----------------------------- main ---------------------------------------------------

if __name__ == "__main__":
    B, Sa, Sb, D, H = 2, 16, 8, 32, 2   # dim=32, num_attention_heads=2, head_dim=16

    root = jax.random.PRNGKey(0)
    k_xa, k_xb, k_t, k_p = jax.random.split(root, 4)
    xa = jax.random.normal(k_xa, (B, Sa, D), jnp.float32)
    xb = jax.random.normal(k_xb, (B, Sb, D), jnp.float32)
    temb = jax.random.normal(k_t, (B, D), jnp.float32)
    params = init_params(k_p, D)

    # f32 reference (computed first; kernel outputs may alias internal buffers).
    ref_a, ref_b = reference(xa, xb, temb, params, num_heads=H)

    # Small tiles at toy shapes so the seq-tiled grids and the multi-KV-step online
    # softmax path are actually exercised; at real SD3 sizes use the larger defaults.
    fn = jax.jit(functools.partial(joint_transformer_block, num_heads=H,
                                   seq_tile=8, q_tile=8, kv_tile=8))
    out_a, out_b = fn(xa, xb, temb, params)
    jax.block_until_ready(out_a)
    jax.block_until_ready(out_b)

    # bf16 matmul inputs with f32 accumulation vs. full-f32 reference.
    assert jnp.allclose(out_a, ref_a, rtol=1e-2, atol=1e-2), "branch-a mismatch"
    assert jnp.allclose(out_b, ref_b, rtol=1e-2, atol=1e-2), "branch-b mismatch"

    print("KERNEL_OK")
</pallas_src>

<mosaic_0001>
module attributes {stable_mosaic.version = 11 : i64} {
  func.func @_modulation_kernel(%arg0: i32, %arg1: memref<2x32xf32, #tpu.memory_space<vmem>>, %arg2: memref<32x192xbf16, #tpu.memory_space<vmem>>, %arg3: memref<1x192xf32, #tpu.memory_space<vmem>>, %arg4: memref<32x192xbf16, #tpu.memory_space<vmem>>, %arg5: memref<1x192xf32, #tpu.memory_space<vmem>>, %arg6: memref<2x192xf32, #tpu.memory_space<vmem>>, %arg7: memref<2x192xf32, #tpu.memory_space<vmem>>) attributes {dimension_semantics = [#tpu.dimension_semantics<arbitrary>], iteration_bounds = array<i64: 1>, scalar_prefetch = 0 : i64, scratch_operands = 0 : i64, tpu.core_type = #tpu.core_type<tc>, window_params = [{pipeline_mode = #tpu.pipeline_mode<synchronous>, transform_indices = @transform_0, window_bounds = array<i64: 2, 32>}, {pipeline_mode = #tpu.pipeline_mode<synchronous>, transform_indices = @transform_1, window_bounds = array<i64: 32, 192>}, {pipeline_mode = #tpu.pipeline_mode<synchronous>, transform_indices = @transform_2, window_bounds = array<i64: 1, 192>}, {pipeline_mode = #tpu.pipeline_mode<synchronous>, transform_indices = @transform_3, window_bounds = array<i64: 32, 192>}, {pipeline_mode = #tpu.pipeline_mode<synchronous>, transform_indices = @transform_4, window_bounds = array<i64: 1, 192>}, {pipeline_mode = #tpu.pipeline_mode<synchronous>, transform_indices = @transform_5, window_bounds = array<i64: 2, 192>}, {pipeline_mode = #tpu.pipeline_mode<synchronous>, transform_indices = @transform_6, window_bounds = array<i64: 2, 192>}]} {
    %c0 = arith.constant 0 : index
    %c0_0 = arith.constant 0 : index
    %0 = vector.load %arg1[%c0, %c0_0] : memref<2x32xf32, #tpu.memory_space<vmem>>, vector<2x32xf32>
    %1 = arith.negf %0 : vector<2x32xf32>
    %2 = math.exp %1 : vector<2x32xf32>
    %cst = arith.constant 1.000000e+00 : f32
    %3 = vector.broadcast %cst : f32 to vector<2x32xf32>
    %4 = arith.addf %3, %2 : vector<2x32xf32>
    %5 = arith.divf %3, %4 : vector<2x32xf32>
    %6 = arith.mulf %0, %5 : vector<2x32xf32>
    %7 = arith.truncf %6 : vector<2x32xf32> to vector<2x32xbf16>
    %c0_1 = arith.constant 0 : index
    %c0_2 = arith.constant 0 : index
    %8 = vector.load %arg2[%c0_1, %c0_2] : memref<32x192xbf16, #tpu.memory_space<vmem>>, vector<32x192xbf16>
    %cst_3 = arith.constant dense<0.000000e+00> : vector<2x192xf32>
    %9 = tpu.matmul %7, %8, %cst_3 {dimension_numbers = #tpu.dot_dimension_numbers<[1], [0], [0], [1], [0, 0, 1, 1], [], []>} : vector<2x32xbf16>, vector<32x192xbf16>, vector<2x192xf32> -> vector<2x192xf32>
    %c0_4 = arith.constant 0 : index
    %c0_5 = arith.constant 0 : index
    %10 = vector.load %arg3[%c0_4, %c0_5] : memref<1x192xf32, #tpu.memory_space<vmem>>, vector<1x192xf32>
    %11 = vector.broadcast %10 : vector<1x192xf32> to vector<2x192xf32>
    %12 = arith.addf %9, %11 : vector<2x192xf32>
    %c0_6 = arith.constant 0 : index
    %c0_7 = arith.constant 0 : index
    %13 = vector.load %arg6[%c0_6, %c0_7] : memref<2x192xf32, #tpu.memory_space<vmem>>, vector<2x192xf32>
    tpu.vector_store %arg6[%c0_6, %c0_7], %12 {strides = array<i32>} : memref<2x192xf32, #tpu.memory_space<vmem>>, vector<2x192xf32>,
    %c0_8 = arith.constant 0 : index
    %c0_9 = arith.constant 0 : index
    %14 = vector.load %arg4[%c0_8, %c0_9] : memref<32x192xbf16, #tpu.memory_space<vmem>>, vector<32x192xbf16>
    %cst_10 = arith.constant dense<0.000000e+00> : vector<2x192xf32>
    %15 = tpu.matmul %7, %14, %cst_10 {dimension_numbers = #tpu.dot_dimension_numbers<[1], [0], [0], [1], [0, 0, 1, 1], [], []>} : vector<2x32xbf16>, vector<32x192xbf16>, vector<2x192xf32> -> vector<2x192xf32>
    %c0_11 = arith.constant 0 : index
    %c0_12 = arith.constant 0 : index
    %16 = vector.load %arg5[%c0_11, %c0_12] : memref<1x192xf32, #tpu.memory_space<vmem>>, vector<1x192xf32>
    %17 = vector.broadcast %16 : vector<1x192xf32> to vector<2x192xf32>
    %18 = arith.addf %15, %17 : vector<2x192xf32>
    %c0_13 = arith.constant 0 : index
    %c0_14 = arith.constant 0 : index
    %19 = vector.load %arg7[%c0_13, %c0_14] : memref<2x192xf32, #tpu.memory_space<vmem>>, vector<2x192xf32>
    tpu.vector_store %arg7[%c0_13, %c0_14], %18 {strides = array<i32>} : memref<2x192xf32, #tpu.memory_space<vmem>>, vector<2x192xf32>,
    return
  }
  func.func @transform_0(%arg0: i32) -> (i32, i32) {
    %c0_i32 = arith.constant 0 : i32
    %c0_i32_0 = arith.constant 0 : i32
    %c0_i32_1 = arith.constant 0 : i32
    return %c0_i32, %c0_i32_0 : i32, i32
  }
  func.func @transform_1(%arg0: i32) -> (i32, i32) {
    %c0_i32 = arith.constant 0 : i32
    %c0_i32_0 = arith.constant 0 : i32
    %c0_i32_1 = arith.constant 0 : i32
    return %c0_i32, %c0_i32_0 : i32, i32
  }
  func.func @transform_2(%arg0: i32) -> (i32, i32) {
    %c0_i32 = arith.constant 0 : i32
    %c0_i32_0 = arith.constant 0 : i32
    %c0_i32_1 = arith.constant 0 : i32
    return %c0_i32, %c0_i32_0 : i32, i32
  }
  func.func @transform_3(%arg0: i32) -> (i32, i32) {
    %c0_i32 = arith.constant 0 : i32
    %c0_i32_0 = arith.constant 0 : i32
    %c0_i32_1 = arith.constant 0 : i32
    return %c0_i32, %c0_i32_0 : i32, i32
  }
  func.func @transform_4(%arg0: i32) -> (i32, i32) {
    %c0_i32 = arith.constant 0 : i32
    %c0_i32_0 = arith.constant 0 : i32
    %c0_i32_1 = arith.constant 0 : i32
    return %c0_i32, %c0_i32_0 : i32, i32
  }
  func.func @transform_5(%arg0: i32) -> (i32, i32) {
    %c0_i32 = arith.constant 0 : i32
    %c0_i32_0 = arith.constant 0 : i32
    %c0_i32_1 = arith.constant 0 : i32
    return %c0_i32, %c0_i32_0 : i32, i32
  }
  func.func @transform_6(%arg0: i32) -> (i32, i32) {
    %c0_i32 = arith.constant 0 : i32
    %c0_i32_0 = arith.constant 0 : i32
    %c0_i32_1 = arith.constant 0 : i32
    return %c0_i32, %c0_i32_0 : i32, i32
  }
}

module attributes {stable_mosaic.version = 11 : i64} {
  func.func @_norm_qkv_kernel(%arg0: i32, %arg1: i32, %arg2: memref<1x8x32xf32, #tpu.memory_space<vmem>>, %arg3: memref<1x6x32xf32, #tpu.memory_space<vmem>>, %arg4: memref<32x96xbf16, #tpu.memory_space<vmem>>, %arg5: memref<1x96xf32, #tpu.memory_space<vmem>>, %arg6: memref<1x8x96xbf16, #tpu.memory_space<vmem>>) attributes {dimension_semantics = [#tpu.dimension_semantics<parallel>, #tpu.dimension_semantics<parallel>], iteration_bounds = array<i64: 2, 2>, scalar_prefetch = 0 : i64, scratch_operands = 0 : i64, tpu.core_type = #tpu.core_type<tc>, window_params = [{transform_indices = @transform_0, window_bounds = array<i64: 1, 8, 32>}, {transform_indices = @transform_1, window_bounds = array<i64: 1, 6, 32>}, {pipeline_mode = #tpu.pipeline_mode<synchronous>, transform_indices = @transform_2, window_bounds = array<i64: 32, 96>}, {pipeline_mode = #tpu.pipeline_mode<synchronous>, transform_indices = @transform_3, window_bounds = array<i64: 1, 96>}, {transform_indices = @transform_4, window_bounds = array<i64: 1, 8, 96>}]} {
    %c0 = arith.constant 0 : index
    %c0_0 = arith.constant 0 : index
    %c0_1 = arith.constant 0 : index
    %0 = vector.load %arg2[%c0, %c0_0, %c0_1] : memref<1x8x32xf32, #tpu.memory_space<vmem>>, vector<1x8x32xf32>
    %1 = vector.shape_cast %0 : vector<1x8x32xf32> to vector<8x32xf32>
    %c0_2 = arith.constant 0 : index
    %c0_3 = arith.constant 0 : index
    %c0_4 = arith.constant 0 : index
    %2 = vector.load %arg3[%c0_2, %c0_3, %c0_4] : memref<1x6x32xf32, #tpu.memory_space<vmem>>, vector<1x6x32xf32>
    %3 = vector.shape_cast %2 : vector<1x6x32xf32> to vector<6x32xf32>
    %cst = arith.constant dense<0.000000e+00> : vector<8xf32>
    %4 = vector.multi_reduction <add>, %1, %cst [1] : vector<8x32xf32> to vector<8xf32>
    %5 = vector.shape_cast %4 : vector<8xf32> to vector<8x1xf32>
    %cst_5 = arith.constant 3.200000e+01 : f32
    %6 = vector.broadcast %cst_5 : f32 to vector<8x1xf32>
    %7 = arith.divf %5, %6 : vector<8x1xf32>
    %8 = vector.broadcast %7 : vector<8x1xf32> to vector<8x32xf32>
    %9 = arith.subf %1, %8 : vector<8x32xf32>
    %10 = arith.mulf %9, %9 : vector<8x32xf32>
    %cst_6 = arith.constant dense<0.000000e+00> : vector<8xf32>
    %11 = vector.multi_reduction <add>, %10, %cst_6 [1] : vector<8x32xf32> to vector<8xf32>
    %12 = vector.shape_cast %11 : vector<8xf32> to vector<8x1xf32>
    %cst_7 = arith.constant 3.200000e+01 : f32
    %13 = vector.broadcast %cst_7 : f32 to vector<8x1xf32>
    %14 = arith.divf %12, %13 : vector<8x1xf32>
    %cst_8 = arith.constant 9.99999997E-7 : f32
    %15 = vector.broadcast %cst_8 : f32 to vector<8x1xf32>
    %16 = arith.addf %14, %15 : vector<8x1xf32>
    %17 = math.rsqrt %16 : vector<8x1xf32>
    %18 = vector.broadcast %17 : vector<8x1xf32> to vector<8x32xf32>
    %19 = arith.mulf %9, %18 : vector<8x32xf32>
    %20 = vector.extract_strided_slice %3 {offsets = [1, 0], sizes = [1, 32], strides = [1, 1]} : vector<6x32xf32> to vector<1x32xf32>
    %cst_9 = arith.constant 1.000000e+00 : f32
    %21 = vector.broadcast %cst_9 : f32 to vector<1x32xf32>
    %22 = arith.addf %21, %20 : vector<1x32xf32>
    %23 = vector.broadcast %22 : vector<1x32xf32> to vector<8x32xf32>
    %24 = arith.mulf %19, %23 : vector<8x32xf32>
    %25 = vector.extract_strided_slice %3 {offsets = [0, 0], sizes = [1, 32], strides = [1, 1]} : vector<6x32xf32> to vector<1x32xf32>
    %26 = vector.broadcast %25 : vector<1x32xf32> to vector<8x32xf32>
    %27 = arith.addf %24, %26 : vector<8x32xf32>
    %28 = arith.truncf %27 : vector<8x32xf32> to vector<8x32xbf16>
    %c0_10 = arith.constant 0 : index
    %c0_11 = arith.constant 0 : index
    %29 = vector.load %arg4[%c0_10, %c0_11] : memref<32x96xbf16, #tpu.memory_space<vmem>>, vector<32x96xbf16>
    %cst_12 = arith.constant dense<0.000000e+00> : vector<8x96xf32>
    %30 = tpu.matmul %28, %29, %cst_12 {dimension_numbers = #tpu.dot_dimension_numbers<[1], [0], [0], [1], [0, 0, 1, 1], [], []>} : vector<8x32xbf16>, vector<32x96xbf16>, vector<8x96xf32> -> vector<8x96xf32>
    %c0_13 = arith.constant 0 : index
    %c0_14 = arith.constant 0 : index
    %31 = vector.load %arg5[%c0_13, %c0_14] : memref<1x96xf32, #tpu.memory_space<vmem>>, vector<1x96xf32>
    %32 = vector.broadcast %31 : vector<1x96xf32> to vector<8x96xf32>
    %33 = arith.addf %30, %32 : vector<8x96xf32>
    %34 = arith.truncf %33 : vector<8x96xf32> to vector<8x96xbf16>
    %c0_15 = arith.constant 0 : index
    %c0_16 = arith.constant 0 : index
    %c0_17 = arith.constant 0 : index
    %35 = vector.load %arg6[%c0_15, %c0_16, %c0_17] : memref<1x8x96xbf16, #tpu.memory_space<vmem>>, vector<1x8x96xbf16>
    %36 = vector.shape_cast %35 : vector<1x8x96xbf16> to vector<8x96xbf16>
    %37 = vector.shape_cast %34 : vector<8x96xbf16> to vector<1x8x96xbf16>
    tpu.vector_store %arg6[%c0_15, %c0_16, %c0_17], %37 {strides = array<i32>} : memref<1x8x96xbf16, #tpu.memory_space<vmem>>, vector<1x8x96xbf16>,
    return
  }
  func.func @transform_0(%arg0: i32, %arg1: i32) -> (i32, i32, i32) {
    %c0_i32 = arith.constant 0 : i32
    %c0_i32_0 = arith.constant 0 : i32
    return %arg0, %arg1, %c0_i32 : i32, i32, i32
  }
  func.func @transform_1(%arg0: i32, %arg1: i32) -> (i32, i32, i32) {
    %c0_i32 = arith.constant 0 : i32
    %c0_i32_0 = arith.constant 0 : i32
    %c0_i32_1 = arith.constant 0 : i32
    return %arg0, %c0_i32, %c0_i32_0 : i32, i32, i32
  }
  func.func @transform_2(%arg0: i32, %arg1: i32) -> (i32, i32) {
    %c0_i32 = arith.constant 0 : i32
    %c0_i32_0 = arith.constant 0 : i32
    %c0_i32_1 = arith.constant 0 : i32
    return %c0_i32, %c0_i32_0 : i32, i32
  }
  func.func @transform_3(%arg0: i32, %arg1: i32) -> (i32, i32) {
    %c0_i32 = arith.constant 0 : i32
    %c0_i32_0 = arith.constant 0 : i32
    %c0_i32_1 = arith.constant 0 : i32
    return %c0_i32, %c0_i32_0 : i32, i32
  }
  func.func @transform_4(%arg0: i32, %arg1: i32) -> (i32, i32, i32) {
    %c0_i32 = arith.constant 0 : i32
    %c0_i32_0 = arith.constant 0 : i32
    return %arg0, %arg1, %c0_i32 : i32, i32, i32
  }
}

module attributes {stable_mosaic.version = 11 : i64} {
  func.func @_norm_qkv_kernel(%arg0: i32, %arg1: i32, %arg2: memref<1x8x32xf32, #tpu.memory_space<vmem>>, %arg3: memref<1x6x32xf32, #tpu.memory_space<vmem>>, %arg4: memref<32x96xbf16, #tpu.memory_space<vmem>>, %arg5: memref<1x96xf32, #tpu.memory_space<vmem>>, %arg6: memref<1x8x96xbf16, #tpu.memory_space<vmem>>) attributes {dimension_semantics = [#tpu.dimension_semantics<parallel>, #tpu.dimension_semantics<parallel>], iteration_bounds = array<i64: 2, 1>, scalar_prefetch = 0 : i64, scratch_operands = 0 : i64, tpu.core_type = #tpu.core_type<tc>, window_params = [{transform_indices = @transform_0, window_bounds = array<i64: 1, 8, 32>}, {transform_indices = @transform_1, window_bounds = array<i64: 1, 6, 32>}, {pipeline_mode = #tpu.pipeline_mode<synchronous>, transform_indices = @transform_2, window_bounds = array<i64: 32, 96>}, {pipeline_mode = #tpu.pipeline_mode<synchronous>, transform_indices = @transform_3, window_bounds = array<i64: 1, 96>}, {transform_indices = @transform_4, window_bounds = array<i64: 1, 8, 96>}]} {
    %c0 = arith.constant 0 : index
    %c0_0 = arith.constant 0 : index
    %c0_1 = arith.constant 0 : index
    %0 = vector.load %arg2[%c0, %c0_0, %c0_1] : memref<1x8x32xf32, #tpu.memory_space<vmem>>, vector<1x8x32xf32>
    %1 = vector.shape_cast %0 : vector<1x8x32xf32> to vector<8x32xf32>
    %c0_2 = arith.constant 0 : index
    %c0_3 = arith.constant 0 : index
    %c0_4 = arith.constant 0 : index
    %2 = vector.load %arg3[%c0_2, %c0_3, %c0_4] : memref<1x6x32xf32, #tpu.memory_space<vmem>>, vector<1x6x32xf32>
    %3 = vector.shape_cast %2 : vector<1x6x32xf32> to vector<6x32xf32>
    %cst = arith.constant dense<0.000000e+00> : vector<8xf32>
    %4 = vector.multi_reduction <add>, %1, %cst [1] : vector<8x32xf32> to vector<8xf32>
    %5 = vector.shape_cast %4 : vector<8xf32> to vector<8x1xf32>
    %cst_5 = arith.constant 3.200000e+01 : f32
    %6 = vector.broadcast %cst_5 : f32 to vector<8x1xf32>
    %7 = arith.divf %5, %6 : vector<8x1xf32>
    %8 = vector.broadcast %7 : vector<8x1xf32> to vector<8x32xf32>
    %9 = arith.subf %1, %8 : vector<8x32xf32>
    %10 = arith.mulf %9, %9 : vector<8x32xf32>
    %cst_6 = arith.constant dense<0.000000e+00> : vector<8xf32>
    %11 = vector.multi_reduction <add>, %10, %cst_6 [1] : vector<8x32xf32> to vector<8xf32>
    %12 = vector.shape_cast %11 : vector<8xf32> to vector<8x1xf32>
    %cst_7 = arith.constant 3.200000e+01 : f32
    %13 = vector.broadcast %cst_7 : f32 to vector<8x1xf32>
    %14 = arith.divf %12, %13 : vector<8x1xf32>
    %cst_8 = arith.constant 9.99999997E-7 : f32
    %15 = vector.broadcast %cst_8 : f32 to vector<8x1xf32>
    %16 = arith.addf %14, %15 : vector<8x1xf32>
    %17 = math.rsqrt %16 : vector<8x1xf32>
    %18 = vector.broadcast %17 : vector<8x1xf32> to vector<8x32xf32>
    %19 = arith.mulf %9, %18 : vector<8x32xf32>
    %20 = vector.extract_strided_slice %3 {offsets = [1, 0], sizes = [1, 32], strides = [1, 1]} : vector<6x32xf32> to vector<1x32xf32>
    %cst_9 = arith.constant 1.000000e+00 : f32
    %21 = vector.broadcast %cst_9 : f32 to vector<1x32xf32>
    %22 = arith.addf %21, %20 : vector<1x32xf32>
    %23 = vector.broadcast %22 : vector<1x32xf32> to vector<8x32xf32>
    %24 = arith.mulf %19, %23 : vector<8x32xf32>
    %25 = vector.extract_strided_slice %3 {offsets = [0, 0], sizes = [1, 32], strides = [1, 1]} : vector<6x32xf32> to vector<1x32xf32>
    %26 = vector.broadcast %25 : vector<1x32xf32> to vector<8x32xf32>
    %27 = arith.addf %24, %26 : vector<8x32xf32>
    %28 = arith.truncf %27 : vector<8x32xf32> to vector<8x32xbf16>
    %c0_10 = arith.constant 0 : index
    %c0_11 = arith.constant 0 : index
    %29 = vector.load %arg4[%c0_10, %c0_11] : memref<32x96xbf16, #tpu.memory_space<vmem>>, vector<32x96xbf16>
    %cst_12 = arith.constant dense<0.000000e+00> : vector<8x96xf32>
    %30 = tpu.matmul %28, %29, %cst_12 {dimension_numbers = #tpu.dot_dimension_numbers<[1], [0], [0], [1], [0, 0, 1, 1], [], []>} : vector<8x32xbf16>, vector<32x96xbf16>, vector<8x96xf32> -> vector<8x96xf32>
    %c0_13 = arith.constant 0 : index
    %c0_14 = arith.constant 0 : index
    %31 = vector.load %arg5[%c0_13, %c0_14] : memref<1x96xf32, #tpu.memory_space<vmem>>, vector<1x96xf32>
    %32 = vector.broadcast %31 : vector<1x96xf32> to vector<8x96xf32>
    %33 = arith.addf %30, %32 : vector<8x96xf32>
    %34 = arith.truncf %33 : vector<8x96xf32> to vector<8x96xbf16>
    %c0_15 = arith.constant 0 : index
    %c0_16 = arith.constant 0 : index
    %c0_17 = arith.constant 0 : index
    %35 = vector.load %arg6[%c0_15, %c0_16, %c0_17] : memref<1x8x96xbf16, #tpu.memory_space<vmem>>, vector<1x8x96xbf16>
    %36 = vector.shape_cast %35 : vector<1x8x96xbf16> to vector<8x96xbf16>
    %37 = vector.shape_cast %34 : vector<8x96xbf16> to vector<1x8x96xbf16>
    tpu.vector_store %arg6[%c0_15, %c0_16, %c0_17], %37 {strides = array<i32>} : memref<1x8x96xbf16, #tpu.memory_space<vmem>>, vector<1x8x96xbf16>,
    return
  }
  func.func @transform_0(%arg0: i32, %arg1: i32) -> (i32, i32, i32) {
    %c0_i32 = arith.constant 0 : i32
    %c0_i32_0 = arith.constant 0 : i32
    return %arg0, %arg1, %c0_i32 : i32, i32, i32
  }
  func.func @transform_1(%arg0: i32, %arg1: i32) -> (i32, i32, i32) {
    %c0_i32 = arith.constant 0 : i32
    %c0_i32_0 = arith.constant 0 : i32
    %c0_i32_1 = arith.constant 0 : i32
    return %arg0, %c0_i32, %c0_i32_0 : i32, i32, i32
  }
  func.func @transform_2(%arg0: i32, %arg1: i32) -> (i32, i32) {
    %c0_i32 = arith.constant 0 : i32
    %c0_i32_0 = arith.constant 0 : i32
    %c0_i32_1 = arith.constant 0 : i32
    return %c0_i32, %c0_i32_0 : i32, i32
  }
  func.func @transform_3(%arg0: i32, %arg1: i32) -> (i32, i32) {
    %c0_i32 = arith.constant 0 : i32
    %c0_i32_0 = arith.constant 0 : i32
    %c0_i32_1 = arith.constant 0 : i32
    return %c0_i32, %c0_i32_0 : i32, i32
  }
  func.func @transform_4(%arg0: i32, %arg1: i32) -> (i32, i32, i32) {
    %c0_i32 = arith.constant 0 : i32
    %c0_i32_0 = arith.constant 0 : i32
    return %arg0, %arg1, %c0_i32 : i32, i32, i32
  }
}

module attributes {stable_mosaic.version = 11 : i64} {
  func.func @_flash_attn_kernel(%arg0: i32, %arg1: i32, %arg2: i32, %arg3: i32, %arg4: memref<1x1x8x16xbf16, #tpu.memory_space<vmem>>, %arg5: memref<1x1x8x16xbf16, #tpu.memory_space<vmem>>, %arg6: memref<1x1x8x16xbf16, #tpu.memory_space<vmem>>, %arg7: memref<1x1x8x16xbf16, #tpu.memory_space<vmem>>, %arg8: memref<8x1xf32, #tpu.memory_space<vmem>>, %arg9: memref<8x1xf32, #tpu.memory_space<vmem>>, %arg10: memref<8x16xf32, #tpu.memory_space<vmem>>) attributes {dimension_semantics = [#tpu.dimension_semantics<parallel>, #tpu.dimension_semantics<parallel>, #tpu.dimension_semantics<parallel>, #tpu.dimension_semantics<arbitrary>], iteration_bounds = array<i64: 2, 2, 3, 3>, scalar_prefetch = 0 : i64, scratch_operands = 3 : i64, tpu.core_type = #tpu.core_type<tc>, window_params = [{transform_indices = @transform_0, window_bounds = array<i64: 1, 1, 8, 16>}, {transform_indices = @transform_1, window_bounds = array<i64: 1, 1, 8, 16>}, {transform_indices = @transform_2, window_bounds = array<i64: 1, 1, 8, 16>}, {transform_indices = @transform_3, window_bounds = array<i64: 1, 1, 8, 16>}]} {
    %c0_i32 = arith.constant 0 : i32
    %0 = arith.cmpi eq, %arg3, %c0_i32 : i32
    %1 = arith.extui %0 : i1 to i32
    %c0_i32_0 = arith.constant 0 : i32
    %2 = arith.cmpi ne, %1, %c0_i32_0 : i32
    scf.if %2 {
      %cst_29 = arith.constant 0xFF800000 : f32
      %38 = vector.broadcast %cst_29 : f32 to vector<8x1xf32>
      %c0_30 = arith.constant 0 : index
      %c0_31 = arith.constant 0 : index
      %39 = vector.load %arg8[%c0_30, %c0_31] : memref<8x1xf32, #tpu.memory_space<vmem>>, vector<8x1xf32>
      tpu.vector_store %arg8[%c0_30, %c0_31], %38 {strides = array<i32>} : memref<8x1xf32, #tpu.memory_space<vmem>>, vector<8x1xf32>,
      %cst_32 = arith.constant 0.000000e+00 : f32
      %40 = vector.broadcast %cst_32 : f32 to vector<8x1xf32>
      %c0_33 = arith.constant 0 : index
      %c0_34 = arith.constant 0 : index
      %41 = vector.load %arg9[%c0_33, %c0_34] : memref<8x1xf32, #tpu.memory_space<vmem>>, vector<8x1xf32>
      tpu.vector_store %arg9[%c0_33, %c0_34], %40 {strides = array<i32>} : memref<8x1xf32, #tpu.memory_space<vmem>>, vector<8x1xf32>,
      %cst_35 = arith.constant 0.000000e+00 : f32
      %42 = vector.broadcast %cst_35 : f32 to vector<8x16xf32>
      %c0_36 = arith.constant 0 : index
      %c0_37 = arith.constant 0 : index
      %43 = vector.load %arg10[%c0_36, %c0_37] : memref<8x16xf32, #tpu.memory_space<vmem>>, vector<8x16xf32>
      tpu.vector_store %arg10[%c0_36, %c0_37], %42 {strides = array<i32>} : memref<8x16xf32, #tpu.memory_space<vmem>>, vector<8x16xf32>,
    } else {
    }
    %c0 = arith.constant 0 : index
    %c0_1 = arith.constant 0 : index
    %c0_2 = arith.constant 0 : index
    %c0_3 = arith.constant 0 : index
    %3 = vector.load %arg4[%c0, %c0_1, %c0_2, %c0_3] : memref<1x1x8x16xbf16, #tpu.memory_space<vmem>>, vector<1x1x8x16xbf16>
    %4 = vector.shape_cast %3 : vector<1x1x8x16xbf16> to vector<8x16xbf16>
    %cst = arith.constant 2.500000e-01 : bf16
    %5 = vector.broadcast %cst : bf16 to vector<8x16xbf16>
    %6 = arith.mulf %4, %5 : vector<8x16xbf16>
    %c0_4 = arith.constant 0 : index
    %c0_5 = arith.constant 0 : index
    %c0_6 = arith.constant 0 : index
    %c0_7 = arith.constant 0 : index
    %7 = vector.load %arg5[%c0_4, %c0_5, %c0_6, %c0_7] : memref<1x1x8x16xbf16, #tpu.memory_space<vmem>>, vector<1x1x8x16xbf16>
    %8 = vector.shape_cast %7 : vector<1x1x8x16xbf16> to vector<8x16xbf16>
    %c0_8 = arith.constant 0 : index
    %c0_9 = arith.constant 0 : index
    %c0_10 = arith.constant 0 : index
    %c0_11 = arith.constant 0 : index
    %9 = vector.load %arg6[%c0_8, %c0_9, %c0_10, %c0_11] : memref<1x1x8x16xbf16, #tpu.memory_space<vmem>>, vector<1x1x8x16xbf16>
    %10 = vector.shape_cast %9 : vector<1x1x8x16xbf16> to vector<8x16xbf16>
    %cst_12 = arith.constant dense<0.000000e+00> : vector<8x8xf32>
    %11 = tpu.matmul %6, %8, %cst_12 {dimension_numbers = #tpu.dot_dimension_numbers<[1], [1], [0], [0], [0, 0, 1, 0], [], []>} : vector<8x16xbf16>, vector<8x16xbf16>, vector<8x8xf32> -> vector<8x8xf32>
    %c0_13 = arith.constant 0 : index
    %c0_14 = arith.constant 0 : index
    %12 = vector.load %arg8[%c0_13, %c0_14] : memref<8x1xf32, #tpu.memory_space<vmem>>, vector<8x1xf32>
    %cst_15 = arith.constant dense<0xFF800000> : vector<8xf32>
    %13 = vector.multi_reduction <maximumf>, %11, %cst_15 [1] : vector<8x8xf32> to vector<8xf32>
    %14 = vector.shape_cast %13 : vector<8xf32> to vector<8x1xf32>
    %15 = arith.maximumf %12, %14 : vector<8x1xf32>
    %16 = arith.subf %12, %15 : vector<8x1xf32>
    %17 = math.exp %16 : vector<8x1xf32>
    %18 = vector.broadcast %15 : vector<8x1xf32> to vector<8x8xf32>
    %19 = arith.subf %11, %18 : vector<8x8xf32>
    %20 = math.exp %19 : vector<8x8xf32>
    %c0_16 = arith.constant 0 : index
    %c0_17 = arith.constant 0 : index
    %21 = vector.load %arg9[%c0_16, %c0_17] : memref<8x1xf32, #tpu.memory_space<vmem>>, vector<8x1xf32>
    %22 = arith.mulf %17, %21 : vector<8x1xf32>
    %cst_18 = arith.constant dense<0.000000e+00> : vector<8xf32>
    %23 = vector.multi_reduction <add>, %20, %cst_18 [1] : vector<8x8xf32> to vector<8xf32>
    %24 = vector.shape_cast %23 : vector<8xf32> to vector<8x1xf32>
    %25 = arith.addf %22, %24 : vector<8x1xf32>
    %c0_19 = arith.constant 0 : index
    %c0_20 = arith.constant 0 : index
    %26 = vector.load %arg9[%c0_19, %c0_20] : memref<8x1xf32, #tpu.memory_space<vmem>>, vector<8x1xf32>
    tpu.vector_store %arg9[%c0_19, %c0_20], %25 {strides = array<i32>} : memref<8x1xf32, #tpu.memory_space<vmem>>, vector<8x1xf32>,
    %c0_21 = arith.constant 0 : index
    %c0_22 = arith.constant 0 : index
    %27 = vector.load %arg10[%c0_21, %c0_22] : memref<8x16xf32, #tpu.memory_space<vmem>>, vector<8x16xf32>
    %28 = vector.broadcast %17 : vector<8x1xf32> to vector<8x16xf32>
    %29 = arith.mulf %28, %27 : vector<8x16xf32>
    %30 = arith.truncf %20 : vector<8x8xf32> to vector<8x8xbf16>
    %cst_23 = arith.constant dense<0.000000e+00> : vector<8x16xf32>
    %31 = tpu.matmul %30, %10, %cst_23 {dimension_numbers = #tpu.dot_dimension_numbers<[1], [0], [0], [1], [0, 0, 1, 1], [], []>} : vector<8x8xbf16>, vector<8x16xbf16>, vector<8x16xf32> -> vector<8x16xf32>
    %32 = arith.addf %29, %31 : vector<8x16xf32>
    %c0_24 = arith.constant 0 : index
    %c0_25 = arith.constant 0 : index
    %33 = vector.load %arg10[%c0_24, %c0_25] : memref<8x16xf32, #tpu.memory_space<vmem>>, vector<8x16xf32>
    tpu.vector_store %arg10[%c0_24, %c0_25], %32 {strides = array<i32>} : memref<8x16xf32, #tpu.memory_space<vmem>>, vector<8x16xf32>,
    %c0_26 = arith.constant 0 : index
    %c0_27 = arith.constant 0 : index
    %34 = vector.load %arg8[%c0_26, %c0_27] : memref<8x1xf32, #tpu.memory_space<vmem>>, vector<8x1xf32>
    tpu.vector_store %arg8[%c0_26, %c0_27], %15 {strides = array<i32>} : memref<8x1xf32, #tpu.memory_space<vmem>>, vector<8x1xf32>,
    %c2_i32 = arith.constant 2 : i32
    %35 = arith.cmpi eq, %arg3, %c2_i32 : i32
    %36 = arith.extui %35 : i1 to i32
    %c0_i32_28 = arith.constant 0 : i32
    %37 = arith.cmpi ne, %36, %c0_i32_28 : i32
    scf.if %37 {
      %c0_29 = arith.constant 0 : index
      %c0_30 = arith.constant 0 : index
      %38 = vector.load %arg9[%c0_29, %c0_30] : memref<8x1xf32, #tpu.memory_space<vmem>>, vector<8x1xf32>
      %39 = tpu.reciprocal %38 {approx = true} : vector<8x1xf32> -> vector<8x1xf32>
      %c0_31 = arith.constant 0 : index
      %c0_32 = arith.constant 0 : index
      %40 = vector.load %arg10[%c0_31, %c0_32] : memref<8x16xf32, #tpu.memory_space<vmem>>, vector<8x16xf32>
      %41 = vector.broadcast %39 : vector<8x1xf32> to vector<8x16xf32>
      %42 = arith.mulf %40, %41 : vector<8x16xf32>
      %43 = arith.truncf %42 : vector<8x16xf32> to vector<8x16xbf16>
      %c0_33 = arith.constant 0 : index
      %c0_34 = arith.constant 0 : index
      %c0_35 = arith.constant 0 : index
      %c0_36 = arith.constant 0 : index
      %44 = vector.load %arg7[%c0_33, %c0_34, %c0_35, %c0_36] : memref<1x1x8x16xbf16, #tpu.memory_space<vmem>>, vector<1x1x8x16xbf16>
      %45 = vector.shape_cast %44 : vector<1x1x8x16xbf16> to vector<8x16xbf16>
      %46 = vector.shape_cast %43 : vector<8x16xbf16> to vector<1x1x8x16xbf16>
      tpu.vector_store %arg7[%c0_33, %c0_34, %c0_35, %c0_36], %46 {strides = array<i32>} : memref<1x1x8x16xbf16, #tpu.memory_space<vmem>>, vector<1x1x8x16xbf16>,
    } else {
    }
    return
  }
  func.func @transform_0(%arg0: i32, %arg1: i32, %arg2: i32, %arg3: i32) -> (i32, i32, i32, i32) {
    %c0_i32 = arith.constant 0 : i32
    %c0_i32_0 = arith.constant 0 : i32
    return %arg0, %arg1, %arg2, %c0_i32 : i32, i32, i32, i32
  }
  func.func @transform_1(%arg0: i32, %arg1: i32, %arg2: i32, %arg3: i32) -> (i32, i32, i32, i32) {
    %c0_i32 = arith.constant 0 : i32
    %c0_i32_0 = arith.constant 0 : i32
    return %arg0, %arg1, %arg3, %c0_i32 : i32, i32, i32, i32
  }
  func.func @transform_2(%arg0: i32, %arg1: i32, %arg2: i32, %arg3: i32) -> (i32, i32, i32, i32) {
    %c0_i32 = arith.constant 0 : i32
    %c0_i32_0 = arith.constant 0 : i32
    return %arg0, %arg1, %arg3, %c0_i32 : i32, i32, i32, i32
  }
  func.func @transform_3(%arg0: i32, %arg1: i32, %arg2: i32, %arg3: i32) -> (i32, i32, i32, i32) {
    %c0_i32 = arith.constant 0 : i32
    %c0_i32_0 = arith.constant 0 : i32
    return %arg0, %arg1, %arg2, %c0_i32 : i32, i32, i32, i32
  }
}

module attributes {stable_mosaic.version = 11 : i64} {
  func.func @_out_ff_kernel(%arg0: i32, %arg1: i32, %arg2: memref<1x8x32xf32, #tpu.memory_space<vmem>>, %arg3: memref<1x8x32xbf16, #tpu.memory_space<vmem>>, %arg4: memref<1x6x32xf32, #tpu.memory_space<vmem>>, %arg5: memref<32x32xbf16, #tpu.memory_space<vmem>>, %arg6: memref<1x32xf32, #tpu.memory_space<vmem>>, %arg7: memref<32x128xbf16, #tpu.memory_space<vmem>>, %arg8: memref<1x128xf32, #tpu.memory_space<vmem>>, %arg9: memref<128x32xbf16, #tpu.memory_space<vmem>>, %arg10: memref<1x32xf32, #tpu.memory_space<vmem>>, %arg11: memref<1x8x32xf32, #tpu.memory_space<vmem>>) attributes {dimension_semantics = [#tpu.dimension_semantics<parallel>, #tpu.dimension_semantics<parallel>], iteration_bounds = array<i64: 2, 2>, scalar_prefetch = 0 : i64, scratch_operands = 0 : i64, tpu.core_type = #tpu.core_type<tc>, window_params = [{transform_indices = @transform_0, window_bounds = array<i64: 1, 8, 32>}, {transform_indices = @transform_1, window_bounds = array<i64: 1, 8, 32>}, {transform_indices = @transform_2, window_bounds = array<i64: 1, 6, 32>}, {pipeline_mode = #tpu.pipeline_mode<synchronous>, transform_indices = @transform_3, window_bounds = array<i64: 32, 32>}, {pipeline_mode = #tpu.pipeline_mode<synchronous>, transform_indices = @transform_4, window_bounds = array<i64: 1, 32>}, {pipeline_mode = #tpu.pipeline_mode<synchronous>, transform_indices = @transform_5, window_bounds = array<i64: 32, 128>}, {pipeline_mode = #tpu.pipeline_mode<synchronous>, transform_indices = @transform_6, window_bounds = array<i64: 1, 128>}, {pipeline_mode = #tpu.pipeline_mode<synchronous>, transform_indices = @transform_7, window_bounds = array<i64: 128, 32>}, {pipeline_mode = #tpu.pipeline_mode<synchronous>, transform_indices = @transform_8, window_bounds = array<i64: 1, 32>}, {transform_indices = @transform_9, window_bounds = array<i64: 1, 8, 32>}]} {
    %c0 = arith.constant 0 : index
    %c0_0 = arith.constant 0 : index
    %c0_1 = arith.constant 0 : index
    %0 = vector.load %arg2[%c0, %c0_0, %c0_1] : memref<1x8x32xf32, #tpu.memory_space<vmem>>, vector<1x8x32xf32>
    %1 = vector.shape_cast %0 : vector<1x8x32xf32> to vector<8x32xf32>
    %c0_2 = arith.constant 0 : index
    %c0_3 = arith.constant 0 : index
    %c0_4 = arith.constant 0 : index
    %2 = vector.load %arg4[%c0_2, %c0_3, %c0_4] : memref<1x6x32xf32, #tpu.memory_space<vmem>>, vector<1x6x32xf32>
    %3 = vector.shape_cast %2 : vector<1x6x32xf32> to vector<6x32xf32>
    %4 = vector.extract_strided_slice %3 {offsets = [2, 0], sizes = [1, 32], strides = [1, 1]} : vector<6x32xf32> to vector<1x32xf32>
    %5 = vector.extract_strided_slice %3 {offsets = [3, 0], sizes = [1, 32], strides = [1, 1]} : vector<6x32xf32> to vector<1x32xf32>
    %6 = vector.extract_strided_slice %3 {offsets = [4, 0], sizes = [1, 32], strides = [1, 1]} : vector<6x32xf32> to vector<1x32xf32>
    %7 = vector.extract_strided_slice %3 {offsets = [5, 0], sizes = [1, 32], strides = [1, 1]} : vector<6x32xf32> to vector<1x32xf32>
    %c0_5 = arith.constant 0 : index
    %c0_6 = arith.constant 0 : index
    %c0_7 = arith.constant 0 : index
    %8 = vector.load %arg3[%c0_5, %c0_6, %c0_7] : memref<1x8x32xbf16, #tpu.memory_space<vmem>>, vector<1x8x32xbf16>
    %9 = vector.shape_cast %8 : vector<1x8x32xbf16> to vector<8x32xbf16>
    %c0_8 = arith.constant 0 : index
    %c0_9 = arith.constant 0 : index
    %10 = vector.load %arg5[%c0_8, %c0_9] : memref<32x32xbf16, #tpu.memory_space<vmem>>, vector<32x32xbf16>
    %cst = arith.constant dense<0.000000e+00> : vector<8x32xf32>
    %11 = tpu.matmul %9, %10, %cst {dimension_numbers = #tpu.dot_dimension_numbers<[1], [0], [0], [1], [0, 0, 1, 1], [], []>} : vector<8x32xbf16>, vector<32x32xbf16>, vector<8x32xf32> -> vector<8x32xf32>
    %c0_10 = arith.constant 0 : index
    %c0_11 = arith.constant 0 : index
    %12 = vector.load %arg6[%c0_10, %c0_11] : memref<1x32xf32, #tpu.memory_space<vmem>>, vector<1x32xf32>
    %13 = vector.broadcast %12 : vector<1x32xf32> to vector<8x32xf32>
    %14 = arith.addf %11, %13 : vector<8x32xf32>
    %15 = vector.broadcast %4 : vector<1x32xf32> to vector<8x32xf32>
    %16 = arith.mulf %15, %14 : vector<8x32xf32>
    %17 = arith.addf %1, %16 : vector<8x32xf32>
    %cst_12 = arith.constant dense<0.000000e+00> : vector<8xf32>
    %18 = vector.multi_reduction <add>, %17, %cst_12 [1] : vector<8x32xf32> to vector<8xf32>
    %19 = vector.shape_cast %18 : vector<8xf32> to vector<8x1xf32>
    %cst_13 = arith.constant 3.200000e+01 : f32
    %20 = vector.broadcast %cst_13 : f32 to vector<8x1xf32>
    %21 = arith.divf %19, %20 : vector<8x1xf32>
    %22 = vector.broadcast %21 : vector<8x1xf32> to vector<8x32xf32>
    %23 = arith.subf %17, %22 : vector<8x32xf32>
    %24 = arith.mulf %23, %23 : vector<8x32xf32>
    %cst_14 = arith.constant dense<0.000000e+00> : vector<8xf32>
    %25 = vector.multi_reduction <add>, %24, %cst_14 [1] : vector<8x32xf32> to vector<8xf32>
    %26 = vector.shape_cast %25 : vector<8xf32> to vector<8x1xf32>
    %cst_15 = arith.constant 3.200000e+01 : f32
    %27 = vector.broadcast %cst_15 : f32 to vector<8x1xf32>
    %28 = arith.divf %26, %27 : vector<8x1xf32>
    %cst_16 = arith.constant 9.99999997E-7 : f32
    %29 = vector.broadcast %cst_16 : f32 to vector<8x1xf32>
    %30 = arith.addf %28, %29 : vector<8x1xf32>
    %31 = math.rsqrt %30 : vector<8x1xf32>
    %32 = vector.broadcast %31 : vector<8x1xf32> to vector<8x32xf32>
    %33 = arith.mulf %23, %32 : vector<8x32xf32>
    %cst_17 = arith.constant 1.000000e+00 : f32
    %34 = vector.broadcast %cst_17 : f32 to vector<1x32xf32>
    %35 = arith.addf %34, %6 : vector<1x32xf32>
    %36 = vector.broadcast %35 : vector<1x32xf32> to vector<8x32xf32>
    %37 = arith.mulf %33, %36 : vector<8x32xf32>
    %38 = vector.broadcast %5 : vector<1x32xf32> to vector<8x32xf32>
    %39 = arith.addf %37, %38 : vector<8x32xf32>
    %40 = arith.truncf %39 : vector<8x32xf32> to vector<8x32xbf16>
    %c0_18 = arith.constant 0 : index
    %c0_19 = arith.constant 0 : index
    %41 = vector.load %arg7[%c0_18, %c0_19] : memref<32x128xbf16, #tpu.memory_space<vmem>>, vector<32x128xbf16>
    %cst_20 = arith.constant dense<0.000000e+00> : vector<8x128xf32>
    %42 = tpu.matmul %40, %41, %cst_20 {dimension_numbers = #tpu.dot_dimension_numbers<[1], [0], [0], [1], [0, 0, 1, 1], [], []>} : vector<8x32xbf16>, vector<32x128xbf16>, vector<8x128xf32> -> vector<8x128xf32>
    %c0_21 = arith.constant 0 : index
    %c0_22 = arith.constant 0 : index
    %43 = vector.load %arg8[%c0_21, %c0_22] : memref<1x128xf32, #tpu.memory_space<vmem>>, vector<1x128xf32>
    %44 = vector.broadcast %43 : vector<1x128xf32> to vector<8x128xf32>
    %45 = arith.addf %42, %44 : vector<8x128xf32>
    %cst_23 = arith.constant 5.000000e-01 : f32
    %46 = vector.broadcast %cst_23 : f32 to vector<8x128xf32>
    %47 = arith.mulf %46, %45 : vector<8x128xf32>
    %cst_24 = arith.constant 4.471500e-02 : f32
    %48 = vector.broadcast %cst_24 : f32 to vector<8x128xf32>
    %49 = arith.mulf %48, %45 : vector<8x128xf32>
    %50 = arith.mulf %49, %45 : vector<8x128xf32>
    %51 = arith.mulf %50, %45 : vector<8x128xf32>
    %52 = arith.addf %45, %51 : vector<8x128xf32>
    %cst_25 = arith.constant 0.797884583 : f32
    %53 = vector.broadcast %cst_25 : f32 to vector<8x128xf32>
    %54 = arith.mulf %53, %52 : vector<8x128xf32>
    %55 = math.tanh %54 : vector<8x128xf32>
    %cst_26 = arith.constant 1.000000e+00 : f32
    %56 = vector.broadcast %cst_26 : f32 to vector<8x128xf32>
    %57 = arith.addf %56, %55 : vector<8x128xf32>
    %58 = arith.mulf %47, %57 : vector<8x128xf32>
    %59 = arith.truncf %58 : vector<8x128xf32> to vector<8x128xbf16>
    %c0_27 = arith.constant 0 : index
    %c0_28 = arith.constant 0 : index
    %60 = vector.load %arg9[%c0_27, %c0_28] : memref<128x32xbf16, #tpu.memory_space<vmem>>, vector<128x32xbf16>
    %cst_29 = arith.constant dense<0.000000e+00> : vector<8x32xf32>
    %61 = tpu.matmul %59, %60, %cst_29 {dimension_numbers = #tpu.dot_dimension_numbers<[1], [0], [0], [1], [0, 0, 1, 1], [], []>} : vector<8x128xbf16>, vector<128x32xbf16>, vector<8x32xf32> -> vector<8x32xf32>
    %c0_30 = arith.constant 0 : index
    %c0_31 = arith.constant 0 : index
    %62 = vector.load %arg10[%c0_30, %c0_31] : memref<1x32xf32, #tpu.memory_space<vmem>>, vector<1x32xf32>
    %63 = vector.broadcast %62 : vector<1x32xf32> to vector<8x32xf32>
    %64 = arith.addf %61, %63 : vector<8x32xf32>
    %65 = vector.broadcast %7 : vector<1x32xf32> to vector<8x32xf32>
    %66 = arith.mulf %65, %64 : vector<8x32xf32>
    %67 = arith.addf %17, %66 : vector<8x32xf32>
    %c0_32 = arith.constant 0 : index
    %c0_33 = arith.constant 0 : index
    %c0_34 = arith.constant 0 : index
    %68 = vector.load %arg11[%c0_32, %c0_33, %c0_34] : memref<1x8x32xf32, #tpu.memory_space<vmem>>, vector<1x8x32xf32>
    %69 = vector.shape_cast %68 : vector<1x8x32xf32> to vector<8x32xf32>
    %70 = vector.shape_cast %67 : vector<8x32xf32> to vector<1x8x32xf32>
    tpu.vector_store %arg11[%c0_32, %c0_33, %c0_34], %70 {strides = array<i32>} : memref<1x8x32xf32, #tpu.memory_space<vmem>>, vector<1x8x32xf32>,
    return
  }
  func.func @transform_0(%arg0: i32, %arg1: i32) -> (i32, i32, i32) {
    %c0_i32 = arith.constant 0 : i32
    %c0_i32_0 = arith.constant 0 : i32
    return %arg0, %arg1, %c0_i32 : i32, i32, i32
  }
  func.func @transform_1(%arg0: i32, %arg1: i32) -> (i32, i32, i32) {
    %c0_i32 = arith.constant 0 : i32
    %c0_i32_0 = arith.constant 0 : i32
    return %arg0, %arg1, %c0_i32 : i32, i32, i32
  }
  func.func @transform_2(%arg0: i32, %arg1: i32) -> (i32, i32, i32) {
    %c0_i32 = arith.constant 0 : i32
    %c0_i32_0 = arith.constant 0 : i32
    %c0_i32_1 = arith.constant 0 : i32
    return %arg0, %c0_i32, %c0_i32_0 : i32, i32, i32
  }
  func.func @transform_3(%arg0: i32, %arg1: i32) -> (i32, i32) {
    %c0_i32 = arith.constant 0 : i32
    %c0_i32_0 = arith.constant 0 : i32
    %c0_i32_1 = arith.constant 0 : i32
    return %c0_i32, %c0_i32_0 : i32, i32
  }
  func.func @transform_4(%arg0: i32, %arg1: i32) -> (i32, i32) {
    %c0_i32 = arith.constant 0 : i32
    %c0_i32_0 = arith.constant 0 : i32
    %c0_i32_1 = arith.constant 0 : i32
    return %c0_i32, %c0_i32_0 : i32, i32
  }
  func.func @transform_5(%arg0: i32, %arg1: i32) -> (i32, i32) {
    %c0_i32 = arith.constant 0 : i32
    %c0_i32_0 = arith.constant 0 : i32
    %c0_i32_1 = arith.constant 0 : i32
    return %c0_i32, %c0_i32_0 : i32, i32
  }
  func.func @transform_6(%arg0: i32, %arg1: i32) -> (i32, i32) {
    %c0_i32 = arith.constant 0 : i32
    %c0_i32_0 = arith.constant 0 : i32
    %c0_i32_1 = arith.constant 0 : i32
    return %c0_i32, %c0_i32_0 : i32, i32
  }
  func.func @transform_7(%arg0: i32, %arg1: i32) -> (i32, i32) {
    %c0_i32 = arith.constant 0 : i32
    %c0_i32_0 = arith.constant 0 : i32
    %c0_i32_1 = arith.constant 0 : i32
    return %c0_i32, %c0_i32_0 : i32, i32
  }
  func.func @transform_8(%arg0: i32, %arg1: i32) -> (i32, i32) {
    %c0_i32 = arith.constant 0 : i32
    %c0_i32_0 = arith.constant 0 : i32
    %c0_i32_1 = arith.constant 0 : i32
    return %c0_i32, %c0_i32_0 : i32, i32
  }
  func.func @transform_9(%arg0: i32, %arg1: i32) -> (i32, i32, i32) {
    %c0_i32 = arith.constant 0 : i32
    %c0_i32_0 = arith.constant 0 : i32
    return %arg0, %arg1, %c0_i32 : i32, i32, i32
  }
}

module attributes {stable_mosaic.version = 11 : i64} {
  func.func @_out_ff_kernel(%arg0: i32, %arg1: i32, %arg2: memref<1x8x32xf32, #tpu.memory_space<vmem>>, %arg3: memref<1x8x32xbf16, #tpu.memory_space<vmem>>, %arg4: memref<1x6x32xf32, #tpu.memory_space<vmem>>, %arg5: memref<32x32xbf16, #tpu.memory_space<vmem>>, %arg6: memref<1x32xf32, #tpu.memory_space<vmem>>, %arg7: memref<32x128xbf16, #tpu.memory_space<vmem>>, %arg8: memref<1x128xf32, #tpu.memory_space<vmem>>, %arg9: memref<128x32xbf16, #tpu.memory_space<vmem>>, %arg10: memref<1x32xf32, #tpu.memory_space<vmem>>, %arg11: memref<1x8x32xf32, #tpu.memory_space<vmem>>) attributes {dimension_semantics = [#tpu.dimension_semantics<parallel>, #tpu.dimension_semantics<parallel>], iteration_bounds = array<i64: 2, 1>, scalar_prefetch = 0 : i64, scratch_operands = 0 : i64, tpu.core_type = #tpu.core_type<tc>, window_params = [{transform_indices = @transform_0, window_bounds = array<i64: 1, 8, 32>}, {transform_indices = @transform_1, window_bounds = array<i64: 1, 8, 32>}, {transform_indices = @transform_2, window_bounds = array<i64: 1, 6, 32>}, {pipeline_mode = #tpu.pipeline_mode<synchronous>, transform_indices = @transform_3, window_bounds = array<i64: 32, 32>}, {pipeline_mode = #tpu.pipeline_mode<synchronous>, transform_indices = @transform_4, window_bounds = array<i64: 1, 32>}, {pipeline_mode = #tpu.pipeline_mode<synchronous>, transform_indices = @transform_5, window_bounds = array<i64: 32, 128>}, {pipeline_mode = #tpu.pipeline_mode<synchronous>, transform_indices = @transform_6, window_bounds = array<i64: 1, 128>}, {pipeline_mode = #tpu.pipeline_mode<synchronous>, transform_indices = @transform_7, window_bounds = array<i64: 128, 32>}, {pipeline_mode = #tpu.pipeline_mode<synchronous>, transform_indices = @transform_8, window_bounds = array<i64: 1, 32>}, {transform_indices = @transform_9, window_bounds = array<i64: 1, 8, 32>}]} {
    %c0 = arith.constant 0 : index
    %c0_0 = arith.constant 0 : index
    %c0_1 = arith.constant 0 : index
    %0 = vector.load %arg2[%c0, %c0_0, %c0_1] : memref<1x8x32xf32, #tpu.memory_space<vmem>>, vector<1x8x32xf32>
    %1 = vector.shape_cast %0 : vector<1x8x32xf32> to vector<8x32xf32>
    %c0_2 = arith.constant 0 : index
    %c0_3 = arith.constant 0 : index
    %c0_4 = arith.constant 0 : index
    %2 = vector.load %arg4[%c0_2, %c0_3, %c0_4] : memref<1x6x32xf32, #tpu.memory_space<vmem>>, vector<1x6x32xf32>
    %3 = vector.shape_cast %2 : vector<1x6x32xf32> to vector<6x32xf32>
    %4 = vector.extract_strided_slice %3 {offsets = [2, 0], sizes = [1, 32], strides = [1, 1]} : vector<6x32xf32> to vector<1x32xf32>
    %5 = vector.extract_strided_slice %3 {offsets = [3, 0], sizes = [1, 32], strides = [1, 1]} : vector<6x32xf32> to vector<1x32xf32>
    %6 = vector.extract_strided_slice %3 {offsets = [4, 0], sizes = [1, 32], strides = [1, 1]} : vector<6x32xf32> to vector<1x32xf32>
    %7 = vector.extract_strided_slice %3 {offsets = [5, 0], sizes = [1, 32], strides = [1, 1]} : vector<6x32xf32> to vector<1x32xf32>
    %c0_5 = arith.constant 0 : index
    %c0_6 = arith.constant 0 : index
    %c0_7 = arith.constant 0 : index
    %8 = vector.load %arg3[%c0_5, %c0_6, %c0_7] : memref<1x8x32xbf16, #tpu.memory_space<vmem>>, vector<1x8x32xbf16>
    %9 = vector.shape_cast %8 : vector<1x8x32xbf16> to vector<8x32xbf16>
    %c0_8 = arith.constant 0 : index
    %c0_9 = arith.constant 0 : index
    %10 = vector.load %arg5[%c0_8, %c0_9] : memref<32x32xbf16, #tpu.memory_space<vmem>>, vector<32x32xbf16>
    %cst = arith.constant dense<0.000000e+00> : vector<8x32xf32>
    %11 = tpu.matmul %9, %10, %cst {dimension_numbers = #tpu.dot_dimension_numbers<[1], [0], [0], [1], [0, 0, 1, 1], [], []>} : vector<8x32xbf16>, vector<32x32xbf16>, vector<8x32xf32> -> vector<8x32xf32>
    %c0_10 = arith.constant 0 : index
    %c0_11 = arith.constant 0 : index
    %12 = vector.load %arg6[%c0_10, %c0_11] : memref<1x32xf32, #tpu.memory_space<vmem>>, vector<1x32xf32>
    %13 = vector.broadcast %12 : vector<1x32xf32> to vector<8x32xf32>
    %14 = arith.addf %11, %13 : vector<8x32xf32>
    %15 = vector.broadcast %4 : vector<1x32xf32> to vector<8x32xf32>
    %16 = arith.mulf %15, %14 : vector<8x32xf32>
    %17 = arith.addf %1, %16 : vector<8x32xf32>
    %cst_12 = arith.constant dense<0.000000e+00> : vector<8xf32>
    %18 = vector.multi_reduction <add>, %17, %cst_12 [1] : vector<8x32xf32> to vector<8xf32>
    %19 = vector.shape_cast %18 : vector<8xf32> to vector<8x1xf32>
    %cst_13 = arith.constant 3.200000e+01 : f32
    %20 = vector.broadcast %cst_13 : f32 to vector<8x1xf32>
    %21 = arith.divf %19, %20 : vector<8x1xf32>
    %22 = vector.broadcast %21 : vector<8x1xf32> to vector<8x32xf32>
    %23 = arith.subf %17, %22 : vector<8x32xf32>
    %24 = arith.mulf %23, %23 : vector<8x32xf32>
    %cst_14 = arith.constant dense<0.000000e+00> : vector<8xf32>
    %25 = vector.multi_reduction <add>, %24, %cst_14 [1] : vector<8x32xf32> to vector<8xf32>
    %26 = vector.shape_cast %25 : vector<8xf32> to vector<8x1xf32>
    %cst_15 = arith.constant 3.200000e+01 : f32
    %27 = vector.broadcast %cst_15 : f32 to vector<8x1xf32>
    %28 = arith.divf %26, %27 : vector<8x1xf32>
    %cst_16 = arith.constant 9.99999997E-7 : f32
    %29 = vector.broadcast %cst_16 : f32 to vector<8x1xf32>
    %30 = arith.addf %28, %29 : vector<8x1xf32>
    %31 = math.rsqrt %30 : vector<8x1xf32>
    %32 = vector.broadcast %31 : vector<8x1xf32> to vector<8x32xf32>
    %33 = arith.mulf %23, %32 : vector<8x32xf32>
    %cst_17 = arith.constant 1.000000e+00 : f32
    %34 = vector.broadcast %cst_17 : f32 to vector<1x32xf32>
    %35 = arith.addf %34, %6 : vector<1x32xf32>
    %36 = vector.broadcast %35 : vector<1x32xf32> to vector<8x32xf32>
    %37 = arith.mulf %33, %36 : vector<8x32xf32>
    %38 = vector.broadcast %5 : vector<1x32xf32> to vector<8x32xf32>
    %39 = arith.addf %37, %38 : vector<8x32xf32>
    %40 = arith.truncf %39 : vector<8x32xf32> to vector<8x32xbf16>
    %c0_18 = arith.constant 0 : index
    %c0_19 = arith.constant 0 : index
    %41 = vector.load %arg7[%c0_18, %c0_19] : memref<32x128xbf16, #tpu.memory_space<vmem>>, vector<32x128xbf16>
    %cst_20 = arith.constant dense<0.000000e+00> : vector<8x128xf32>
    %42 = tpu.matmul %40, %41, %cst_20 {dimension_numbers = #tpu.dot_dimension_numbers<[1], [0], [0], [1], [0, 0, 1, 1], [], []>} : vector<8x32xbf16>, vector<32x128xbf16>, vector<8x128xf32> -> vector<8x128xf32>
    %c0_21 = arith.constant 0 : index
    %c0_22 = arith.constant 0 : index
    %43 = vector.load %arg8[%c0_21, %c0_22] : memref<1x128xf32, #tpu.memory_space<vmem>>, vector<1x128xf32>
    %44 = vector.broadcast %43 : vector<1x128xf32> to vector<8x128xf32>
    %45 = arith.addf %42, %44 : vector<8x128xf32>
    %cst_23 = arith.constant 5.000000e-01 : f32
    %46 = vector.broadcast %cst_23 : f32 to vector<8x128xf32>
    %47 = arith.mulf %46, %45 : vector<8x128xf32>
    %cst_24 = arith.constant 4.471500e-02 : f32
    %48 = vector.broadcast %cst_24 : f32 to vector<8x128xf32>
    %49 = arith.mulf %48, %45 : vector<8x128xf32>
    %50 = arith.mulf %49, %45 : vector<8x128xf32>
    %51 = arith.mulf %50, %45 : vector<8x128xf32>
    %52 = arith.addf %45, %51 : vector<8x128xf32>
    %cst_25 = arith.constant 0.797884583 : f32
    %53 = vector.broadcast %cst_25 : f32 to vector<8x128xf32>
    %54 = arith.mulf %53, %52 : vector<8x128xf32>
    %55 = math.tanh %54 : vector<8x128xf32>
    %cst_26 = arith.constant 1.000000e+00 : f32
    %56 = vector.broadcast %cst_26 : f32 to vector<8x128xf32>
    %57 = arith.addf %56, %55 : vector<8x128xf32>
    %58 = arith.mulf %47, %57 : vector<8x128xf32>
    %59 = arith.truncf %58 : vector<8x128xf32> to vector<8x128xbf16>
    %c0_27 = arith.constant 0 : index
    %c0_28 = arith.constant 0 : index
    %60 = vector.load %arg9[%c0_27, %c0_28] : memref<128x32xbf16, #tpu.memory_space<vmem>>, vector<128x32xbf16>
    %cst_29 = arith.constant dense<0.000000e+00> : vector<8x32xf32>
    %61 = tpu.matmul %59, %60, %cst_29 {dimension_numbers = #tpu.dot_dimension_numbers<[1], [0], [0], [1], [0, 0, 1, 1], [], []>} : vector<8x128xbf16>, vector<128x32xbf16>, vector<8x32xf32> -> vector<8x32xf32>
    %c0_30 = arith.constant 0 : index
    %c0_31 = arith.constant 0 : index
    %62 = vector.load %arg10[%c0_30, %c0_31] : memref<1x32xf32, #tpu.memory_space<vmem>>, vector<1x32xf32>
    %63 = vector.broadcast %62 : vector<1x32xf32> to vector<8x32xf32>
    %64 = arith.addf %61, %63 : vector<8x32xf32>
    %65 = vector.broadcast %7 : vector<1x32xf32> to vector<8x32xf32>
    %66 = arith.mulf %65, %64 : vector<8x32xf32>
    %67 = arith.addf %17, %66 : vector<8x32xf32>
    %c0_32 = arith.constant 0 : index
    %c0_33 = arith.constant 0 : index
    %c0_34 = arith.constant 0 : index
    %68 = vector.load %arg11[%c0_32, %c0_33, %c0_34] : memref<1x8x32xf32, #tpu.memory_space<vmem>>, vector<1x8x32xf32>
    %69 = vector.shape_cast %68 : vector<1x8x32xf32> to vector<8x32xf32>
    %70 = vector.shape_cast %67 : vector<8x32xf32> to vector<1x8x32xf32>
    tpu.vector_store %arg11[%c0_32, %c0_33, %c0_34], %70 {strides = array<i32>} : memref<1x8x32xf32, #tpu.memory_space<vmem>>, vector<1x8x32xf32>,
    return
  }
  func.func @transform_0(%arg0: i32, %arg1: i32) -> (i32, i32, i32) {
    %c0_i32 = arith.constant 0 : i32
    %c0_i32_0 = arith.constant 0 : i32
    return %arg0, %arg1, %c0_i32 : i32, i32, i32
  }
  func.func @transform_1(%arg0: i32, %arg1: i32) -> (i32, i32, i32) {
    %c0_i32 = arith.constant 0 : i32
    %c0_i32_0 = arith.constant 0 : i32
    return %arg0, %arg1, %c0_i32 : i32, i32, i32
  }
  func.func @transform_2(%arg0: i32, %arg1: i32) -> (i32, i32, i32) {
    %c0_i32 = arith.constant 0 : i32
    %c0_i32_0 = arith.constant 0 : i32
    %c0_i32_1 = arith.constant 0 : i32
    return %arg0, %c0_i32, %c0_i32_0 : i32, i32, i32
  }
  func.func @transform_3(%arg0: i32, %arg1: i32) -> (i32, i32) {
    %c0_i32 = arith.constant 0 : i32
    %c0_i32_0 = arith.constant 0 : i32
    %c0_i32_1 = arith.constant 0 : i32
    return %c0_i32, %c0_i32_0 : i32, i32
  }
  func.func @transform_4(%arg0: i32, %arg1: i32) -> (i32, i32) {
    %c0_i32 = arith.constant 0 : i32
    %c0_i32_0 = arith.constant 0 : i32
    %c0_i32_1 = arith.constant 0 : i32
    return %c0_i32, %c0_i32_0 : i32, i32
  }
  func.func @transform_5(%arg0: i32, %arg1: i32) -> (i32, i32) {
    %c0_i32 = arith.constant 0 : i32
    %c0_i32_0 = arith.constant 0 : i32
    %c0_i32_1 = arith.constant 0 : i32
    return %c0_i32, %c0_i32_0 : i32, i32
  }
  func.func @transform_6(%arg0: i32, %arg1: i32) -> (i32, i32) {
    %c0_i32 = arith.constant 0 : i32
    %c0_i32_0 = arith.constant 0 : i32
    %c0_i32_1 = arith.constant 0 : i32
    return %c0_i32, %c0_i32_0 : i32, i32
  }
  func.func @transform_7(%arg0: i32, %arg1: i32) -> (i32, i32) {
    %c0_i32 = arith.constant 0 : i32
    %c0_i32_0 = arith.constant 0 : i32
    %c0_i32_1 = arith.constant 0 : i32
    return %c0_i32, %c0_i32_0 : i32, i32
  }
  func.func @transform_8(%arg0: i32, %arg1: i32) -> (i32, i32) {
    %c0_i32 = arith.constant 0 : i32
    %c0_i32_0 = arith.constant 0 : i32
    %c0_i32_1 = arith.constant 0 : i32
    return %c0_i32, %c0_i32_0 : i32, i32
  }
  func.func @transform_9(%arg0: i32, %arg1: i32) -> (i32, i32, i32) {
    %c0_i32 = arith.constant 0 : i32
    %c0_i32_0 = arith.constant 0 : i32
    return %arg0, %arg1, %c0_i32 : i32, i32, i32
  }
}

</mosaic_0001>

<bundles_post_ra>
// kernel: joint_transformer_block.6
= control target key start
LH: loop header
LB: loop body
LE: loop exit
PB: predicated region body
PF: predicated region fallthrough
CT: control target
= control target key end

     0   :  { %12 = vsyncpa [#allocation3], 0  ;;  %s644_s0 = inlined_call_operand.hbm [shape: f32[2,32], index: 0, kind: input, shape index: {}]   ;;  %s645_s1 = inlined_call_operand.hbm [shape: bf16[32,192], index: 1, kind: input, shape index: {}]   ;;  %s646_s2 = inlined_call_operand.hbm [shape: f32[1,192], index: 2, kind: input, shape index: {}]   ;;  %s647_s3 = inlined_call_operand.hbm [shape: bf16[32,192], index: 3, kind: input, shape index: {}]   ;;  %s648_s4 = inlined_call_operand.hbm [shape: f32[1,192], index: 4, kind: input, shape index: {}]   ;;  %s649_s5 = inlined_call_operand.hbm [shape: f32[2,192], index: 5, kind: output, shape index: {0}]   ;;  %s650_s6 = inlined_call_operand.hbm [shape: f32[2,192], index: 6, kind: output, shape index: {1}]  }
   0x1   :  { %13 = vsyncpa [#allocation6], 0 }
   0x2   :  { %14 = vsyncpa [#allocation9], 0 }
   0x3   :  { %15 = vsyncpa [#allocation4], 0 }
   0x4   :  { %16 = vsyncpa [#allocation13], 0  ;;  %s514_s21 = smov [#allocation5]   ;;  %s350_s25 = scalar_lea.hbm %s645_s1, 512 }
   0x5   :  { %s32_s22 = sshll.u32 %s514_s21, 4  ;;  %p351_p0 = scmp.ne.s32.totalorder %s645_s1, %s350_s25  ;;  %s33_s22 = int_to_ptr.vmem [resolvable:$true] %s32_s22 }
   0x6   :  { %p354_p1 = scmp.lt.u32.totalorder %s350_s25, %s645_s1 }
   0x8   :  { %p356_p2 = pnand %p354_p1, %p351_p0 }
   0xa   :  { %359 = shalt.err (!%p356_p2)
}
   0xb   :  { %s360_s30 = scalar_lea.vmem %s33_s22, 512  ;;  %p365_p4 = scmp.lt.s32.totalorder %s33_s22, %s33_s22 }
   0xc   :  { %p361_p3 = scmp.ne.s32.totalorder %s33_s22, %s360_s30  ;;  %p366_p5 = scmp.lt.s32.totalorder %s360_s30, %s360_s30 }
   0xe   :  { %p367_p6 = por %p366_p5, %p365_p4 }
  0x10   :  { %p368_p7 = pnand %p367_p6, %p361_p3 }
  0x12   :  { %371 = shalt.err (!%p368_p7)
}
  0x13   :  { %s515_s7 = smov 128   ;;  %s516_s8 = smov 8  }
  0x14   :  { %38 = dma.hbm_to_vmem [thread:$0]  %s645_s1, 512, %s33_s22, [#allocation6], %s515_s7, %s515_s7, %s516_s8  }
  0x15   :  { %s517_s11 = smov [#allocation8]   ;;  %s518_s13 = smov [#allocation2]  }
  0x16   :  { %s54_s12 = sshll.u32 %s517_s11, 4  ;;  %s23_s14 = sshll.u32 %s518_s13, 4  ;;  %s55_s12 = int_to_ptr.vmem [resolvable:$true] %s54_s12  ;;  %s24_s14 = int_to_ptr.vmem [resolvable:$true] %s23_s14 }
  0x17   :  { %s372_s17 = scalar_lea.hbm %s647_s3, 512 }
  0x18   :  { %p373_p8 = scmp.ne.s32.totalorder %s647_s3, %s372_s17  ;;  %p376_p9 = scmp.lt.u32.totalorder %s372_s17, %s647_s3 }
  0x1a   :  { %p378_p10 = pnand %p376_p9, %p373_p8 }
  0x1c   :  { %381 = shalt.err (!%p378_p10)
}
  0x1d   :  { %s382_s1 = scalar_lea.vmem %s55_s12, 512  ;;  %p387_p12 = scmp.lt.s32.totalorder %s55_s12, %s55_s12 }
  0x1e   :  { %p383_p11 = scmp.ne.s32.totalorder %s55_s12, %s382_s1  ;;  %p388_p13 = scmp.lt.s32.totalorder %s382_s1, %s382_s1 }
  0x20   :  { %p389_p0 = por %p388_p13, %p387_p12 }
  0x22   :  { %p390_p1 = pnand %p389_p0, %p383_p11 }
  0x24   :  { %393 = shalt.err (!%p390_p1)
}
  0x25   :  { %60 = dma.hbm_to_vmem [thread:$0]  %s647_s3, 512, %s55_s12, [#allocation9], %s515_s7, %s515_s7, %s516_s8  }
  0x26   :  { %s394_s26 = scalar_lea.hbm %s644_s0, 32 }
  0x27   :  { %p395_p2 = scmp.ne.s32.totalorder %s644_s0, %s394_s26  ;;  %p398_p3 = scmp.lt.u32.totalorder %s394_s26, %s644_s0 }
  0x29   :  { %p400_p4 = pnand %p398_p3, %p395_p2 }
  0x2b   :  { %403 = shalt.err (!%p400_p4)
}
  0x2c   :  { %s404_s9 = scalar_lea.vmem %s24_s14, 32  ;;  %p409_p6 = scmp.lt.s32.totalorder %s24_s14, %s24_s14 }
  0x2d   :  { %p405_p5 = scmp.ne.s32.totalorder %s24_s14, %s404_s9  ;;  %p410_p7 = scmp.lt.s32.totalorder %s404_s9, %s404_s9 }
  0x2f   :  { %p411_p8 = por %p410_p7, %p409_p6 }
  0x31   :  { %p412_p9 = pnand %p411_p8, %p405_p5 }
  0x33   :  { %415 = shalt.err (!%p412_p9)
}
  0x34   :  { %26 = dma.hbm_to_vmem [thread:$0]  %s644_s0, 32, %s24_s14, [#allocation3]  }
  0x35   :  { %s519_s8 = smov [#allocation7]   ;;  %s520_s11 = smov [#allocation10]  }
  0x36   :  { %s45_s10 = sshll.u32 %s519_s8, 4  ;;  %s67_s12 = sshll.u32 %s520_s11, 4  ;;  %s46_s10 = int_to_ptr.vmem [resolvable:$true] %s45_s10  ;;  %s68_s12 = int_to_ptr.vmem [resolvable:$true] %s67_s12 }
  0x37   :  { %s416_s16 = scalar_lea.hbm %s646_s2, 32 }
  0x38   :  { %p417_p10 = scmp.ne.s32.totalorder %s646_s2, %s416_s16  ;;  %p420_p11 = scmp.lt.u32.totalorder %s416_s16, %s646_s2 }
  0x3a   :  { %p422_p12 = pnand %p420_p11, %p417_p10 }
  0x3c   :  { %425 = shalt.err (!%p422_p12)
}
  0x3d   :  { %s426_s0 = scalar_lea.vmem %s46_s10, 32  ;;  %p431_p0 = scmp.lt.s32.totalorder %s46_s10, %s46_s10 }
  0x3e   :  { %p427_p13 = scmp.ne.s32.totalorder %s46_s10, %s426_s0  ;;  %p432_p1 = scmp.lt.s32.totalorder %s426_s0, %s426_s0 }
  0x40   :  { %p433_p2 = por %p432_p1, %p431_p0 }
  0x42   :  { %p434_p3 = pnand %p433_p2, %p427_p13 }
  0x44   :  { %437 = shalt.err (!%p434_p3)
}
  0x45   :  { %48 = dma.hbm_to_vmem [thread:$0]  %s646_s2, 32, %s46_s10, [#allocation6]  }
  0x46   :  { %s438_s23 = scalar_lea.hbm %s648_s4, 32 }
  0x47   :  { %p439_p4 = scmp.ne.s32.totalorder %s648_s4, %s438_s23  ;;  %p442_p5 = scmp.lt.u32.totalorder %s438_s23, %s648_s4 }
  0x49   :  { %p444_p6 = pnand %p442_p5, %p439_p4 }
  0x4b   :  { %447 = shalt.err (!%p444_p6)
}
  0x4c   :  { %s448_s28 = scalar_lea.vmem %s68_s12, 32  ;;  %p453_p8 = scmp.lt.s32.totalorder %s68_s12, %s68_s12 }
  0x4d   :  { %p449_p7 = scmp.ne.s32.totalorder %s68_s12, %s448_s28  ;;  %p454_p9 = scmp.lt.s32.totalorder %s448_s28, %s448_s28 }
  0x4f   :  { %p455_p10 = por %p454_p9, %p453_p8 }
  0x51   :  { %p456_p11 = pnand %p455_p10, %p449_p7 }
  0x53   :  { %459 = shalt.err (!%p456_p11)
}
  0x54   :  { %70 = dma.hbm_to_vmem [thread:$0]  %s648_s4, 32, %s68_s12, [#allocation9]  }
  0x55   :  { %504 = dma.done.wait [#allocation3], 32  }
  0x56   :  { %505 = vsyncadd [#allocation3], 4294967264 }
  0x57   :  { %506 = dma.done.wait [#allocation6], 544  }
  0x58   :  { %507 = vsyncadd [#allocation6], 4294966752 }
  0x59   :  { %508 = dma.done.wait [#allocation9], 544  }
  0x5a   :  { %509 = vsyncadd [#allocation9], 4294966752  ;;  %v521_v0 = vmov 0   ;;  %v334_v1 = vld [vmem:[#allocation5 + $0x4] ss:$8 sps:$4 sm:$0xff]   ;;  %vm132_vm0 = vcmask 261120   ;;  %v102_v16 = vlaneseq }
  0x5b   :  { %168 = vmatprep.mubr.bf16.mxu0 %v521_v0  ;;  %260 = vmatprep.mubr.bf16.mxu1 %v521_v0  ;;  %v336_v2 = vld [vmem:[#allocation8 + $0x4] ss:$8 sps:$4 sm:$0xff]   ;;  %v339_v4 = vld [vmem:[#allocation8] ss:$8 sps:$4 sm:$0xff]   ;;  %v340_v5 = vld [vmem:[#allocation5 + $0x14] ss:$8 sps:$4 sm:$0xff]  }
  0x5c   :  { %136 = vmatprep.subr.bf16.mxu0 %v334_v1  ;;  %v338_v3 = vld [vmem:[#allocation5] ss:$8 sps:$4 sm:$0xff]   ;;  %228 = vmatprep.subr.bf16.mxu1 %v336_v2  ;;  %v344_v7 = vld [vmem:[#allocation5 + $0x10] ss:$8 sps:$4 sm:$0xff]   ;;  %v87_v9 = vld [vmem:[#allocation2] sm:$0x3] }
  0x5d   :  { %137 = vmatpush1.bf16.msra.mxu0 %v338_v3  ;;  %229 = vmatpush1.bf16.msra.mxu1 %v339_v4  ;;  %v342_v6 = vld [vmem:[#allocation8 + $0x14] ss:$8 sps:$4 sm:$0xff]   ;;  %v345_v8 = vld [vmem:[#allocation8 + $0x10] ss:$8 sps:$4 sm:$0xff]   ;;  %v312_v10 = vmul.f32 -1.442695, %v87_v9 }
  0x5e   :  { %138 = vmatprep.subr.bf16.mxu0 %v340_v5  ;;  %230 = vmatprep.subr.bf16.mxu1 %v342_v6  ;;  %v103_v17 = vshrl.u32 %v102_v16, 7  ;;  %v522_v19 = vmov 1983009808   ;;  %v100_v21 = vld [vmem:[#allocation7] sm:$0x3]  ;;  %vm188_vm1 = vcmask 1041408  }
  0x5f   :  { %346 = vpow2.f32 %v312_v10  ;;  %v181_v20 = vunpack.c.l.s4 %v522_v19  ;;  %v196_v22 = vld [vmem:[#allocation10] sm:$0x3]  ;;  %vm189_vm2 = vcmask 519170   ;;  %s523_s4 = smov [#allocation11]   ;;  %s524_s9 = smov [#allocation12]  }
  0x60   :  { %v104_v18 = vsub.s32 0, %v103_v17  ;;  %v108_v23 = vsub.s32 1, %v103_v17  ;;  %s287_s30 = sshll.u32 %s523_s4, 4  ;;  %s297_s3 = sshll.u32 %s524_s9, 4  ;;  %vm190_vm3 = vmor %vm189_vm2, %vm188_vm1  ;;  %s288_s30 = int_to_ptr.vmem [resolvable:$true] %s287_s30  ;;  %s298_s3 = int_to_ptr.vmem [resolvable:$true] %s297_s3 }
  0x61   :  { %139 = vmatpush1.bf16.msra.mxu0 %v344_v7  ;;  %231 = vmatpush1.bf16.msra.mxu1 %v345_v8  ;;  %v182_v26 = vunpack.c.0.s8 %v181_v20  ;;  %s460_s7 = scalar_lea.vmem %s288_s30, 64  ;;  %p465_p13 = scmp.lt.s32.totalorder %s288_s30, %s288_s30 }
  0x62   :  { %v105_v24 = vrot.slane %v100_v21, %v104_v18  ;;  %v201_v25 = vrot.slane %v196_v22, %v104_v18  ;;  %v109_v27 = vrot.slane %v100_v21, %v108_v23  ;;  %v205_v28 = vrot.slane %v196_v22, %v108_v23  ;;  %p461_p12 = scmp.ne.s32.totalorder %s288_s30, %s460_s7  ;;  %p466_p0 = scmp.lt.s32.totalorder %s460_s7, %s460_s7 }
  0x63   :  { %v185_v34 = vsub.s32 %v182_v26, %v103_v17 }
  0x64   :  { %p467_p1 = por %p466_p0, %p465_p13 }
  0x66   :  { %p468_p2 = pnand %p467_p1, %p461_p12 }
  0x69   :  { %v347_v11 = vpop.eup %346 }
  0x6a   :  { %v91_v12 = vadd.f32 1.0, %v347_v11 }
  0x6c   :  { %348 = vrcp.f32 %v91_v12 }
  0x76   :  { %v349_v13 = vpop.eup %348 }
  0x77   :  { %v94_v14 = vmul.f32 %v349_v13, %v87_v9 }
  0x79   :  { %v95_v15 = vpack.c.bf16 %v94_v14, %v94_v14 }
  0x7b   :  { %317 = vmatmul.mubr.msk.bf16.vlgmr.msra.gmra.mrb[0].mxu0 %vm132_vm0, %v95_v15  ;;  %322 = vmatmul.mubr.msk.bf16.vlgmr.msra.gmra.mrb[0].mxu1 %vm132_vm0, %v95_v15 }
 0x14e   :  { %v170_v29 = vpop.f32.mrb[0].mxu0  ;;  %v262_v30 = vpop.f32.mrb[0].mxu1 }
 0x14f   :  { %v171_v31 = vadd.f32 %v170_v29, %v105_v24  ;;  %v263_v32 = vadd.f32 %v262_v30, %v201_v25  ;;  %v172_v33 = vpop.f32.mrb[1].mxu0  ;;  %v264_v35 = vpop.f32.mrb[1].mxu1 }
 0x150   :  { %v173_v36 = vadd.f32 %v172_v33, %v109_v27  ;;  %v265_v37 = vadd.f32 %v264_v35, %v205_v28  ;;  %v174_v38 = vpop.f32.mrb[2].mxu0  ;;  %v266_v39 = vpop.f32.mrb[2].mxu1 }
 0x151   :  { %v175_v40 = vpop.f32.mrb[3].mxu0  ;;  %v267_v41 = vpop.f32.mrb[3].mxu1 }
 0x152   :  { %v179_v42 = vcombine.low %v171_v31, %v173_v36  ;;  %v271_v43 = vcombine.low %v263_v32, %v265_v37 }
 0x154   :  { %v186_v44 = vrot.slane %v179_v42, %v185_v34  ;;  %v278_v45 = vrot.slane %v271_v43, %v185_v34 }
 0x156   :  { %191 = vst.msk [vmem:[#allocation11] sm:$0xf] %vm190_vm3, %v186_v44  ;;  %280 = vst.msk [vmem:[#allocation12] sm:$0xf] %vm190_vm3, %v278_v45 }
 0x157   :  { %471 = shalt.err (!%p468_p2)
}
 0x158   :  { %s472_s11 = scalar_lea.hbm %s649_s5, 64 }
 0x159   :  { %p473_p3 = scmp.ne.s32.totalorder %s649_s5, %s472_s11  ;;  %p476_p4 = scmp.lt.u32.totalorder %s472_s11, %s649_s5 }
 0x15b   :  { %p478_p5 = pnand %p476_p4, %p473_p3 }
 0x15d   :  { %481 = shalt.err (!%p478_p5)
}
 0x15e   :  { %290 = dma.vmem_to_hbm [thread:$0]  %s288_s30, 64, %s649_s5, [#allocation4]  }
 0x15f   :  { %s482_s19 = scalar_lea.vmem %s298_s3, 64  ;;  %p487_p7 = scmp.lt.s32.totalorder %s298_s3, %s298_s3 }
 0x160   :  { %p483_p6 = scmp.ne.s32.totalorder %s298_s3, %s482_s19  ;;  %p488_p8 = scmp.lt.s32.totalorder %s482_s19, %s482_s19 }
 0x162   :  { %p489_p9 = por %p488_p8, %p487_p7 }
 0x164   :  { %p490_p10 = pnand %p489_p9, %p483_p6 }
 0x166   :  { %493 = shalt.err (!%p490_p10)
}
 0x167   :  { %s494_s14 = scalar_lea.hbm %s650_s6, 64 }
 0x168   :  { %p495_p11 = scmp.ne.s32.totalorder %s650_s6, %s494_s14  ;;  %p498_p12 = scmp.lt.u32.totalorder %s494_s14, %s650_s6 }
 0x16a   :  { %p500_p13 = pnand %p498_p12, %p495_p11 }
 0x16c   :  { %503 = shalt.err (!%p500_p13)
}
 0x16d   :  { %300 = dma.vmem_to_hbm [thread:$0]  %s298_s3, 64, %s650_s6, [#allocation13]  }
 0x16e   :  { %510 = dma.done.wait [#allocation4], 64  }
 0x16f   :  { %511 = vsyncadd [#allocation4], 4294967232 }
 0x170   :  { %512 = dma.done.wait [#allocation13], 64  }
 0x171   :  { %513 = vsyncadd [#allocation13], 4294967232 }
 0x172   :  { %307 = vsyncpa [#allocation3], 1 }
 0x173   :  { %308 = vsyncpa [#allocation6], 1 }
 0x174   :  { %309 = vsyncpa [#allocation9], 1 }
 0x175   :  { %310 = vsyncpa [#allocation4], 1 }
 0x176   :  { %311 = vsyncpa [#allocation13], 1 }

// kernel: joint_transformer_block.7
= control target key start
LH: loop header
LB: loop body
LE: loop exit
PB: predicated region body
PF: predicated region fallthrough
CT: control target
= control target key end

     0   :  { %s1370_s0 = inlined_call_operand.hbm [shape: f32[2,16,32], index: 0, kind: input, shape index: {}]   ;;  %s1371_s1 = inlined_call_operand.hbm [shape: f32[2,6,32], index: 1, kind: input, shape index: {}]   ;;  %s1372_s2 = inlined_call_operand.hbm [shape: bf16[32,96], index: 2, kind: input, shape index: {}]   ;;  %s1373_s3 = inlined_call_operand.hbm [shape: f32[1,96], index: 3, kind: input, shape index: {}]   ;;  %s1374_s4 = inlined_call_operand.hbm [shape: bf16[2,16,96], index: 4, kind: output, shape index: {}]  }
   0x1   :  { %1385 = sst [smem:[#allocation19_spill]] %s1372_s2 }
   0x2   :  { %1386 = sst [smem:[#allocation20_spill]] %s1373_s3 }
   0x3   :  { %1387 = sst [smem:[#allocation21_spill]] %s1374_s4 }
   0x4   :  { %9 = vsyncpa [#allocation3], 0 }
   0x5   :  { %11 = vsyncpa [#allocation3 + $0x1], 0 }
   0x6   :  { %12 = vsyncpa [#allocation6], 0 }
   0x7   :  { %14 = vsyncpa [#allocation6 + $0x1], 0 }
   0x8   :  { %15 = vsyncpa [#allocation9], 0 }
   0x9   :  { %16 = vsyncpa [#allocation4], 0 }
   0xa   :  { %18 = vsyncpa [#allocation4 + $0x1], 0  ;;  %s996_s15 = smov 0   ;;  %s998_s16 = smov 0  }
   0xb   :  { %s1000_s17 = smov 0   ;;  %s1002_s18 = smov 0  }
   0xc   :  { %s1004_s19 = smov 0   ;;  %s1006_s20 = smov 0  }
   0xd   :  { %s1008_s21 = smov 0   ;;  %s1010_s22 = smov 0  }
   0xe   :  { %s1012_s23 = smov 0   ;;  %s1014_s24 = smov 0  }
   0xf   :  { %s1016_s25 = smov 0  }
  0x10 LB: > { %1388 = sst [smem:[#allocation16_spill]] %s932_s18  ;;  %s1052_s26 = sadd.s32 4294967295, %s960_s25   ;;  %s960_s25 = sphi %s1016_s25, %s24_s25   ;;  %s956_s24 = sphi %s1014_s24, %s1429_s24   ;;  %s952_s23 = sphi %s1012_s23, %s1428_s23   ;;  %s948_s22 = sphi %s1010_s22, %s1427_s22   ;;  %s944_s21 = sphi %s1008_s21, %s1426_s21   ;;  %s940_s20 = sphi %s1006_s20, %s1425_s20   ;;  %s936_s19 = sphi %s1004_s19, %s1424_s19   ;;  %s932_s18 = sphi %s1002_s18, %s1423_s18   ;;  %s928_s17 = sphi %s1000_s17, %s1422_s17   ;;  %s924_s16 = sphi %s998_s16, %s1421_s16   ;;  %s920_s15 = sphi %s996_s15, %s1420_s15  }
  0x11   : > { %p539_p0 = scmp.ge.s32.totalorder %s960_s25, 1  ;;  %p1375_p1 = scmp.eq.s32.totalorder %s1052_s26, 0 }
  0x12   : > { %p165_p2 = scmp.lt.s32.totalorder %s960_s25, 5  ;;  %s962_s28 = smov [#allocation7]  }
  0x13   : > { %s177_s29 = sshll.u32 %s962_s28, 4  ;;  %s963_s5 = smov [#allocation8]   ;;  %s178_s29 = int_to_ptr.vmem [resolvable:$true] %s177_s29 }
  0x14   : > { %p1057_p3 = pnand %p539_p0, %p165_p2  ;;  %s191_s6 = sshll.u32 %s963_s5, 4  ;;  %s1069_s6 = int_to_ptr.vmem [resolvable:$true] %s191_s6 }
  0x15   : > { %s1391_s2 = sld [smem:[#allocation19_spill]] }
  0x16   : > { %s1389_s27 = scalar_select %p1057_p3, 1, 0 }
  0x17   : > { %p588_p4 = pneg %p1057_p3 }
  0x19   : > { %p1065_p5 = pnand %p588_p4, %p1375_p1 }
  0x1b   : > { %s710_s9 = scalar_lea.hbm %s1391_s2, 256  ;;  %p712_p7 = pneg %p1065_p5 }
  0x1c   : > { %p711_p6 = scmp.ne.s32.totalorder %s1391_s2, %s710_s9  ;;  %p717_p10 = scmp.lt.u32.totalorder %s710_s9, %s1391_s2 }
  0x1e   : > { %p713_p8 = pnand %p712_p7, %p711_p6 }
  0x20   : > { %p714_p9 = pneg %p713_p8 }
  0x22   : > { %p719_p11 = pnand %p717_p10, %p714_p9 }
  0x24   : > { %722 = shalt.err (!%p719_p11)
}
  0x25   : > { %s723_s14 = scalar_lea.vmem %s178_s29, 256  ;;  %p731_p2 = scmp.lt.s32.totalorder %s178_s29, %s178_s29 }
  0x26   : > { %p724_p12 = scmp.ne.s32.totalorder %s178_s29, %s723_s14  ;;  %p732_p4 = scmp.lt.s32.totalorder %s723_s14, %s723_s14 }
  0x28   : > { %p726_p13 = pnand %p724_p12, %p712_p7  ;;  %p733_p1 = por %p732_p4, %p731_p2 }
  0x2a   : > { %p727_p0 = pneg %p726_p13 }
  0x2c   : > { %p734_p3 = pnand %p733_p1, %p727_p0 }
  0x2e   : > { %737 = shalt.err (!%p734_p3)
}
  0x2f   : > { %s964_s28 = smov 64   ;;  %s965_s5 = smov 4  }
  0x30   : > { %591 = dma.hbm_to_vmem [thread:$0]  (!%p1065_p5), %s1391_s2, 256, %s178_s29, [#allocation6], %s964_s28, %s964_s28, %s965_s5  }
  0x31   : > { %s1392_s3 = sld [smem:[#allocation20_spill]] }
  0x37   : > { %s738_s11 = scalar_lea.hbm %s1392_s3, 16 }
  0x38   : > { %p739_p6 = scmp.ne.s32.totalorder %s1392_s3, %s738_s11  ;;  %p745_p8 = scmp.lt.u32.totalorder %s738_s11, %s1392_s3 }
  0x3a   : > { %p741_p1 = pnand %p739_p6, %p712_p7 }
  0x3c   : > { %p742_p3 = pneg %p741_p1 }
  0x3e   : > { %p747_p9 = pnand %p745_p8, %p742_p3 }
  0x40   : > { %750 = shalt.err (!%p747_p9)
}
  0x41   : > { %s751_s29 = scalar_lea.vmem %s1069_s6, 16  ;;  %s758_s28 = scalar_lea.vmem %s1069_s6, 32 }
  0x42   : > { %p752_p10 = scmp.ne.s32.totalorder %s1069_s6, %s751_s29  ;;  %p759_p13 = scmp.lt.s32.totalorder %s1069_s6, %s1069_s6 }
  0x43   : > { %p760_p0 = scmp.lt.s32.totalorder %s758_s28, %s751_s29 }
  0x44   : > { %p754_p11 = pnand %p752_p10, %p712_p7 }
  0x45   : > { %p761_p2 = por %p760_p0, %p759_p13 }
  0x46   : > { %p755_p12 = pneg %p754_p11 }
  0x48   : > { %p762_p4 = pnand %p761_p2, %p755_p12 }
  0x4a   : > { %765 = shalt.err (!%p762_p4)
}
  0x4b   : > { %594 = dma.hbm_to_vmem [thread:$0]  (!%p1065_p5), %s1392_s3, 16, %s1069_s6, [#allocation9]  }
  0x4c   : > { %s538_s30 = sadd.s32 4294967294, %s960_s25   ;;  %s33_s7 = sadd.s32 1, %s952_s23 }
  0x4d   : > { %p34_p7 = scmp.ge.s32.totalorder %s33_s7, 2  ;;  %s36_s8 = sadd.s32 1, %s956_s24 }
  0x4e   : > { %s45_s9 = sadd.s32 1, %s940_s20  ;;  %p52_p6 = scmp.ne.s32.totalorder %s940_s20, %s936_s19 }
  0x4f   : > { %s1431_s7 = smov (%p34_p7, %s33_s7), 0  ;;  %s1433_s8 = smov (!%p34_p7, %s36_s8), %s956_s24 }
  0x50   : > { %1393 = sst [smem:[#allocation17_spill]] %s1431_s7  ;;  %s41_s10 = ssub.s32 %s952_s23, %s1431_s7 }
  0x51   : > { %p1382_p1 = scmp.eq.s32.totalorder %s960_s25, 0  ;;  %p38_p3 = scmp.ge.s32.totalorder %s1433_s8, 2 }
  0x52   : > { %p58_p8 = scmp.ne.s32.totalorder %s936_s19, %s932_s18  ;;  %p152_p9 = scmp.eq.s32.totalorder %s1052_s26, 3 }
  0x53   : > { %p1135_p5 = por %p1382_p1, %p52_p6  ;;  %s1435_s8 = smov (%p38_p3, %s1433_s8), 0 }
  0x54   : > { %1395 = sst [smem:[#allocation18_spill]] %s1435_s8  ;;  %p1396_p10 = scmp.eq.s32.totalorder %s1052_s26, 0 }
  0x55   : > { %p1148_p12 = por %p152_p9, %p52_p6  ;;  %s1154_s13 = ssub.s32 %s956_s24, %s1435_s8 }
  0x56   : > { %p1144_p11 = por %p1396_p10, %p58_p8  ;;  %p158_p13 = scmp.eq.s32.totalorder %s538_s30, 3 }
  0x57   : > { %s1398_s12 = scalar_select %p1148_p12, 1, 0 }
  0x58   : > { %s42_s14 = sor.u32 %s41_s10, %s1154_s13  ;;  %p1158_p4 = por %p158_p13, %p58_p8 }
  0x59   : > { %p43_p2 = scmp.eq.s32.totalorder %s42_s14, 0  ;;  %p1381_p7 = scmp.lt.s32.totalorder %s960_s25, 4 }
  0x5a   : > { %s1399_s29 = scalar_select %p1158_p4, 1, 0 }
  0x5b   : > { %s202_s28 = sand.u32 1, %s940_s20   ;;  %s544_s2 = sshll.u32 %s956_s24, 1 }
  0x5c   : > { %s1165_s4 = scalar_select %p43_p2, %s940_s20, %s45_s9  }
  0x5d   : > { %s543_s5 = sshll.u32 %s202_s28, 3  ;;  %s211_s3 = sadd.s32 %s952_s23, %s544_s2 }
  0x5e   : > { %s206_s8 = scalar_lea.vmem [#allocation2], %s543_s5  ;;  %s545_s18 = sshll.u32 %s211_s3, 7 }
  0x5f   : > { %s215_s7 = sshll.u32 %s206_s8, 4  ;;  %s1174_s14 = scalar_lea.hbm %s1370_s0, %s545_s18  ;;  %s1169_s7 = int_to_ptr.vmem [resolvable:$true] %s215_s7 }
  0x60   : > { %p1180_p6 = pnand %p1381_p7, %p1135_p5  ;;  %s203_s2 = scalar_lea.sflag [#allocation3], %s202_s28 }
  0x61   : > { %s766_s3 = scalar_lea.hbm %s1174_s14, 128  ;;  %s771_s6 = scalar_lea.hbm %s1370_s0, 512 }
  0x62   : > { %p767_p3 = scmp.ne.s32.totalorder %s1174_s14, %s766_s3  ;;  %p768_p8 = pneg %p1180_p6 }
  0x63   : > { %p772_p5 = scmp.lt.u32.totalorder %s1174_s14, %s1370_s0  ;;  %p773_p13 = scmp.lt.u32.totalorder %s771_s6, %s766_s3 }
  0x64   : > { %p769_p9 = pnand %p768_p8, %p767_p3  ;;  %p775_p7 = scmp.lt.u32.totalorder %s766_s3, %s1174_s14 }
  0x65   : > { %p774_p2 = por %p773_p13, %p772_p5 }
  0x66   : > { %p770_p10 = pneg %p769_p9 }
  0x67   : > { %p776_p1 = por %p775_p7, %p774_p2 }
  0x69   : > { %p777_p0 = pnand %p776_p1, %p770_p10 }
  0x6b   : > { %780 = shalt.err (!%p777_p0)
}
  0x6c   : > { %s781_s28 = scalar_lea.vmem %s1169_s7, 128  ;;  %s966_s10 = smov [#allocation2]  }
  0x6d   : > { %p782_p3 = scmp.ne.s32.totalorder %s1169_s7, %s781_s28  ;;  %s786_s18 = sshll.u32 %s966_s10, 4  ;;  %s787_s18 = int_to_ptr.vmem [resolvable:$false] %s786_s18 }
  0x6e   : > { %s788_s8 = scalar_lea.vmem %s787_s18, 256  ;;  %p789_p12 = scmp.lt.s32.totalorder %s1169_s7, %s787_s18 }
  0x6f   : > { %p784_p9 = pnand %p782_p3, %p768_p8  ;;  %p790_p5 = scmp.lt.s32.totalorder %s788_s8, %s781_s28 }
  0x71   : > { %p785_p4 = pneg %p784_p9  ;;  %p791_p13 = por %p790_p5, %p789_p12 }
  0x73   : > { %p792_p7 = pnand %p791_p13, %p785_p4 }
  0x75   : > { %795 = shalt.err (!%p792_p7)
}
  0x76   : > { %598 = dma.hbm_to_vmem [thread:$0]  (!%p1180_p6), %s1174_s14, 128, %s1169_s7, %s203_s2  }
  0x77   : > { %s71_s3 = sadd.s32 1, %s928_s17  ;;  %p1401_p1 = scmp.eq.s32.totalorder %s1154_s13, 0 }
  0x78   : > { %p78_p12 = scmp.ne.s32.totalorder %s928_s17, %s924_s16  ;;  %p84_p0 = scmp.ne.s32.totalorder %s924_s16, %s920_s15 }
  0x79   : > { %s1213_s6 = scalar_select %p1401_p1, %s928_s17, %s71_s3  }
  0x7a   : > { %s222_s9 = sand.u32 1, %s960_s25   ;;  %s224_s5 = sand.u32 1, %s928_s17  }
  0x7b   : > { %p1402_p4 = scmp.eq.s32.totalorder %s960_s25, 0  ;;  %p1403_p10 = scmp.eq.s32.totalorder %s1052_s26, 0 }
  0x7c   : > { %s546_s28 = sshll.u32 %s224_s5, 3  ;;  %s547_s10 = sshll.u32 %s956_s24, 7 }
  0x7d   : > { %p80_p8 = por %p78_p12, %p1402_p4  ;;  %p1225_p2 = por %p84_p0, %p1403_p10 }
  0x7e   : > { %s1233_s7 = scalar_lea.hbm %s1371_s1, %s547_s10  ;;  %s226_s15 = scalar_lea.vmem [#allocation5], %s546_s28 }
  0x7f   : > { %s1404_s30 = scalar_select %p1225_p2, 1, 0 }
  0x80   : > { %s233_s13 = sshll.u32 %s226_s15, 4  ;;  %p1405_p6 = scmp.lt.s32.totalorder %s960_s25, 4  ;;  %s1235_s13 = int_to_ptr.vmem [resolvable:$true] %s233_s13 }
  0x81   : > { %s223_s2 = scalar_lea.sflag [#allocation6], %s222_s9  ;;  %s796_s3 = scalar_lea.hbm %s1233_s7, 128 }
  0x82   : > { %p1239_p3 = pnand %p1405_p6, %p80_p8  ;;  %p797_p9 = scmp.ne.s32.totalorder %s1233_s7, %s796_s3 }
  0x83   : > { %s801_s10 = scalar_lea.hbm %s1371_s1, 256  ;;  %p802_p1 = scmp.lt.u32.totalorder %s1233_s7, %s1371_s1 }
  0x84   : > { %p798_p5 = pneg %p1239_p3  ;;  %p803_p12 = scmp.lt.u32.totalorder %s801_s10, %s796_s3 }
  0x85   : > { %p805_p4 = scmp.lt.u32.totalorder %s796_s3, %s1233_s7 }
  0x86   : > { %p799_p13 = pnand %p798_p5, %p797_p9  ;;  %p804_p0 = por %p803_p12, %p802_p1 }
  0x88   : > { %p800_p7 = pneg %p799_p13  ;;  %p806_p8 = por %p805_p4, %p804_p0 }
  0x8a   : > { %p807_p10 = pnand %p806_p8, %p800_p7 }
  0x8c   : > { %810 = shalt.err (!%p807_p10)
}
  0x8d   : > { %s811_s9 = scalar_lea.vmem %s1235_s13, 128  ;;  %s967_s15 = smov [#allocation5]  }
  0x8e   : > { %p812_p6 = scmp.ne.s32.totalorder %s1235_s13, %s811_s9  ;;  %s816_s5 = sshll.u32 %s967_s15, 4  ;;  %s817_s5 = int_to_ptr.vmem [resolvable:$false] %s816_s5 }
  0x8f   : > { %s818_s28 = scalar_lea.vmem %s817_s5, 256  ;;  %p819_p2 = scmp.lt.s32.totalorder %s1235_s13, %s817_s5 }
  0x90   : > { %p814_p9 = pnand %p812_p6, %p798_p5  ;;  %p820_p1 = scmp.lt.s32.totalorder %s818_s28, %s811_s9 }
  0x92   : > { %p815_p13 = pneg %p814_p9  ;;  %p821_p12 = por %p820_p1, %p819_p2 }
  0x94   : > { %p822_p0 = pnand %p821_p12, %p815_p13 }
  0x96   : > { %825 = shalt.err (!%p822_p0)
}
  0x97   : > { %601 = dma.hbm_to_vmem [thread:$0]  (!%p1239_p3), %s1233_s7, 128, %s1235_s13, %s223_s2  }
  0x98   : > { %p1407_p7 = scmp.ne.s32.totalorder %s1389_s27, 0 }
  0x99   : > { %s1271_s3 = sand.u32 (!%p1407_p7), 1, %s936_s19  }
  0x9a   : > { %242 = sbr.rel (%p1407_p7) target bundleno = 719 (0x2cf), region = 36  ;;  %s549_s10 = sshll.u32 (!%p1407_p7), %s1271_s3, 3 }
  0x9b   : > { %s245_s18 = scalar_lea.sflag (!%p1407_p7), [#allocation3], %s1271_s3  ;;  %s248_s8 = scalar_lea.vmem (!%p1407_p7), [#allocation2], %s549_s10 }
  0xa1   : > { %899 = dma.done.wait (%p1144_p11), %s245_s18, 128  }
  0xa2   : > { %901 = vsyncadd (%p1144_p11), %s245_s18, 4294967168  ;;  %s253_s7 = sand.u32 1, %s1052_s26   ;;  %s255_s27 = sand.u32 1, %s924_s16  }
  0xa3   : > { %s1281_s13 = sshll.u32 %s255_s27, 3  ;;  %s254_s14 = scalar_lea.sflag [#allocation6], %s253_s7 }
  0xa4   : > { %s257_s2 = scalar_lea.vmem [#allocation5], %s1281_s13  ;;  %p1408_p2 = scmp.ne.s32.totalorder %s1404_s30, 0 }
  0xa6   : > { %903 = dma.done.wait (%p1408_p2), %s254_s14, 128  }
  0xa7   : > { %905 = vsyncadd (%p1408_p2), %s254_s14, 4294967168  ;;  %p1409_p3 = scmp.eq.s32.totalorder %s1052_s26, 0 }
  0xa9   : > { %907 = dma.done.wait (%p1409_p3), [#allocation6], 256   ;;  %p1410_p11 = pmov %p1409_p3 }
  0xaa   : > { %p1411_p5 = pmov %p1409_p3 }
  0xab   : > { %909 = vsyncadd (%p1410_p11), [#allocation6], 4294967040 }
  0xac   : > { %911 = dma.done.wait (%p1411_p5), [#allocation9], 16   ;;  %p1412_p4 = pmov %p1409_p3 }
  0xad   : > { %vm298_vm0 = vcmask 261120   ;;  %v296_v0 = vld [vmem:[%s248_s8] sm:$0xff]  ;;  %v968_v8 = vmov 0.0   ;;  %vm969_vm1 = vmmov 0   ;;  %v314_v12 = vlaneseq  ;;  %v297_v15 = vld [vmem:[%s257_s2] sm:$0x3f] }
  0xae   : > { %913 = vsyncadd (%p1412_p4), [#allocation9], 4294967280  ;;  %v299_v1 = vsel %vm298_vm0, %v296_v0, 0.0  ;;  %v706_v7 = vld [vmem:[#allocation7] sm:$0xff]   ;;  %566 = vmatprep.subr.bf16.mxu0 %v968_v8  ;;  %v707_v9 = vld [vmem:[#allocation7 + $0x8] sm:$0xff]   ;;  %570 = vmatprep.mubr.msk.bf16.mxu0 %vm969_vm1, %v968_v8  ;;  %v313_v16 = vadd.f32 1.0, %v297_v15 }
  0xaf   : > { %300 = vadd.xlane.f32.xlu0 %v299_v1  ;;  %567 = vmatpush3.bf16.msra.mxu0 %v706_v7  ;;  %v315_v14 = vshrl.u32 %v314_v12, 7  ;;  %s553_s26 = sshll.u32 %s1271_s3, 2  ;;  %s559_s11 = sshll.u32 %s948_s22, 1  ;;  %v554_v26 = vld [vmem:[#allocation8] ss:$0 sm:$0xff]  ;;  %vm392_vm2 = vcmask 781312  }
  0xb0   : > { %568 = vmatprep.subr.bf16.mxu0 %v968_v8  ;;  %s406_s30 = sadd.s32 %s944_s21, %s559_s11  ;;  %s294_s15 = scalar_lea.vmem [#allocation10], %s553_s26 }
  0xb1   : > { %v316_v17 = vsub.s32 1, %v315_v14  ;;  %v321_v18 = vsub.s32 0, %v315_v14  ;;  %s560_s9 = sshll.u32 %s406_s30, 6  ;;  %s410_s5 = sshll.u32 %s294_s15, 4  ;;  %s1309_s5 = int_to_ptr.vmem [resolvable:$true] %s410_s5 }
  0xb2   : > { %s1413_s18 = sld [smem:[#allocation21_spill]]  ;;  %s395_s21 = scalar_lea.sflag [#allocation4], %s1271_s3 }
  0xb3   : > { %569 = vmatpush3.bf16.msra.mxu0 %v707_v9  ;;  %v317_v19 = vrot.slane %v313_v16, %v316_v17  ;;  %v322_v22 = vrot.slane %v297_v15, %v321_v18  ;;  %s826_s22 = scalar_lea.vmem %s1309_s5, 64  ;;  %p1415_p10 = scmp.ne.s32.totalorder %s1398_s12, 0 }
  0xb4   : > { %p827_p8 = scmp.ne.s32.totalorder %s1309_s5, %s826_s22  ;;  %s970_s27 = smov [#allocation10]  }
  0xb5   : > { %s830_s13 = sshll.u32 %s970_s27, 4  ;;  %s831_s13 = int_to_ptr.vmem [resolvable:$false] %s830_s13 }
  0xb6   : > { %p828_p6 = pnand %p827_p8, %p1415_p10  ;;  %s832_s14 = scalar_lea.vmem %s831_s13, 128 }
  0xb7   : > { %p833_p13 = scmp.lt.s32.totalorder %s1309_s5, %s831_s13  ;;  %p834_p1 = scmp.lt.s32.totalorder %s832_s14, %s826_s22 }
  0xb8   : > { %s1414_s8 = smov %s1413_s18  ;;  %s1307_s7 = scalar_lea.hbm %s1413_s18, %s560_s9 }
  0xb9   : > { %p829_p9 = pneg %p828_p6  ;;  %p835_p12 = por %p834_p1, %p833_p13 }
  0xbb   : > { %p836_p0 = pnand %p835_p12, %p829_p9 }
 0x13c   : > { %v301_v2 = vpop.xlane.xlu0 %300 }
 0x13d   : > { %v303_v3 = vmul.f32 0.03125, %v301_v2 }
 0x13f   : > { %v304_v4 = vsub.f32 %v296_v0, %v303_v3 }
 0x141   : > { %v305_v5 = vmul.f32 %v304_v4, %v304_v4 }
 0x143   : > { %v306_v6 = vsel %vm298_vm0, %v305_v5, 0.0 }
 0x144   : > { %307 = vadd.xlane.f32.xlu0 %v306_v6 }
 0x1d1   : > { %v308_v10 = vpop.xlane.xlu0 %307 }
 0x1d2   : > { %v309_v11 = vmul.f32 0.03125, %v308_v10 }
 0x1d4   : > { %v310_v13 = vadd.f32 1e-06, %v309_v11 }
 0x1d6   : > { %708 = vrsqrt.f32 %v310_v13 }
 0x1e0   : > { %v709_v20 = vpop.eup %708 }
 0x1e1   : > { %v312_v21 = vmul.f32 %v709_v20, %v304_v4 }
 0x1e3   : > { %v318_v23 = vmul.f32 %v317_v19, %v312_v21 }
 0x1e5   : > { %v323_v24 = vadd.f32 %v322_v22, %v318_v23 }
 0x1e7   : > { %v324_v25 = vpack.c.bf16 %v323_v24, %v323_v24 }
 0x1e9   : > { %571 = vmatmul.mubr.msk.bf16.vlgmr.msra.gmra.mrb[0].mxu0 %vm298_vm0, %v324_v25 }
 0x2bc   : > { %v385_v27 = vpop.f32.mrb[0].mxu0 }
 0x2bd   : > { %v386_v28 = vadd.f32 %v554_v26, %v385_v27  ;;  %v572_v29 = vpop.f32.mrb[1].mxu0 }
 0x2be   : > { %v388_v30 = vpop.f32.mrb[2].mxu0 }
 0x2bf   : > { %v391_v31 = vpack.c.bf16 %v386_v28, %v386_v28  ;;  %v573_v32 = vpop.f32.mrb[3].mxu0 }
 0x2c1   : > { %393 = vst.msk [vmem:[%s294_s15] sm:$0xf] %vm392_vm2, %v391_v31 }
 0x2c2   : > { %839 = shalt.err (!%p836_p0)
}
 0x2c3   : > { %s840_s3 = scalar_lea.hbm %s1307_s7, 64  ;;  %s844_s11 = scalar_lea.hbm %s1414_s8, 256 }
 0x2c4   : > { %p841_p7 = scmp.ne.s32.totalorder %s1307_s7, %s840_s3  ;;  %p845_p11 = scmp.lt.u32.totalorder %s1307_s7, %s1414_s8 }
 0x2c5   : > { %p846_p5 = scmp.lt.u32.totalorder %s844_s11, %s840_s3  ;;  %p848_p8 = scmp.lt.u32.totalorder %s840_s3, %s1307_s7 }
 0x2c6   : > { %p842_p2 = pnand %p841_p7, %p1415_p10 }
 0x2c7   : > { %p847_p4 = por %p846_p5, %p845_p11 }
 0x2c8   : > { %p843_p3 = pneg %p842_p2 }
 0x2c9   : > { %p849_p6 = por %p848_p8, %p847_p4 }
 0x2cb   : > { %p850_p9 = pnand %p849_p6, %p843_p3 }
 0x2cd   : > { %853 = shalt.err (!%p850_p9)
}
 0x2ce   : > { %586 = dma.vmem_to_hbm [thread:$0]  (%p1415_p10), %s1309_s5, 64, %s1307_s7, %s395_s21  }
 0x2cf PF: > { %s1416_s15 = sld [smem:[#allocation16_spill]]  ;;  %p611_p13 = scmp.ge.s32.totalorder %s960_s25, 2 }
 0x2d0   : > { %p1417_p1 = scmp.ne.s32.totalorder %s1399_s29, 0 }
 0x2d2   : > { %p603_p12 = pnand %p611_p13, %p1417_p1 }
 0x2d5   : > { %s422_s28 = sand.u32 1, %s1416_s15  }
 0x2d6   : > { %s423_s10 = scalar_lea.sflag [#allocation4], %s422_s28 }
 0x2d7   : > { %915 = dma.done.wait (!%p603_p12), %s423_s10, 64  }
 0x2d8   : > { %917 = vsyncadd (!%p603_p12), %s423_s10, 4294967232  ;;  %s24_s25 = sadd.s32 1, %s960_s25   ;;  %s1418_s12 = sld [smem:[#allocation17_spill]] }
 0x2d9   : > { %p21_p0 = scmp.ge.s32.totalorder %s24_s25, 6   ;;  %s1419_s5 = sld [smem:[#allocation18_spill]] }
 0x2da   : > { %s1420_s15 = smov %s924_s16  ;;  %s1421_s16 = smov %s928_s17 }
 0x2db   : > { %s1422_s17 = smov %s1213_s6  ;;  %s1423_s18 = smov %s936_s19 }
 0x2dc   : > { %s1424_s19 = smov %s940_s20  ;;  %s1425_s20 = smov %s1165_s4 }
 0x2dd   : > { %s1426_s21 = smov %s952_s23  ;;  %s1427_s22 = smov %s956_s24 }
 0x2de   : > { %s1428_s23 = smov %s1418_s12  ;;  %23 = sbr.rel (!%p21_p0) target bundleno = 16 (0x10), region = 102 }
 0x2df   : > { %s1429_s24 = smov %s1419_s5 }
 0x2e5   :  { %428 = vsyncpa [#allocation3], 1 }
 0x2e6   :  { %430 = vsyncpa [#allocation3 + $0x1], 1 }
 0x2e7   :  { %431 = vsyncpa [#allocation6], 1 }
 0x2e8   :  { %433 = vsyncpa [#allocation6 + $0x1], 1 }
 0x2e9   :  { %434 = vsyncpa [#allocation9], 1 }
 0x2ea   :  { %435 = vsyncpa [#allocation4], 1 }
 0x2eb   :  { %437 = vsyncpa [#allocation4 + $0x1], 1 }

// kernel: joint_transformer_block.8
= control target key start
LH: loop header
LB: loop body
LE: loop exit
PB: predicated region body
PF: predicated region fallthrough
CT: control target
= control target key end

     0   :  { %s1199_s0 = inlined_call_operand.hbm [shape: f32[2,8,32], index: 0, kind: input, shape index: {}]   ;;  %s1200_s1 = inlined_call_operand.hbm [shape: f32[2,6,32], index: 1, kind: input, shape index: {}]   ;;  %s1201_s2 = inlined_call_operand.hbm [shape: bf16[32,96], index: 2, kind: input, shape index: {}]   ;;  %s1202_s3 = inlined_call_operand.hbm [shape: f32[1,96], index: 3, kind: input, shape index: {}]   ;;  %s1203_s4 = inlined_call_operand.hbm [shape: bf16[2,8,96], index: 4, kind: output, shape index: {}]  }
   0x1   :  { %1209 = sst [smem:[#allocation17_spill]] %s1201_s2 }
   0x2   :  { %1210 = sst [smem:[#allocation18_spill]] %s1202_s3 }
   0x3   :  { %9 = vsyncpa [#allocation3], 0 }
   0x4   :  { %11 = vsyncpa [#allocation3 + $0x1], 0 }
   0x5   :  { %12 = vsyncpa [#allocation6], 0 }
   0x6   :  { %14 = vsyncpa [#allocation6 + $0x1], 0 }
   0x7   :  { %15 = vsyncpa [#allocation9], 0 }
   0x8   :  { %16 = vsyncpa [#allocation4], 0 }
   0x9   :  { %18 = vsyncpa [#allocation4 + $0x1], 0  ;;  %s907_s15 = smov 0   ;;  %s909_s16 = smov 0  }
   0xa   :  { %s911_s17 = smov 0   ;;  %s913_s18 = smov 0  }
   0xb   :  { %s915_s19 = smov 0   ;;  %s917_s20 = smov 0  }
   0xc LB: > { %s938_s21 = sadd.s32 4294967295, %s871_s20   ;;  %s531_s22 = sadd.s32 4294967294, %s871_s20   ;;  %s871_s20 = sphi %s917_s20, %s24_s20   ;;  %s867_s19 = sphi %s915_s19, %s1235_s19   ;;  %s863_s18 = sphi %s913_s18, %s1234_s18   ;;  %s859_s17 = sphi %s911_s17, %s1233_s17   ;;  %s855_s16 = sphi %s909_s16, %s1232_s16   ;;  %s851_s15 = sphi %s907_s15, %s1231_s15  }
   0xd   : > { %p58_p0 = scmp.ne.s32.totalorder %s855_s16, %s851_s15  ;;  %p1204_p1 = scmp.eq.s32.totalorder %s938_s21, 0 }
   0xe   : > { %p158_p3 = scmp.eq.s32.totalorder %s531_s22, 1  ;;  %p532_p5 = scmp.ge.s32.totalorder %s871_s20, 1 }
   0xf   : > { %p947_p4 = por %p1204_p1, %p58_p0  ;;  %p165_p7 = scmp.lt.s32.totalorder %s871_s20, 3 }
  0x10   : > { %p952_p6 = por %p158_p3, %p58_p0  ;;  %s873_s26 = smov [#allocation7]  }
  0x11   : > { %s1211_s23 = scalar_select %p947_p4, 1, 0 }
  0x12   : > { %s1212_s24 = scalar_select %p952_p6, 1, 0 }
  0x13   : > { %p957_p8 = pnand %p532_p5, %p165_p7  ;;  %s177_s27 = sshll.u32 %s873_s26, 4  ;;  %s961_s27 = int_to_ptr.vmem [resolvable:$true] %s177_s27 }
  0x14   : > { %s874_s29 = smov [#allocation8]   ;;  %s1215_s2 = sld [smem:[#allocation17_spill]] }
  0x15   : > { %s1213_s25 = scalar_select %p957_p8, 1, 0 }
  0x16   : > { %p579_p9 = pneg %p957_p8  ;;  %s191_s30 = sshll.u32 %s874_s29, 4  ;;  %s972_s30 = int_to_ptr.vmem [resolvable:$true] %s191_s30 }
  0x18   : > { %p968_p11 = pnand %p579_p9, %p1204_p1 }
  0x1a   : > { %s661_s7 = scalar_lea.hbm %s1215_s2, 256  ;;  %p663_p13 = pneg %p968_p11 }
  0x1b   : > { %p662_p12 = scmp.ne.s32.totalorder %s1215_s2, %s661_s7  ;;  %p668_p5 = scmp.lt.u32.totalorder %s661_s7, %s1215_s2 }
  0x1d   : > { %p664_p0 = pnand %p663_p13, %p662_p12 }
  0x1f   : > { %p665_p3 = pneg %p664_p0 }
  0x21   : > { %p670_p7 = pnand %p668_p5, %p665_p3 }
  0x23   : > { %673 = shalt.err (!%p670_p7)
}
  0x24   : > { %s674_s12 = scalar_lea.vmem %s961_s27, 256  ;;  %p682_p2 = scmp.lt.s32.totalorder %s961_s27, %s961_s27 }
  0x25   : > { %p675_p9 = scmp.ne.s32.totalorder %s961_s27, %s674_s12  ;;  %p683_p12 = scmp.lt.s32.totalorder %s674_s12, %s674_s12 }
  0x27   : > { %p677_p10 = pnand %p675_p9, %p663_p13  ;;  %p684_p0 = por %p683_p12, %p682_p2 }
  0x29   : > { %p678_p1 = pneg %p677_p10 }
  0x2b   : > { %p685_p6 = pnand %p684_p0, %p678_p1 }
  0x2d   : > { %688 = shalt.err (!%p685_p6)
}
  0x2e   : > { %s875_s13 = smov 64   ;;  %s876_s14 = smov 4  }
  0x2f   : > { %582 = dma.hbm_to_vmem [thread:$0]  (!%p968_p11), %s1215_s2, 256, %s961_s27, [#allocation6], %s875_s13, %s875_s13, %s876_s14  }
  0x30   : > { %s1216_s3 = sld [smem:[#allocation18_spill]] }
  0x36   : > { %s689_s6 = scalar_lea.hbm %s1216_s3, 16 }
  0x37   : > { %p690_p2 = scmp.ne.s32.totalorder %s1216_s3, %s689_s6  ;;  %p696_p10 = scmp.lt.u32.totalorder %s689_s6, %s1216_s3 }
  0x39   : > { %p692_p1 = pnand %p690_p2, %p663_p13 }
  0x3b   : > { %p693_p6 = pneg %p692_p1 }
  0x3d   : > { %p698_p3 = pnand %p696_p10, %p693_p6 }
  0x3f   : > { %701 = shalt.err (!%p698_p3)
}
  0x40   : > { %s702_s27 = scalar_lea.vmem %s972_s30, 16  ;;  %s709_s11 = scalar_lea.vmem %s972_s30, 32 }
  0x41   : > { %p703_p5 = scmp.ne.s32.totalorder %s972_s30, %s702_s27  ;;  %p710_p12 = scmp.lt.s32.totalorder %s972_s30, %s972_s30 }
  0x42   : > { %p711_p0 = scmp.lt.s32.totalorder %s709_s11, %s702_s27 }
  0x43   : > { %p705_p7 = pnand %p703_p5, %p663_p13 }
  0x44   : > { %p712_p2 = por %p711_p0, %p710_p12 }
  0x45   : > { %p706_p9 = pneg %p705_p7 }
  0x47   : > { %p713_p1 = pnand %p712_p2, %p706_p9 }
  0x49   : > { %716 = shalt.err (!%p713_p1)
}
  0x4a   : > { %585 = dma.hbm_to_vmem [thread:$0]  (!%p968_p11), %s1216_s3, 16, %s972_s30, [#allocation9]  }
  0x4b   : > { %s36_s14 = sadd.s32 1, %s867_s19  ;;  %s45_s22 = sadd.s32 1, %s859_s17 }
  0x4c   : > { %p38_p13 = scmp.ge.s32.totalorder %s36_s14, 2  ;;  %p52_p6 = scmp.ne.s32.totalorder %s859_s17, %s855_s16 }
  0x4d   : > { %p53_p10 = scmp.eq.s32.totalorder %s871_s20, 0  ;;  %p599_p3 = scmp.lt.s32.totalorder %s871_s20, 2 }
  0x4e   : > { %s1237_s14 = smov (%p38_p13, %s36_s14), 0  ;;  %p1218_p7 = scmp.eq.s32.totalorder %s938_s21, 1 }
  0x4f   : > { %1217 = sst [smem:[#allocation16_spill]] %s1237_s14  ;;  %p54_p5 = por %p53_p10, %p52_p6 }
  0x50   : > { %p1037_p9 = por %p1218_p7, %p52_p6  ;;  %s40_s26 = ssub.s32 %s867_s19, %s1237_s14 }
  0x51   : > { %s202_s29 = sand.u32 1, %s859_s17   ;;  %p43_p12 = scmp.eq.s32.totalorder %s40_s26, 0 }
  0x52   : > { %s1219_s28 = scalar_select %p1037_p9, 1, 0 }
  0x53   : > { %s1044_s30 = sshll.u32 %s202_s29, 3  ;;  %s537_s5 = sshll.u32 %s867_s19, 7 }
  0x54   : > { %s1048_s6 = scalar_select %p43_p12, %s859_s17, %s45_s22  }
  0x55   : > { %s1053_s9 = scalar_lea.hbm %s1199_s0, %s537_s5  ;;  %s206_s10 = scalar_lea.vmem [#allocation2], %s1044_s30 }
  0x56   : > { %s214_s27 = sshll.u32 %s206_s10, 4  ;;  %p1058_p11 = pnand %p599_p3, %p54_p5  ;;  %s1062_s27 = int_to_ptr.vmem [resolvable:$true] %s214_s27 }
  0x57   : > { %s1067_s22 = scalar_lea.hbm %s1200_s1, %s537_s5  ;;  %s203_s26 = scalar_lea.sflag [#allocation3], %s202_s29 }
  0x58   : > { %s717_s7 = scalar_lea.hbm %s1053_s9, 128  ;;  %p719_p2 = pneg %p1058_p11 }
  0x59   : > { %p718_p0 = scmp.ne.s32.totalorder %s1053_s9, %s717_s7  ;;  %s722_s2 = scalar_lea.hbm %s1199_s0, 256 }
  0x5a   : > { %p723_p6 = scmp.lt.u32.totalorder %s1053_s9, %s1199_s0  ;;  %p724_p10 = scmp.lt.u32.totalorder %s722_s2, %s717_s7 }
  0x5b   : > { %p720_p1 = pnand %p719_p2, %p718_p0  ;;  %p726_p5 = scmp.lt.u32.totalorder %s717_s7, %s1053_s9 }
  0x5c   : > { %p725_p3 = por %p724_p10, %p723_p6 }
  0x5d   : > { %p721_p13 = pneg %p720_p1 }
  0x5e   : > { %p727_p7 = por %p726_p5, %p725_p3 }
  0x60   : > { %p728_p12 = pnand %p727_p7, %p721_p13 }
  0x62   : > { %731 = shalt.err (!%p728_p12)
}
  0x63   : > { %s732_s29 = scalar_lea.vmem %s1062_s27, 128  ;;  %s877_s5 = smov [#allocation2]  }
  0x64   : > { %p733_p0 = scmp.ne.s32.totalorder %s1062_s27, %s732_s29  ;;  %s737_s12 = sshll.u32 %s877_s5, 4  ;;  %s738_s12 = int_to_ptr.vmem [resolvable:$false] %s737_s12 }
  0x65   : > { %s739_s3 = scalar_lea.vmem %s738_s12, 256  ;;  %p740_p4 = scmp.lt.s32.totalorder %s1062_s27, %s738_s12 }
  0x66   : > { %p735_p1 = pnand %p733_p0, %p719_p2  ;;  %p741_p6 = scmp.lt.s32.totalorder %s739_s3, %s732_s29 }
  0x68   : > { %p736_p9 = pneg %p735_p1  ;;  %p742_p10 = por %p741_p6, %p740_p4 }
  0x6a   : > { %p743_p3 = pnand %p742_p10, %p736_p9 }
  0x6c   : > { %746 = shalt.err (!%p743_p3)
}
  0x6d   : > { %589 = dma.hbm_to_vmem [thread:$0]  (!%p1058_p11), %s1053_s9, 128, %s1062_s27, %s203_s26  }
  0x6e   : > { %s221_s2 = sand.u32 1, %s871_s20   ;;  %s225_s14 = scalar_lea.vmem [#allocation5], %s1044_s30 }
  0x6f   : > { %s232_s13 = sshll.u32 %s225_s14, 4  ;;  %s222_s7 = scalar_lea.sflag [#allocation6], %s221_s2  ;;  %s233_s13 = int_to_ptr.vmem [resolvable:$true] %s232_s13 }
  0x70   : > { %s747_s8 = scalar_lea.hbm %s1067_s22, 128  ;;  %s752_s5 = scalar_lea.hbm %s1200_s1, 256 }
  0x71   : > { %p748_p4 = scmp.ne.s32.totalorder %s1067_s22, %s747_s8  ;;  %p753_p5 = scmp.lt.u32.totalorder %s1067_s22, %s1200_s1 }
  0x72   : > { %p754_p7 = scmp.lt.u32.totalorder %s752_s5, %s747_s8  ;;  %p756_p0 = scmp.lt.u32.totalorder %s747_s8, %s1067_s22 }
  0x73   : > { %p750_p9 = pnand %p748_p4, %p719_p2 }
  0x74   : > { %p755_p12 = por %p754_p7, %p753_p5 }
  0x75   : > { %p751_p13 = pneg %p750_p9 }
  0x76   : > { %p757_p1 = por %p756_p0, %p755_p12 }
  0x78   : > { %p758_p6 = pnand %p757_p1, %p751_p13 }
  0x7a   : > { %761 = shalt.err (!%p758_p6)
}
  0x7b   : > { %s762_s30 = scalar_lea.vmem %s233_s13, 128  ;;  %s878_s9 = smov [#allocation5]  }
  0x7c   : > { %p763_p10 = scmp.ne.s32.totalorder %s233_s13, %s762_s30  ;;  %s767_s27 = sshll.u32 %s878_s9, 4  ;;  %s768_s27 = int_to_ptr.vmem [resolvable:$false] %s767_s27 }
  0x7d   : > { %s769_s26 = scalar_lea.vmem %s768_s27, 256  ;;  %p770_p9 = scmp.lt.s32.totalorder %s233_s13, %s768_s27 }
  0x7e   : > { %p765_p3 = pnand %p763_p10, %p719_p2  ;;  %p771_p8 = scmp.lt.s32.totalorder %s769_s26, %s762_s30 }
  0x80   : > { %p766_p4 = pneg %p765_p3  ;;  %p772_p5 = por %p771_p8, %p770_p9 }
  0x82   : > { %p773_p7 = pnand %p772_p5, %p766_p4 }
  0x84   : > { %776 = shalt.err (!%p773_p7)
}
  0x85   : > { %592 = dma.hbm_to_vmem [thread:$0]  (!%p1058_p11), %s1067_s22, 128, %s233_s13, %s222_s7  }
  0x86   : > { %p1221_p13 = scmp.ne.s32.totalorder %s1213_s25, 0 }
  0x87   : > { %s1118_s2 = sand.u32 (!%p1221_p13), 1, %s855_s16   ;;  %p1222_p2 = scmp.ne.s32.totalorder (!%p1221_p13), %s1211_s23, 0 }
  0x88   : > { %241 = sbr.rel (%p1221_p13) target bundleno = 699 (0x2bb), region = 36  ;;  %s541_s14 = sshll.u32 (!%p1221_p13), %s1118_s2, 3 }
  0x89   : > { %s244_s8 = scalar_lea.sflag (!%p1221_p13), [#allocation3], %s1118_s2  ;;  %s247_s10 = scalar_lea.vmem (!%p1221_p13), [#allocation2], %s541_s14 }
  0x8f   : > { %830 = dma.done.wait (%p1222_p2), %s244_s8, 128  }
  0x90   : > { %832 = vsyncadd (%p1222_p2), %s244_s8, 4294967168  ;;  %s252_s11 = sand.u32 1, %s938_s21   ;;  %s1127_s25 = scalar_lea.vmem [#allocation5], %s541_s14 }
  0x91   : > { %s253_s22 = scalar_lea.sflag [#allocation6], %s252_s11 }
  0x92   : > { %834 = dma.done.wait (%p1222_p2), %s253_s22, 128  }
  0x93   : > { %836 = vsyncadd (%p1222_p2), %s253_s22, 4294967168  ;;  %p1223_p8 = scmp.eq.s32.totalorder %s938_s21, 0 }
  0x95   : > { %838 = dma.done.wait (%p1223_p8), [#allocation6], 256   ;;  %p1224_p11 = pmov %p1223_p8 }
  0x96   : > { %p1225_p12 = pmov %p1223_p8 }
  0x97   : > { %840 = vsyncadd (%p1224_p11), [#allocation6], 4294967040 }
  0x98   : > { %842 = dma.done.wait (%p1225_p12), [#allocation9], 16   ;;  %p1226_p0 = pmov %p1223_p8 }
  0x99   : > { %vm297_vm0 = vcmask 261120   ;;  %v295_v0 = vld [vmem:[%s247_s10] sm:$0xff]  ;;  %v879_v8 = vmov 0.0   ;;  %vm880_vm1 = vmmov 0   ;;  %v313_v12 = vlaneseq  ;;  %v296_v15 = vld [vmem:[%s1127_s25] sm:$0x3f] }
  0x9a   : > { %844 = vsyncadd (%p1226_p0), [#allocation9], 4294967280  ;;  %v298_v1 = vsel %vm297_vm0, %v295_v0, 0.0  ;;  %v657_v7 = vld [vmem:[#allocation7] sm:$0xff]   ;;  %557 = vmatprep.subr.bf16.mxu0 %v879_v8  ;;  %v658_v9 = vld [vmem:[#allocation7 + $0x8] sm:$0xff]   ;;  %561 = vmatprep.mubr.msk.bf16.mxu0 %vm880_vm1, %v879_v8  ;;  %v312_v16 = vadd.f32 1.0, %v296_v15 }
  0x9b   : > { %299 = vadd.xlane.f32.xlu0 %v298_v1  ;;  %558 = vmatpush3.bf16.msra.mxu0 %v657_v7  ;;  %v314_v14 = vshrl.u32 %v313_v12, 7  ;;  %s545_s21 = sshll.u32 %s1118_s2, 2  ;;  %v546_v26 = vld [vmem:[#allocation8] ss:$0 sm:$0xff]  ;;  %s551_s23 = sshll.u32 %s863_s18, 6  ;;  %vm391_vm2 = vcmask 781312  }
  0x9c   : > { %559 = vmatprep.subr.bf16.mxu0 %v879_v8  ;;  %s293_s13 = scalar_lea.vmem [#allocation10], %s545_s21  ;;  %s1150_s12 = scalar_lea.hbm %s1203_s4, %s551_s23 }
  0x9d   : > { %v315_v17 = vsub.s32 1, %v314_v14  ;;  %v320_v18 = vsub.s32 0, %v314_v14  ;;  %s408_s7 = sshll.u32 %s293_s13, 4  ;;  %s394_s18 = scalar_lea.sflag [#allocation4], %s1118_s2  ;;  %s1152_s7 = int_to_ptr.vmem [resolvable:$true] %s408_s7 }
  0x9e   : > { %s777_s3 = scalar_lea.vmem %s1152_s7, 64  ;;  %p1227_p6 = scmp.ne.s32.totalorder %s1219_s28, 0 }
  0x9f   : > { %560 = vmatpush3.bf16.msra.mxu0 %v658_v9  ;;  %v316_v19 = vrot.slane %v312_v16, %v315_v17  ;;  %v321_v22 = vrot.slane %v296_v15, %v320_v18  ;;  %p778_p1 = scmp.ne.s32.totalorder %s1152_s7, %s777_s3  ;;  %s881_s30 = smov [#allocation10]  }
  0xa0   : > { %s781_s9 = sshll.u32 %s881_s30, 4  ;;  %s782_s9 = int_to_ptr.vmem [resolvable:$false] %s781_s9 }
  0xa1   : > { %p779_p10 = pnand %p778_p1, %p1227_p6  ;;  %s783_s27 = scalar_lea.vmem %s782_s9, 128 }
  0xa2   : > { %p784_p4 = scmp.lt.s32.totalorder %s1152_s7, %s782_s9  ;;  %p785_p9 = scmp.lt.s32.totalorder %s783_s27, %s777_s3 }
  0xa3   : > { %p780_p3 = pneg %p779_p10 }
  0xa4   : > { %p786_p5 = por %p785_p9, %p784_p4 }
  0xa6   : > { %p787_p7 = pnand %p786_p5, %p780_p3 }
 0x128   : > { %v300_v2 = vpop.xlane.xlu0 %299 }
 0x129   : > { %v302_v3 = vmul.f32 0.03125, %v300_v2 }
 0x12b   : > { %v303_v4 = vsub.f32 %v295_v0, %v302_v3 }
 0x12d   : > { %v304_v5 = vmul.f32 %v303_v4, %v303_v4 }
 0x12f   : > { %v305_v6 = vsel %vm297_vm0, %v304_v5, 0.0 }
 0x130   : > { %306 = vadd.xlane.f32.xlu0 %v305_v6 }
 0x1bd   : > { %v307_v10 = vpop.xlane.xlu0 %306 }
 0x1be   : > { %v308_v11 = vmul.f32 0.03125, %v307_v10 }
 0x1c0   : > { %v309_v13 = vadd.f32 1e-06, %v308_v11 }
 0x1c2   : > { %659 = vrsqrt.f32 %v309_v13 }
 0x1cc   : > { %v660_v20 = vpop.eup %659 }
 0x1cd   : > { %v311_v21 = vmul.f32 %v660_v20, %v303_v4 }
 0x1cf   : > { %v317_v23 = vmul.f32 %v316_v19, %v311_v21 }
 0x1d1   : > { %v322_v24 = vadd.f32 %v321_v22, %v317_v23 }
 0x1d3   : > { %v323_v25 = vpack.c.bf16 %v322_v24, %v322_v24 }
 0x1d5   : > { %562 = vmatmul.mubr.msk.bf16.vlgmr.msra.gmra.mrb[0].mxu0 %vm297_vm0, %v323_v25 }
 0x2a8   : > { %v384_v27 = vpop.f32.mrb[0].mxu0 }
 0x2a9   : > { %v385_v28 = vadd.f32 %v546_v26, %v384_v27  ;;  %v563_v29 = vpop.f32.mrb[1].mxu0 }
 0x2aa   : > { %v387_v30 = vpop.f32.mrb[2].mxu0 }
 0x2ab   : > { %v390_v31 = vpack.c.bf16 %v385_v28, %v385_v28  ;;  %v564_v32 = vpop.f32.mrb[3].mxu0 }
 0x2ad   : > { %392 = vst.msk [vmem:[%s293_s13] sm:$0xf] %vm391_vm2, %v390_v31 }
 0x2ae   : > { %790 = shalt.err (!%p787_p7)
}
 0x2af   : > { %s791_s26 = scalar_lea.hbm %s1150_s12, 64  ;;  %s795_s8 = scalar_lea.hbm %s1203_s4, 128 }
 0x2b0   : > { %p792_p13 = scmp.ne.s32.totalorder %s1150_s12, %s791_s26  ;;  %p796_p11 = scmp.lt.u32.totalorder %s1150_s12, %s1203_s4 }
 0x2b1   : > { %p797_p12 = scmp.lt.u32.totalorder %s795_s8, %s791_s26  ;;  %p799_p1 = scmp.lt.u32.totalorder %s791_s26, %s1150_s12 }
 0x2b2   : > { %p793_p2 = pnand %p792_p13, %p1227_p6 }
 0x2b3   : > { %p798_p0 = por %p797_p12, %p796_p11 }
 0x2b4   : > { %p794_p8 = pneg %p793_p2 }
 0x2b5   : > { %p800_p10 = por %p799_p1, %p798_p0 }
 0x2b7   : > { %p801_p3 = pnand %p800_p10, %p794_p8 }
 0x2b9   : > { %804 = shalt.err (!%p801_p3)
}
 0x2ba   : > { %577 = dma.vmem_to_hbm [thread:$0]  (%p1227_p6), %s1152_s7, 64, %s1150_s12, %s394_s18  }
 0x2bb PF: > { %s420_s22 = sand.u32 1, %s851_s15   ;;  %p1228_p4 = scmp.ne.s32.totalorder %s1212_s24, 0 }
 0x2bc   : > { %p1229_p9 = scmp.ge.s32.totalorder %s871_s20, 2  ;;  %s421_s25 = scalar_lea.sflag [#allocation4], %s420_s22 }
 0x2be   : > { %p594_p5 = pnand %p1229_p9, %p1228_p4 }
 0x2c0   : > { %846 = dma.done.wait (!%p594_p5), %s421_s25, 64  }
 0x2c1   : > { %848 = vsyncadd (!%p594_p5), %s421_s25, 4294967232  ;;  %s24_s20 = sadd.s32 1, %s871_s20   ;;  %s1230_s28 = sld [smem:[#allocation16_spill]] }
 0x2c2   : > { %p21_p7 = scmp.ge.s32.totalorder %s24_s20, 4   ;;  %s1231_s15 = smov %s855_s16 }
 0x2c3   : > { %s1232_s16 = smov %s859_s17  ;;  %s1233_s17 = smov %s1048_s6 }
 0x2c4   : > { %s1234_s18 = smov %s867_s19  ;;  %23 = sbr.rel (!%p21_p7) target bundleno = 12 (0xc), region = 102 }
 0x2c7   : > { %s1235_s19 = smov %s1230_s28 }
 0x2cb   :  { %426 = vsyncpa [#allocation3], 1 }
 0x2cc   :  { %428 = vsyncpa [#allocation3 + $0x1], 1 }
 0x2cd   :  { %429 = vsyncpa [#allocation6], 1 }
 0x2ce   :  { %431 = vsyncpa [#allocation6 + $0x1], 1 }
 0x2cf   :  { %432 = vsyncpa [#allocation9], 1 }
 0x2d0   :  { %433 = vsyncpa [#allocation4], 1 }
 0x2d1   :  { %435 = vsyncpa [#allocation4 + $0x1], 1 }

// kernel: joint_transformer_block.9
= control target key start
LH: loop header
LB: loop body
LE: loop exit
PB: predicated region body
PF: predicated region fallthrough
CT: control target
= control target key end

     0   :  { %s1561_s0 = inlined_call_operand.hbm [shape: bf16[2,2,24,16], index: 0, kind: input, shape index: {}]   ;;  %s1562_s1 = inlined_call_operand.hbm [shape: bf16[2,2,24,16], index: 1, kind: input, shape index: {}]   ;;  %s1563_s2 = inlined_call_operand.hbm [shape: bf16[2,2,24,16], index: 2, kind: input, shape index: {}]   ;;  %s1564_s3 = inlined_call_operand.hbm [shape: bf16[2,2,24,16], index: 3, kind: output, shape index: {}]  }
   0x1   :  { %1592 = sst [smem:[#allocation33_spill]] %s1562_s1 }
   0x2   :  { %1593 = sst [smem:[#allocation34_spill]] %s1564_s3 }
   0x3   :  { %8 = vsyncpa [#allocation6], 0 }
   0x4   :  { %10 = vsyncpa [#allocation6 + $0x1], 0 }
   0x5   :  { %11 = vsyncpa [#allocation9], 0 }
   0x6   :  { %13 = vsyncpa [#allocation9 + $0x1], 0 }
   0x7   :  { %14 = vsyncpa [#allocation7], 0 }
   0x8   :  { %16 = vsyncpa [#allocation7 + $0x1], 0  ;;  %s1128_s12 = smov 0   ;;  %s1130_s13 = smov 0  }
   0x9   :  { %s1132_s14 = smov 0   ;;  %s1134_s15 = smov 0  }
   0xa   :  { %s1136_s16 = smov 0   ;;  %s1138_s17 = smov 0  }
   0xb   :  { %s1140_s18 = smov 0   ;;  %s1142_s19 = smov 0  }
   0xc   :  { %s1144_s20 = smov 0   ;;  %s1146_s21 = smov 0  }
   0xd   :  { %s1148_s22 = smov 0   ;;  %s1150_s23 = smov 0  }
   0xe   :  { %s1152_s24 = smov 0   ;;  %s1154_s25 = smov 0  }
   0xf   :  { %s1156_s26 = smov 0  }
  0x10 LB: > { %1594 = sst [smem:[#allocation15_spill]] %s1044_s13  ;;  %s1202_s27 = sadd.s32 4294967295, %s1096_s26   ;;  %s1096_s26 = sphi %s1156_s26, %s22_s26   ;;  %s1092_s25 = sphi %s1154_s25, %s1677_s25   ;;  %s1088_s24 = sphi %s1152_s24, %s1676_s24   ;;  %s1084_s23 = sphi %s1150_s23, %s1675_s23   ;;  %s1080_s22 = sphi %s1148_s22, %s1674_s22   ;;  %s1076_s21 = sphi %s1146_s21, %s1673_s21   ;;  %s1072_s20 = sphi %s1144_s20, %s1663_s20   ;;  %s1068_s19 = sphi %s1142_s19, %s1662_s19   ;;  %s1064_s18 = sphi %s1140_s18, %s1672_s18   ;;  %s1060_s17 = sphi %s1138_s17, %s1671_s17   ;;  %s1056_s16 = sphi %s1136_s16, %s1670_s16   ;;  %s1052_s15 = sphi %s1134_s15, %s1669_s15   ;;  %s1048_s14 = sphi %s1132_s14, %s1668_s14   ;;  %s1044_s13 = sphi %s1130_s13, %s1667_s13   ;;  %s1040_s12 = sphi %s1128_s12, %s1660_s12  }
  0x11   : > { %1595 = sst [smem:[#allocation16_spill]] %s1052_s15  ;;  %s37_s28 = sadd.s32 1, %s1080_s22 }
  0x12   : > { %1596 = sst [smem:[#allocation17_spill]] %s1056_s16  ;;  %p1205_p0 = scmp.ge.s32.totalorder %s37_s28, 3 }
  0x13   : > { %1597 = sst [smem:[#allocation18_spill]] %s1064_s18  ;;  %p1570_p1 = scmp.eq.s32.totalorder %s1096_s26, 0 }
  0x14   : > { %1598 = sst [smem:[#allocation19_spill]] %s1068_s19  ;;  %s1679_s28 = smov (%p1205_p0, %s37_s28), 0 }
  0x15   : > { %1599 = sst [smem:[#allocation20_spill]] %s1072_s20  ;;  %p1569_p2 = scmp.eq.s32.totalorder %s1202_s27, 0 }
  0x16   : > { %1600 = sst [smem:[#allocation21_spill]] %s1076_s21  ;;  %p96_p3 = scmp.ne.s32.totalorder %s1048_s14, %s1044_s13 }
  0x17   : > { %1601 = sst [smem:[#allocation22_spill]] %s1084_s23  ;;  %p102_p4 = scmp.ne.s32.totalorder %s1044_s13, %s1040_s12 }
  0x18   : > { %1602 = sst [smem:[#allocation23_spill]] %s1088_s24  ;;  %p1225_p5 = por %p96_p3, %p1570_p1 }
  0x19   : > { %1603 = sst [smem:[#allocation24_spill]] %s1202_s27  ;;  %p1568_p6 = scmp.lt.s32.totalorder %s1096_s26, 36 }
  0x1a   : > { %p1232_p7 = por %p102_p4, %p1569_p2  ;;  %s1567_s9 = smul.u32 3, %s1088_s24 }
  0x1b   : > { %s1566_s10 = smul.u32 6, %s1092_s25  ;;  %s208_s11 = sand.u32 1, %s1096_s26  }
  0x1c   : > { %s1606_s8 = scalar_select %p1232_p7, 1, 0 }
  0x1d   : > { %s210_s5 = sand.u32 1, %s1048_s14   ;;  %s217_s6 = sadd.s32 %s1080_s22, %s1567_s9 }
  0x1e   : > { %1607 = sst [smem:[#allocation25_spill]] %s1606_s8  ;;  %s1240_s12 = sshll.u32 %s210_s5, 2 }
  0x1f   : > { %s219_s4 = sadd.s32 %s1566_s10, %s217_s6  ;;  %s212_s3 = scalar_lea.vmem [#allocation8], %s1240_s12 }
  0x20   : > { %s649_s30 = sshll.u32 %s219_s4, 6  ;;  %s223_s19 = sshll.u32 %s212_s3, 4  ;;  %s1253_s19 = int_to_ptr.vmem [resolvable:$true] %s223_s19 }
  0x21   : > { %s1608_s1 = sld [smem:[#allocation33_spill]]  ;;  %p1259_p8 = pnand %p1568_p6, %p1225_p5 }
  0x22   : > { %s1266_s3 = scalar_lea.hbm %s1563_s2, %s649_s30  ;;  %s1270_s20 = scalar_lea.sflag [#allocation9], %s208_s11 }
  0x23   : > { %1610 = sst [smem:[#allocation26_spill]] %s1270_s20  ;;  %p1589_p12 = pneg %p1259_p8 }
  0x27   : > { %s1251_s18 = scalar_lea.hbm %s1608_s1, %s649_s30  ;;  %s853_s4 = scalar_lea.hbm %s1608_s1, 768 }
  0x28   : > { %s848_s21 = scalar_lea.hbm %s1251_s18, 64  ;;  %p854_p4 = scmp.lt.u32.totalorder %s1251_s18, %s1608_s1 }
  0x29   : > { %p849_p11 = scmp.ne.s32.totalorder %s1251_s18, %s848_s21  ;;  %p855_p5 = scmp.lt.u32.totalorder %s853_s4, %s848_s21 }
  0x2a   : > { %p857_p2 = scmp.lt.u32.totalorder %s848_s21, %s1251_s18 }
  0x2b   : > { %p851_p13 = pnand %p1589_p12, %p849_p11  ;;  %p856_p6 = por %p855_p5, %p854_p4 }
  0x2d   : > { %p852_p3 = pneg %p851_p13  ;;  %p858_p1 = por %p857_p2, %p856_p6 }
  0x2f   : > { %p859_p9 = pnand %p858_p1, %p852_p3 }
  0x31   : > { %862 = shalt.err (!%p859_p9)
}
  0x32   : > { %s863_s30 = scalar_lea.vmem %s1253_s19, 64  ;;  %s1098_s10 = smov [#allocation8]  }
  0x33   : > { %p864_p11 = scmp.ne.s32.totalorder %s1253_s19, %s863_s30  ;;  %s868_s11 = sshll.u32 %s1098_s10, 4  ;;  %s869_s11 = int_to_ptr.vmem [resolvable:$false] %s868_s11 }
  0x34   : > { %s870_s9 = scalar_lea.vmem %s869_s11, 128  ;;  %p871_p7 = scmp.lt.s32.totalorder %s1253_s19, %s869_s11 }
  0x35   : > { %p866_p13 = pnand %p864_p11, %p1589_p12  ;;  %p872_p4 = scmp.lt.s32.totalorder %s870_s9, %s863_s30 }
  0x37   : > { %p867_p10 = pneg %p866_p13  ;;  %p873_p5 = por %p872_p4, %p871_p7 }
  0x39   : > { %p874_p2 = pnand %p873_p5, %p867_p10 }
  0x3b   : > { %877 = shalt.err (!%p874_p2)
}
  0x3c   : > { %703 = dma.hbm_to_vmem [thread:$0]  (!%p1259_p8), %s1251_s18, 64, %s1253_s19, %s1270_s20  }
  0x3d   : > { %p1611_p1 = scmp.lt.s32.totalorder %s1096_s26, 37  ;;  %p1612_p6 = scmp.ge.s32.totalorder %s1096_s26, 1 }
  0x3e   : > { %s643_s7 = sadd.s32 4294967294, %s1096_s26   ;;  %s40_s4 = sadd.s32 1, %s1084_s23 }
  0x3f   : > { %p1302_p7 = pnand %p1612_p6, %p1611_p1  ;;  %s1681_s4 = smov (!%p1205_p0, %s40_s4), %s1084_s23 }
  0x40   : > { %p66_p9 = scmp.ne.s32.totalorder %s1060_s17, %s1056_s16  ;;  %p72_p10 = scmp.ne.s32.totalorder %s1056_s16, %s1052_s15 }
  0x41   : > { %s1613_s21 = scalar_select %p1302_p7, 1, 0 }
  0x42   : > { %p42_p3 = scmp.ge.s32.totalorder %s1681_s4, 3  ;;  %p160_p11 = scmp.eq.s32.totalorder %s1202_s27, 35 }
  0x43   : > { %1614 = sst [smem:[#allocation27_spill]] %s1613_s21  ;;  %p1615_p13 = scmp.eq.s32.totalorder %s1096_s26, 0 }
  0x44   : > { %p1617_p5 = scmp.eq.s32.totalorder %s1202_s27, 0  ;;  %s1683_s4 = smov (%p42_p3, %s1681_s4), 0 }
  0x45   : > { %p1319_p4 = por %p1615_p13, %p66_p9  ;;  %1620 = sst [smem:[#allocation29_spill]] %s1683_s4 }
  0x46   : > { %p1328_p2 = por %p1617_p5, %p72_p10  ;;  %s1621_s29 = sadd.s32 1, %s1088_s24 }
  0x47   : > { %s1685_s29 = smov (!%p42_p3, %s1621_s29), %s1088_s24  ;;  %s55_s30 = ssub.s32 %s1084_s23, %s1683_s4 }
  0x48   : > { %s1618_s19 = scalar_select %p1328_p2, 1, 0 }
  0x49   : > { %p1339_p0 = por %p160_p11, %p66_p9  ;;  %p46_p1 = scmp.ge.s32.totalorder %s1685_s29, 2 }
  0x4a   : > { %1619 = sst [smem:[#allocation28_spill]] %s1618_s19  ;;  %p166_p6 = scmp.eq.s32.totalorder %s643_s7, 35 }
  0x4b   : > { %s1622_s10 = scalar_select %p1339_p0, 1, 0 }
  0x4c   : > { %s186_s11 = sand.u32 1, %s1060_s17   ;;  %s1624_s9 = smul.u32 3, %s1088_s24 }
  0x4d   : > { %1623 = sst [smem:[#allocation30_spill]] %s1622_s10  ;;  %s1687_s29 = smov (%p46_p1, %s1685_s29), 0 }
  0x4e   : > { %s195_s6 = sadd.s32 %s1084_s23, %s1624_s9  ;;  %1625 = sst [smem:[#allocation31_spill]] %s1687_s29 }
  0x4f   : > { %s1626_s1 = sadd.s32 1, %s1092_s25  ;;  %s53_s8 = ssub.s32 %s1088_s24, %s1687_s29 }
  0x50   : > { %s1689_s1 = smov (!%p46_p1, %s1626_s1), %s1092_s25  ;;  %p1357_p3 = por %p166_p6, %p72_p10 }
  0x51   : > { %p50_p9 = scmp.ge.s32.totalorder %s1689_s1, 2  ;;  %s646_s7 = sshll.u32 %s186_s11, 2 }
  0x52   : > { %s1627_s4 = scalar_select %p1357_p3, 1, 0 }
  0x53   : > { %s1629_s9 = smul.u32 6, %s1092_s25  ;;  %s1691_s1 = smov (%p50_p9, %s1689_s1), 0 }
  0x54   : > { %1628 = sst [smem:[#allocation32_spill]] %s1627_s4  ;;  %s52_s24 = ssub.s32 %s1092_s25, %s1691_s1 }
  0x55   : > { %s197_s23 = sadd.s32 %s1629_s9, %s195_s6  ;;  %s54_s13 = sor.u32 %s53_s8, %s52_s24 }
  0x56   : > { %s647_s29 = sshll.u32 %s197_s23, 6  ;;  %s190_s27 = scalar_lea.vmem [#allocation5], %s646_s7 }
  0x57   : > { %s1370_s4 = scalar_lea.hbm %s1561_s0, %s647_s29  ;;  %s201_s19 = sshll.u32 %s190_s27, 4  ;;  %s1375_s19 = int_to_ptr.vmem [resolvable:$true] %s201_s19 }
  0x58   : > { %s56_s16 = sor.u32 %s55_s30, %s54_s13  ;;  %s1630_s21 = ssub.s32 %s1080_s22, %s1679_s28 }
  0x59   : > { %s86_s20 = sor.u32 %s1630_s21, %s54_s13  ;;  %p57_p10 = scmp.eq.s32.totalorder %s56_s16, 0 }
  0x5a   : > { %p87_p11 = scmp.eq.s32.totalorder %s86_s20, 0  ;;  %p1631_p13 = scmp.lt.s32.totalorder %s1096_s26, 36 }
  0x5b   : > { %s1633_s23 = sadd.s32 1, %s1060_s17  ;;  %s1634_s27 = sadd.s32 1, %s1048_s14 }
  0x5c   : > { %p1381_p5 = pnand %p1631_p13, %p1319_p4  ;;  %s234_s13 = scalar_lea.vmem [#allocation10], %s1240_s12 }
  0x5d   : > { %s1388_s24 = scalar_select %p57_p10, %s1060_s17, %s1633_s23  }
  0x5e   : > { %s1393_s8 = scalar_select %p87_p11, %s1048_s14, %s1634_s27  }
  0x5f   : > { %s1396_s16 = sshll.u32 %s234_s13, 4  ;;  %s187_s20 = scalar_lea.sflag [#allocation6], %s186_s11  ;;  %s246_s16 = int_to_ptr.vmem [resolvable:$true] %s1396_s16 }
  0x60   : > { %s878_s21 = scalar_lea.hbm %s1370_s4, 64  ;;  %p880_p6 = pneg %p1381_p5 }
  0x61   : > { %p879_p1 = scmp.ne.s32.totalorder %s1370_s4, %s878_s21  ;;  %s883_s29 = scalar_lea.hbm %s1561_s0, 768 }
  0x62   : > { %p884_p10 = scmp.lt.u32.totalorder %s1370_s4, %s1561_s0  ;;  %p885_p11 = scmp.lt.u32.totalorder %s883_s29, %s878_s21 }
  0x63   : > { %p881_p4 = pnand %p880_p6, %p879_p1  ;;  %p887_p12 = scmp.lt.u32.totalorder %s878_s21, %s1370_s4 }
  0x64   : > { %p886_p13 = por %p885_p11, %p884_p10 }
  0x65   : > { %p882_p9 = pneg %p881_p4 }
  0x66   : > { %p888_p3 = por %p887_p12, %p886_p13 }
  0x68   : > { %p889_p0 = pnand %p888_p3, %p882_p9 }
  0x6a   : > { %892 = shalt.err (!%p889_p0)
}
  0x6b   : > { %s893_s12 = scalar_lea.vmem %s1375_s19, 64  ;;  %s1099_s11 = smov [#allocation5]  }
  0x6c   : > { %p894_p1 = scmp.ne.s32.totalorder %s1375_s19, %s893_s12  ;;  %s898_s7 = sshll.u32 %s1099_s11, 4  ;;  %s899_s7 = int_to_ptr.vmem [resolvable:$false] %s898_s7 }
  0x6d   : > { %s900_s9 = scalar_lea.vmem %s899_s7, 128  ;;  %p901_p7 = scmp.lt.s32.totalorder %s1375_s19, %s899_s7 }
  0x6e   : > { %p896_p4 = pnand %p894_p1, %p880_p6  ;;  %p902_p10 = scmp.lt.s32.totalorder %s900_s9, %s893_s12 }
  0x70   : > { %p897_p2 = pneg %p896_p4  ;;  %p903_p11 = por %p902_p10, %p901_p7 }
  0x72   : > { %p904_p12 = pnand %p903_p11, %p897_p2 }
  0x74   : > { %907 = shalt.err (!%p904_p12)
}
  0x75   : > { %700 = dma.hbm_to_vmem [thread:$0]  (!%p1381_p5), %s1370_s4, 64, %s1375_s19, %s187_s20  }
  0x76   : > { %s908_s23 = scalar_lea.hbm %s1266_s3, 64  ;;  %p1635_p3 = pneg %p1259_p8 }
  0x77   : > { %p909_p0 = scmp.ne.s32.totalorder %s1266_s3, %s908_s23  ;;  %s913_s15 = scalar_lea.hbm %s1563_s2, 768 }
  0x78   : > { %p914_p2 = scmp.lt.u32.totalorder %s1266_s3, %s1563_s2  ;;  %p915_p9 = scmp.lt.u32.totalorder %s913_s15, %s908_s23 }
  0x79   : > { %p911_p6 = pnand %p909_p0, %p1635_p3  ;;  %p917_p1 = scmp.lt.u32.totalorder %s908_s23, %s1266_s3 }
  0x7a   : > { %p916_p13 = por %p915_p9, %p914_p2 }
  0x7b   : > { %p912_p7 = pneg %p911_p6 }
  0x7c   : > { %p918_p4 = por %p917_p1, %p916_p13 }
  0x7e   : > { %p919_p5 = pnand %p918_p4, %p912_p7 }
  0x80   : > { %922 = shalt.err (!%p919_p5)
}
  0x81   : > { %s923_s4 = scalar_lea.vmem %s246_s16, 64  ;;  %p1636_p11 = pmov %p1635_p3 }
  0x82   : > { %p924_p10 = scmp.ne.s32.totalorder %s246_s16, %s923_s4  ;;  %s1100_s19 = smov [#allocation10]  }
  0x83   : > { %s928_s20 = sshll.u32 %s1100_s19, 4  ;;  %s929_s20 = int_to_ptr.vmem [resolvable:$false] %s928_s20 }
  0x84   : > { %p926_p12 = pnand %p924_p10, %p1636_p11  ;;  %s930_s18 = scalar_lea.vmem %s929_s20, 128 }
  0x85   : > { %p931_p3 = scmp.lt.s32.totalorder %s246_s16, %s929_s20  ;;  %p932_p6 = scmp.lt.s32.totalorder %s930_s18, %s923_s4 }
  0x86   : > { %p927_p0 = pneg %p926_p12 }
  0x87   : > { %p933_p2 = por %p932_p6, %p931_p3 }
  0x89   : > { %p934_p9 = pnand %p933_p2, %p927_p0 }
  0x8b   : > { %937 = shalt.err (!%p934_p9)
}
  0x8c   : > { %s1637_s29 = sld [smem:[#allocation26_spill]]  ;;  %s1638_s30 = sld [smem:[#allocation27_spill]] }
  0x92   : > { %706 = dma.hbm_to_vmem [thread:$0]  (!%p1259_p8), %s1266_s3, 64, %s246_s16, %s1637_s29  }
  0x93   : > { %p1639_p7 = scmp.ne.s32.totalorder %s1638_s30, 0 }
  0x94   : > { %s1640_s10 = sld [smem:[#allocation17_spill]] (!%p1639_p7)  ;;  %s1641_s12 = sld [smem:[#allocation28_spill]] (!%p1639_p7) }
  0x95   : > { %254 = sbr.rel (%p1639_p7) target bundleno = 1021 (0x3fd), region = 32 }
  0x9a   : > { %s1447_s11 = sand.u32 (!%p1639_p7), 1, %s1640_s10   ;;  %p1642_p13 = scmp.ne.s32.totalorder (!%p1639_p7), %s1641_s12, 0 }
  0x9b   : > { %s653_s7 = sshll.u32 (!%p1639_p7), %s1447_s11, 2  ;;  %s257_s9 = scalar_lea.sflag (!%p1639_p7), [#allocation6], %s1447_s11 }
  0x9c   : > { %s260_s23 = scalar_lea.vmem [#allocation5], %s653_s7 }
  0x9d   : > { %1027 = dma.done.wait (%p1642_p13), %s257_s9, 64  }
  0x9e   : > { %1029 = vsyncadd (%p1642_p13), %s257_s9, 4294967232  ;;  %s1643_s5 = sld [smem:[#allocation24_spill]]  ;;  %s1644_s27 = sld [smem:[#allocation15_spill]] }
  0x9f   : > { %s1645_s3 = sld [smem:[#allocation25_spill]] }
  0xa4   : > { %s265_s16 = sand.u32 1, %s1643_s5   ;;  %s267_s13 = sand.u32 1, %s1644_s27  }
  0xa5   : > { %s1457_s15 = sshll.u32 %s267_s13, 2  ;;  %s266_s21 = scalar_lea.sflag [#allocation9], %s265_s16 }
  0xa6   : > { %s269_s6 = scalar_lea.vmem [#allocation8], %s1457_s15  ;;  %p1646_p8 = scmp.ne.s32.totalorder %s1645_s3, 0 }
  0xa8   : > { %1031 = dma.done.wait (%p1646_p8), %s266_s21, 128  }
  0xa9   : > { %1033 = vsyncadd (%p1646_p8), %s266_s21, 4294967168  ;;  %s278_s4 = scalar_lea.vmem [#allocation10], %s1457_s15  ;;  %s1465_s19 = scalar_lea.vmem [#allocation11], %s653_s7 }
  0xaa   : > { %s1647_s20 = sld [smem:[#allocation18_spill]] }
  0xb0   : > { %p657_p1 = scmp.ne.s32.totalorder %s1647_s20, 0 }
  0xb1   : > { %vm317_vm0 = vcmask (!%p657_p1), 7168   ;;  %vm320_vm1 = vcmask (!%p657_p1), 130048   ;;  %v1101_v0 = vmov (!%p657_p1), -inf   ;;  %v1102_v1 = vmov (!%p657_p1), 0.0  }
  0xb2   : > { %316 = sbr.rel (%p657_p1) target bundleno = 185 (0xb9), region = 48  ;;  %318 = vst.msk [vmem:[#allocation2] sm:$0xff] (!%p657_p1), %vm317_vm0, %v1101_v0  ;;  %319 = vst.msk [vmem:[#allocation3] sm:$0xff] (!%p657_p1), %vm317_vm0, %v1102_v1 }
  0xb3   : > { %321 = vst.msk [vmem:[#allocation4] sm:$0xff] (!%p657_p1), %vm320_vm1, %v1102_v1 }
  0xb9 PF: > { %v324_v2 = vld [vmem:[%s269_s6] sm:$0xf]  ;;  %vm326_vm2 = vcmask 130048   ;;  %v1103_v3 = vmov 0.0   ;;  %vm1104_vm3 = vmmov 0   ;;  %vm374_vm4 = vcmask 64512  }
  0xba   : > { %669 = vmatprep.subr.bf16.mxu0 %v1103_v3  ;;  %v331_v4 = vsel %vm326_vm2, %v324_v2, 0  ;;  %671 = vmatprep.mubr.msk.bf16.mxu0 %vm1104_vm3, %v1103_v3  ;;  %v322_v5 = vld [vmem:[%s260_s23] sm:$0xf]  ;;  %v1105_v12 = vmov 0   ;;  %v373_v13 = vld [vmem:[#allocation2] sm:$0xff]  ;;  %vm396_vm5 = vcmask 7168  }
  0xbb   : > { %670 = vmatpush3.bf16.xpose.msra.mxu0 %v331_v4  ;;  %675 = vmatprep.subr.bf16.mxu1 %v1103_v3  ;;  %v323_v6 = vmul.bf16 1048592000, %v322_v5  ;;  %v325_v17 = vld [vmem:[%s278_s4] sm:$0xf]  ;;  %vm409_vm6 = vcmask 1043456   ;;  %v398_v31 = vld [vmem:[#allocation4] sm:$0xff] }
  0xbc   : > { %677 = vmatprep.mubr.msk.bf16.mxu1 %vm1104_vm3, %v1103_v3  ;;  %839 = vset.pattern.permute.xlu0 %v1105_v12  ;;  %v411_v18 = vsel %vm409_vm6, %v325_v17, 0  ;;  %v390_v27 = vld [vmem:[#allocation3] sm:$0xff]  ;;  %s1648_s18 = sld [smem:[#allocation18_spill]] }
  0xbd   : > { %840 = vset.pattern.permute.xlu1 %v1105_v12  ;;  %676 = vmatpush3.bf16.msra.mxu1 %v411_v18 }
  0xc2   : > { %672 = vmatmul.mubr.msk.bf16.vlgmr.msra.gmra.mrb[0].mxu0 %vm326_vm2, %v323_v6  ;;  %p660_p4 = scmp.ne.s32.totalorder %s1648_s18, 2 }
  0xc3   : > { %v1106_v40 = vmov (!%p660_p4), 0   ;;  %vm470_vm7 = vcmask (!%p660_p4), 125952  }
 0x195   : > { %v367_v7 = vpop.f32.mrb[0].mxu0 }
 0x196   : > { %v673_v8 = vpop.f32.mrb[1].mxu0  ;;  %v375_v9 = vsel %vm374_vm4, %v367_v7, -inf }
 0x197   : > { %376 = vmax.xlane.f32.xlu0 %v375_v9  ;;  %v370_v10 = vpop.f32.mrb[2].mxu0 }
 0x198   : > { %v674_v11 = vpop.f32.mrb[3].mxu0 }
 0x224   : > { %v377_v14 = vpop.xlane.xlu0 %376 }
 0x225   : > { %v378_v15 = vmax.f32 %v373_v13, %v377_v14 }
 0x227   : > { %v379_v16 = vsub.f32 %v373_v13, %v378_v15  ;;  %455 = vst.msk [vmem:[#allocation2] sm:$0xff] %vm396_vm5, %v378_v15  ;;  %384 = vperm.xlu0 %839, %v378_v15  }
 0x229   : > { %v380_v25 = vmul.f32 1.442695, %v379_v16 }
 0x22b   : > { %845 = vset.pattern.permute.xlu0 (!%p660_p4), %v1106_v40 }
 0x2a6   : > { %v385_v19 = vpop.permute.xlu0 %384 }
 0x2a7   : > { %v387_v20 = vsub.f32 %v367_v7, %v385_v19 }
 0x2a9   : > { %v388_v21 = vmul.f32 1.442695, %v387_v20 }
 0x2ab   : > { %841 = vpow2.f32 %v388_v21 }
 0x2ac   : > { %843 = vpow2.f32 %v380_v25 }
 0x2b5   : > { %v842_v22 = vpop.eup %841 }
 0x2b6   : > { %v392_v23 = vsel %vm374_vm4, %v842_v22, 0.0  ;;  %v405_v24 = vpack.c.bf16 %v842_v22, %v842_v22  ;;  %v844_v26 = vpop.eup %843 }
 0x2b7   : > { %393 = vadd.xlane.f32.xlu1 %v392_v23  ;;  %v391_v28 = vmul.f32 %v844_v26, %v390_v27 }
 0x2b8   : > { %678 = vmatmul.mubr.msk.bf16.vlgmr.msra.gmra.mrb[0].mxu1 %vm374_vm4, %v405_v24 }
 0x2c8   : > { %401 = vperm.xlu1 %840, %v844_v26  }
 0x344   : > { %v394_v29 = vpop.xlane.xlu1 %393 }
 0x345   : > { %v395_v30 = vadd.f32 %v394_v29, %v391_v28 }
 0x347   : > { %397 = vst.msk [vmem:[#allocation3] sm:$0xff] %vm396_vm5, %v395_v30 }
 0x348   : > { %v402_v32 = vpop.permute.xlu1 %401 }
 0x349   : > { %v404_v33 = vmul.f32 %v402_v32, %v398_v31 }
 0x34e   : > { %v460_v39 = vld [vmem:[#allocation3] sm:$0xff] (!%p660_p4) }
 0x34f   : > { %846 = vrcp.f32 (!%p660_p4), %v460_v39 }
 0x359   : > { %v847_v41 = vpop.eup (!%p660_p4), %846 }
 0x35a   : > { %465 = vperm.xlu0 (!%p660_p4), %845, %v847_v41  }
 0x388   : > { %459 = sbr.rel (%p660_p4) target bundleno = 991 (0x3df), region = 52 }
 0x38b   : > { %v447_v34 = vpop.f32.mrb[0].mxu1 }
 0x38c   : > { %v453_v35 = vadd.f32 %v447_v34, %v404_v33  ;;  %v679_v36 = vpop.f32.mrb[1].mxu1 }
 0x38d   : > { %v450_v37 = vpop.f32.mrb[2].mxu1 }
 0x38e   : > { %454 = vst.msk [vmem:[#allocation4] sm:$0xff] %vm326_vm2, %v453_v35  ;;  %v680_v38 = vpop.f32.mrb[3].mxu1 }
 0x395   : > { %v462_v42 = vld [vmem:[#allocation4] sm:$0xff] }
 0x3d9   : > { %v466_v43 = vpop.permute.xlu0 %465 }
 0x3da   : > { %v468_v44 = vmul.f32 %v466_v43, %v462_v42 }
 0x3dc   : > { %v469_v45 = vpack.c.bf16 %v468_v44, %v468_v44 }
 0x3de   : > { %471 = vst.msk [vmem:[%s1465_s19] sm:$0xf] %vm470_vm7, %v469_v45 }
 0x3df PF: > { %s1649_s29 = sld [smem:[#allocation20_spill]]  ;;  %s1650_s30 = sld [smem:[#allocation21_spill]] }
 0x3e0   : > { %s1651_s10 = sld [smem:[#allocation19_spill]]  ;;  %s490_s23 = sshll.u32 %s1465_s19, 4  ;;  %s1484_s23 = int_to_ptr.vmem [resolvable:$true] %s490_s23 }
 0x3e1   : > { %s1652_s12 = sld [smem:[#allocation30_spill]]  ;;  %s1653_s15 = sld [smem:[#allocation34_spill]] }
 0x3e2   : > { %s473_s4 = scalar_lea.sflag [#allocation7], %s1447_s11  ;;  %s938_s20 = scalar_lea.vmem %s1484_s23, 64 }
 0x3e3   : > { %p939_p5 = scmp.ne.s32.totalorder %s1484_s23, %s938_s20  ;;  %s1107_s18 = smov [#allocation11]  }
 0x3e4   : > { %s942_s19 = sshll.u32 %s1107_s18, 4  ;;  %s943_s19 = int_to_ptr.vmem [resolvable:$false] %s942_s19 }
 0x3e5   : > { %s687_s7 = smul.u32 3, %s1649_s29  ;;  %s944_s29 = scalar_lea.vmem %s943_s19, 128 }
 0x3e6   : > { %s688_s9 = smul.u32 6, %s1650_s30  ;;  %p945_p0 = scmp.lt.s32.totalorder %s1484_s23, %s943_s19 }
 0x3e7   : > { %s484_s5 = sadd.s32 %s1651_s10, %s687_s7  ;;  %s1654_s6 = smov %s1653_s15 }
 0x3e8   : > { %s486_s27 = sadd.s32 %s688_s9, %s484_s5  ;;  %p1655_p10 = scmp.ne.s32.totalorder %s1652_s12, 0 }
 0x3e9   : > { %s662_s3 = sshll.u32 %s486_s27, 6  ;;  %p946_p3 = scmp.lt.s32.totalorder %s944_s29, %s938_s20 }
 0x3ea   : > { %s488_s21 = scalar_lea.hbm %s1653_s15, %s662_s3  ;;  %p940_p11 = pnand %p939_p5, %p1655_p10 }
 0x3eb   : > { %p947_p6 = por %p946_p3, %p945_p0 }
 0x3ec   : > { %p941_p12 = pneg %p940_p11 }
 0x3ee   : > { %p948_p2 = pnand %p947_p6, %p941_p12 }
 0x3f0   : > { %951 = shalt.err (!%p948_p2)
}
 0x3f1   : > { %s952_s30 = scalar_lea.hbm %s488_s21, 64  ;;  %s956_s7 = scalar_lea.hbm %s1654_s6, 768 }
 0x3f2   : > { %p953_p9 = scmp.ne.s32.totalorder %s488_s21, %s952_s30  ;;  %p957_p8 = scmp.lt.u32.totalorder %s488_s21, %s1654_s6 }
 0x3f3   : > { %p958_p1 = scmp.lt.u32.totalorder %s956_s7, %s952_s30  ;;  %p960_p5 = scmp.lt.u32.totalorder %s952_s30, %s488_s21 }
 0x3f4   : > { %p954_p7 = pnand %p953_p9, %p1655_p10 }
 0x3f5   : > { %p959_p4 = por %p958_p1, %p957_p8 }
 0x3f6   : > { %p955_p13 = pneg %p954_p7 }
 0x3f7   : > { %p961_p11 = por %p960_p5, %p959_p4 }
 0x3f9   : > { %p962_p12 = pnand %p961_p11, %p955_p13 }
 0x3fb   : > { %965 = shalt.err (!%p962_p12)
}
 0x3fc   : > { %695 = dma.vmem_to_hbm [thread:$0]  (%p1655_p10), %s1484_s23, 64, %s488_s21, %s473_s4  }
 0x3fd PF: > { %s1656_s27 = sld [smem:[#allocation16_spill]]  ;;  %s1657_s3 = sld [smem:[#allocation32_spill]] }
 0x3fe   : > { %p712_p0 = scmp.ge.s32.totalorder %s1096_s26, 2 }
 0x403   : > { %s502_s16 = sand.u32 1, %s1656_s27   ;;  %p1658_p3 = scmp.ne.s32.totalorder %s1657_s3, 0 }
 0x404   : > { %s503_s13 = scalar_lea.sflag [#allocation7], %s502_s16 }
 0x405   : > { %p708_p6 = pnand %p712_p0, %p1658_p3 }
 0x407   : > { %1035 = dma.done.wait (!%p708_p6), %s503_s13, 64  }
 0x408   : > { %1037 = vsyncadd (!%p708_p6), %s503_s13, 4294967232  ;;  %s22_s26 = sadd.s32 1, %s1096_s26   ;;  %s1660_s12 = sld [smem:[#allocation15_spill]] }
 0x409   : > { %p1511_p2 = scmp.ge.s32.totalorder %s22_s26, 38   ;;  %s1661_s23 = sld [smem:[#allocation17_spill]] }
 0x40a   : > { %s1662_s19 = sld [smem:[#allocation22_spill]]  ;;  %s1663_s20 = sld [smem:[#allocation23_spill]] }
 0x40b   : > { %s1664_s4 = sld [smem:[#allocation29_spill]]  ;;  %s1665_s29 = sld [smem:[#allocation31_spill]] }
 0x40c   : > { %s1667_s13 = smov %s1048_s14  ;;  %s1668_s14 = smov %s1393_s8 }
 0x40d   : > { %s1670_s16 = smov %s1060_s17  ;;  %s1671_s17 = smov %s1388_s24 }
 0x40e   : > { %s1672_s18 = smov %s1080_s22  ;;  %s1673_s21 = smov %s1092_s25 }
 0x40f   : > { %s1669_s15 = smov %s1661_s23  ;;  %s1674_s22 = smov %s1679_s28 }
 0x410   : > { %s1677_s25 = smov %s1691_s1  ;;  %21 = sbr.rel (!%p1511_p2) target bundleno = 16 (0x10), region = 109 }
 0x411   : > { %s1675_s23 = smov %s1664_s4  ;;  %s1676_s24 = smov %s1665_s29 }
 0x417   :  { %508 = vsyncpa [#allocation6], 1 }
 0x418   :  { %510 = vsyncpa [#allocation6 + $0x1], 1 }
 0x419   :  { %511 = vsyncpa [#allocation9], 1 }
 0x41a   :  { %513 = vsyncpa [#allocation9 + $0x1], 1 }
 0x41b   :  { %514 = vsyncpa [#allocation7], 1 }
 0x41c   :  { %516 = vsyncpa [#allocation7 + $0x1], 1 }

// kernel: joint_transformer_block.10
= control target key start
LH: loop header
LB: loop body
LE: loop exit
PB: predicated region body
PF: predicated region fallthrough
CT: control target
= control target key end

     0   :  { %s2325_s0 = inlined_call_operand.hbm [shape: f32[2,16,32], index: 0, kind: input, shape index: {}, may-alias: {0,9}]   ;;  %s2326_s1 = inlined_call_operand.hbm [shape: bf16[2,16,32], index: 1, kind: input, shape index: {}]   ;;  %s2327_s2 = inlined_call_operand.hbm [shape: f32[2,6,32], index: 2, kind: input, shape index: {}]   ;;  %s2328_s3 = inlined_call_operand.hbm [shape: bf16[32,32], index: 3, kind: input, shape index: {}]   ;;  %s2329_s4 = inlined_call_operand.hbm [shape: f32[1,32], index: 4, kind: input, shape index: {}]   ;;  %s2330_s5 = inlined_call_operand.hbm [shape: bf16[32,128], index: 5, kind: input, shape index: {}]   ;;  %s2331_s6 = inlined_call_operand.hbm [shape: f32[1,128], index: 6, kind: input, shape index: {}]   ;;  %s2332_s7 = inlined_call_operand.hbm [shape: bf16[128,32], index: 7, kind: input, shape index: {}]   ;;  %s2333_s8 = inlined_call_operand.hbm [shape: f32[1,32], index: 8, kind: input, shape index: {}]   ;;  %s2334_s9 = inlined_call_operand.hbm [shape: f32[2,16,32], index: 9, kind: output, shape index: {}, may-alias: {0,9}]  }
   0x1   :  { %2357 = sst [smem:[#allocation37_spill]] %s2326_s1 }
   0x2   :  { %2358 = sst [smem:[#allocation38_spill]] %s2327_s2 }
   0x3   :  { %2359 = sst [smem:[#allocation39_spill]] %s2328_s3 }
   0x4   :  { %2360 = sst [smem:[#allocation40_spill]] %s2330_s5 }
   0x5   :  { %2361 = sst [smem:[#allocation41_spill]] %s2332_s7 }
   0x6   :  { %2362 = sst [smem:[#allocation42_spill]] %s2334_s9 }
   0x7   :  { %14 = vsyncpa [#allocation3], 0 }
   0x8   :  { %16 = vsyncpa [#allocation3 + $0x1], 0 }
   0x9   :  { %17 = vsyncpa [#allocation6], 0 }
   0xa   :  { %19 = vsyncpa [#allocation6 + $0x1], 0 }
   0xb   :  { %20 = vsyncpa [#allocation9], 0 }
   0xc   :  { %21 = vsyncpa [#allocation12], 0 }
   0xd   :  { %22 = vsyncpa [#allocation15], 0 }
   0xe   :  { %23 = vsyncpa [#allocation4], 0 }
   0xf   :  { %25 = vsyncpa [#allocation4 + $0x1], 0  ;;  %s1783_s30 = smov 0   ;;  %s1785_s10 = smov 0  }
  0x10   :  { %s1787_s11 = smov 0   ;;  %s1789_s12 = smov 0  }
  0x11   :  { %s1791_s13 = smov 0   ;;  %s1793_s14 = smov 0  }
  0x12   :  { %s1795_s15 = smov 0   ;;  %s1797_s16 = smov 0  }
  0x13   :  { %s1799_s17 = smov 0   ;;  %s1801_s18 = smov 0  }
  0x14   :  { %s1803_s19 = smov 0  }
  0x15 LB: > { %2363 = sst [smem:[#allocation25_spill]] %s1677_s30  ;;  %s1839_s20 = sadd.s32 4294967295, %s1717_s19   ;;  %s1717_s19 = sphi %s1803_s19, %s31_s19   ;;  %s1713_s18 = sphi %s1801_s18, %s2433_s18   ;;  %s1709_s17 = sphi %s1799_s17, %s2426_s17   ;;  %s1705_s16 = sphi %s1797_s16, %s2432_s16   ;;  %s1701_s15 = sphi %s1795_s15, %s2425_s15   ;;  %s1697_s14 = sphi %s1793_s14, %s2424_s14   ;;  %s1693_s13 = sphi %s1791_s13, %s2431_s13   ;;  %s1689_s12 = sphi %s1789_s12, %s2430_s12   ;;  %s1685_s11 = sphi %s1787_s11, %s2429_s11   ;;  %s1681_s10 = sphi %s1785_s10, %s2428_s10   ;;  %s1677_s30 = sphi %s1783_s30, %s2420_s30  }
  0x16   : > { %2364 = sst [smem:[#allocation26_spill]] %s1681_s10  ;;  %p1024_p0 = scmp.ge.s32.totalorder %s1717_s19, 1 }
  0x17   : > { %2365 = sst [smem:[#allocation27_spill]] %s1685_s11  ;;  %p2340_p1 = scmp.eq.s32.totalorder %s1839_s20, 0 }
  0x18   : > { %2366 = sst [smem:[#allocation28_spill]] %s1697_s14  ;;  %p284_p2 = scmp.lt.s32.totalorder %s1717_s19, 5 }
  0x19   : > { %2367 = sst [smem:[#allocation29_spill]] %s1701_s15  ;;  %s1719_s22 = smov [#allocation8]  }
  0x1a   : > { %2368 = sst [smem:[#allocation30_spill]] %s1705_s16  ;;  %p1844_p3 = pnand %p1024_p0, %p284_p2 }
  0x1b   : > { %2369 = sst [smem:[#allocation31_spill]] %s1709_s17  ;;  %s296_s23 = sshll.u32 %s1719_s22, 4  ;;  %s1848_s23 = int_to_ptr.vmem [resolvable:$true] %s296_s23 }
  0x1c   : > { %s2370_s21 = scalar_select %p1844_p3, 1, 0 }
  0x1d   : > { %p1156_p4 = pneg %p1844_p3  ;;  %s1720_s25 = smov [#allocation11]  }
  0x1e   : > { %2371 = sst [smem:[#allocation32_spill]] %s2370_s21  ;;  %s320_s26 = sshll.u32 %s1720_s25, 4  ;;  %s1858_s26 = int_to_ptr.vmem [resolvable:$true] %s320_s26 }
  0x1f   : > { %p1854_p5 = pnand %p1156_p4, %p2340_p1  ;;  %s1721_s27 = smov [#allocation14]  }
  0x20   : > { %s1860_s28 = sshll.u32 %s1721_s27, 4  ;;  %s2373_s3 = sld [smem:[#allocation39_spill]]  ;;  %s345_s28 = int_to_ptr.vmem [resolvable:$true] %s1860_s28 }
  0x21   : > { %s2372_s24 = scalar_select %p1854_p5, 1, 0 }
  0x22   : > { %p1870_p7 = pneg %p1854_p5 }
  0x26   : > { %s1317_s22 = scalar_lea.hbm %s2373_s3, 256 }
  0x27   : > { %p1318_p6 = scmp.ne.s32.totalorder %s2373_s3, %s1317_s22  ;;  %p1324_p10 = scmp.lt.u32.totalorder %s1317_s22, %s2373_s3 }
  0x29   : > { %p1320_p8 = pnand %p1870_p7, %p1318_p6 }
  0x2b   : > { %p1321_p9 = pneg %p1320_p8 }
  0x2d   : > { %p1326_p11 = pnand %p1324_p10, %p1321_p9 }
  0x2f   : > { %1329 = shalt.err (!%p1326_p11)
}
  0x30   : > { %s1330_s9 = scalar_lea.vmem %s1848_s23, 256  ;;  %p1338_p2 = scmp.lt.s32.totalorder %s1848_s23, %s1848_s23 }
  0x31   : > { %p1331_p12 = scmp.ne.s32.totalorder %s1848_s23, %s1330_s9  ;;  %p1339_p4 = scmp.lt.s32.totalorder %s1330_s9, %s1330_s9 }
  0x33   : > { %p1333_p13 = pnand %p1331_p12, %p1870_p7  ;;  %p1340_p6 = por %p1339_p4, %p1338_p2 }
  0x35   : > { %p1334_p0 = pneg %p1333_p13 }
  0x37   : > { %p1341_p8 = pnand %p1340_p6, %p1334_p0 }
  0x39   : > { %1344 = shalt.err (!%p1341_p8)
}
  0x3a   : > { %s1722_s15 = smov 64   ;;  %s1723_s16 = smov 4  }
  0x3b   : > { %1159 = dma.hbm_to_vmem [thread:$0]  (!%p1854_p5), %s2373_s3, 256, %s1848_s23, [#allocation9], %s1722_s15, %s1722_s15, %s1723_s16  }
  0x3c   : > { %s2375_s5 = sld [smem:[#allocation40_spill]] }
  0x42   : > { %s1345_s9 = scalar_lea.hbm %s2375_s5, 256 }
  0x43   : > { %p1346_p9 = scmp.ne.s32.totalorder %s2375_s5, %s1345_s9  ;;  %p1352_p12 = scmp.lt.u32.totalorder %s1345_s9, %s2375_s5 }
  0x45   : > { %p1348_p10 = pnand %p1346_p9, %p1870_p7 }
  0x47   : > { %p1349_p11 = pneg %p1348_p10 }
  0x49   : > { %p1354_p13 = pnand %p1352_p12, %p1349_p11 }
  0x4b   : > { %1357 = shalt.err (!%p1354_p13)
}
  0x4c   : > { %s1358_s23 = scalar_lea.vmem %s1858_s26, 256  ;;  %p1366_p6 = scmp.lt.s32.totalorder %s1858_s26, %s1858_s26 }
  0x4d   : > { %p1359_p0 = scmp.ne.s32.totalorder %s1858_s26, %s1358_s23  ;;  %p1367_p8 = scmp.lt.s32.totalorder %s1358_s23, %s1358_s23 }
  0x4f   : > { %p1361_p2 = pnand %p1359_p0, %p1870_p7  ;;  %p1368_p9 = por %p1367_p8, %p1366_p6 }
  0x51   : > { %p1362_p4 = pneg %p1361_p2 }
  0x53   : > { %p1369_p10 = pnand %p1368_p9, %p1362_p4 }
  0x55   : > { %1372 = shalt.err (!%p1369_p10)
}
  0x56   : > { %1165 = dma.hbm_to_vmem [thread:$0]  (!%p1854_p5), %s2375_s5, 256, %s1858_s26, [#allocation12], %s1722_s15, %s1722_s15, %s1723_s16  }
  0x57   : > { %s2376_s7 = sld [smem:[#allocation41_spill]] }
  0x5d   : > { %s1373_s29 = scalar_lea.hbm %s2376_s7, 1024 }
  0x5e   : > { %p1374_p11 = scmp.ne.s32.totalorder %s2376_s7, %s1373_s29  ;;  %p1380_p0 = scmp.lt.u32.totalorder %s1373_s29, %s2376_s7 }
  0x60   : > { %p1376_p12 = pnand %p1374_p11, %p1870_p7 }
  0x62   : > { %p1377_p13 = pneg %p1376_p12 }
  0x64   : > { %p1382_p2 = pnand %p1380_p0, %p1377_p13 }
  0x66   : > { %1385 = shalt.err (!%p1382_p2)
}
  0x67   : > { %s1386_s23 = scalar_lea.vmem %s345_s28, 1024  ;;  %p1394_p9 = scmp.lt.s32.totalorder %s345_s28, %s345_s28 }
  0x68   : > { %p1387_p4 = scmp.ne.s32.totalorder %s345_s28, %s1386_s23  ;;  %p1395_p10 = scmp.lt.s32.totalorder %s1386_s23, %s1386_s23 }
  0x6a   : > { %p1389_p6 = pnand %p1387_p4, %p1870_p7  ;;  %p1396_p1 = por %p1395_p10, %p1394_p9 }
  0x6c   : > { %p1390_p8 = pneg %p1389_p6 }
  0x6e   : > { %p1397_p3 = pnand %p1396_p1, %p1390_p8 }
  0x70   : > { %1400 = shalt.err (!%p1397_p3)
}
  0x71   : > { %1171 = dma.hbm_to_vmem [thread:$0]  (!%p1854_p5), %s2376_s7, 1024, %s345_s28, [#allocation15], %s1722_s15, %s1722_s15, %s1723_s16  }
  0x72   : > { %s1023_s30 = sadd.s32 4294967294, %s1717_s19   ;;  %s40_s10 = sadd.s32 1, %s1709_s17 }
  0x73   : > { %s43_s11 = sadd.s32 1, %s1713_s18  ;;  %p41_p1 = scmp.ge.s32.totalorder %s40_s10, 2 }
  0x74   : > { %s52_s29 = sadd.s32 1, %s1697_s14  ;;  %p59_p3 = scmp.ne.s32.totalorder %s1697_s14, %s1693_s13 }
  0x75   : > { %p2342_p11 = scmp.eq.s32.totalorder %s1717_s19, 0  ;;  %s2435_s10 = smov (%p41_p1, %s40_s10), 0 }
  0x76   : > { %2377 = sst [smem:[#allocation33_spill]] %s2435_s10  ;;  %s2437_s11 = smov (!%p41_p1, %s43_s11), %s1713_s18 }
  0x77   : > { %s48_s22 = ssub.s32 %s1709_s17, %s2435_s10  ;;  %p1956_p12 = por %p2342_p11, %p59_p3 }
  0x78   : > { %p45_p13 = scmp.ge.s32.totalorder %s2437_s11, 2  ;;  %p65_p0 = scmp.ne.s32.totalorder %s1693_s13, %s1689_s12 }
  0x79   : > { %p271_p2 = scmp.eq.s32.totalorder %s1839_s20, 3  ;;  %p277_p4 = scmp.eq.s32.totalorder %s1023_s30, 3 }
  0x7a   : > { %s2439_s11 = smov (%p45_p13, %s2437_s11), 0  ;;  %p2380_p6 = scmp.eq.s32.totalorder %s1839_s20, 0 }
  0x7b   : > { %2379 = sst [smem:[#allocation34_spill]] %s2439_s11  ;;  %p1971_p9 = por %p271_p2, %p59_p3 }
  0x7c   : > { %p1967_p8 = por %p2380_p6, %p65_p0  ;;  %s1977_s25 = ssub.s32 %s1713_s18, %s2439_s11 }
  0x7d   : > { %s2382_s16 = scalar_select %p1971_p9, 1, 0 }
  0x7e   : > { %s2381_s15 = scalar_select %p1967_p8, 1, 0 }
  0x7f   : > { %p1979_p10 = por %p277_p4, %p65_p0  ;;  %s49_s9 = sor.u32 %s48_s22, %s1977_s25 }
  0x80   : > { %p50_p13 = scmp.eq.s32.totalorder %s49_s9, 0  ;;  %p2347_p11 = scmp.lt.s32.totalorder %s1717_s19, 4 }
  0x81   : > { %s2383_s27 = scalar_select %p1979_p10, 1, 0 }
  0x82   : > { %s1987_s23 = sand.u32 1, %s1697_s14   ;;  %s1033_s26 = sshll.u32 %s1713_s18, 1 }
  0x83   : > { %2384 = sst [smem:[#allocation35_spill]] %s2383_s27  ;;  %s1994_s30 = sadd.s32 %s1709_s17, %s1033_s26 }
  0x84   : > { %s1991_s2 = scalar_select %p50_p13, %s1697_s14, %s52_s29  }
  0x85   : > { %p2000_p3 = pnand %p2347_p11, %p1956_p12  ;;  %s389_s22 = sand.u32 1, %s1717_s19  }
  0x86   : > { %2385 = sst [smem:[#allocation36_spill]] %s1991_s2  ;;  %s1035_s9 = sshll.u32 %s1987_s23, 2 }
  0x87   : > { %s2386_s3 = scalar_select %p2000_p3, 1, 0 }
  0x88   : > { %s1037_s5 = sshll.u32 %s1994_s30, 6  ;;  %s2387_s1 = sld [smem:[#allocation37_spill]] }
  0x89   : > { %s393_s29 = scalar_lea.vmem [#allocation5], %s1035_s9  ;;  %s2014_s26 = scalar_lea.sflag [#allocation6], %s389_s22 }
  0x8a   : > { %s402_s28 = sshll.u32 %s393_s29, 4  ;;  %p2353_p0 = pneg %p2000_p3  ;;  %s2012_s28 = int_to_ptr.vmem [resolvable:$true] %s402_s28 }
  0x8e   : > { %s2010_s10 = scalar_lea.hbm %s2387_s1, %s1037_s5  ;;  %s1406_s11 = scalar_lea.hbm %s2387_s1, 256 }
  0x8f   : > { %s1401_s17 = scalar_lea.hbm %s2010_s10, 64  ;;  %p1407_p6 = scmp.lt.u32.totalorder %s2010_s10, %s2387_s1 }
  0x90   : > { %p1402_p12 = scmp.ne.s32.totalorder %s2010_s10, %s1401_s17  ;;  %p1408_p13 = scmp.lt.u32.totalorder %s1406_s11, %s1401_s17 }
  0x91   : > { %p1410_p1 = scmp.lt.u32.totalorder %s1401_s17, %s2010_s10 }
  0x92   : > { %p1404_p2 = pnand %p2353_p0, %p1402_p12  ;;  %p1409_p11 = por %p1408_p13, %p1407_p6 }
  0x94   : > { %p1405_p4 = pneg %p1404_p2  ;;  %p1411_p10 = por %p1410_p1, %p1409_p11 }
  0x96   : > { %p1412_p9 = pnand %p1411_p10, %p1405_p4 }
  0x98   : > { %1415 = shalt.err (!%p1412_p9)
}
  0x99   : > { %s1416_s22 = scalar_lea.vmem %s2012_s28, 64  ;;  %s1724_s9 = smov [#allocation5]  }
  0x9a   : > { %p1417_p12 = scmp.ne.s32.totalorder %s2012_s28, %s1416_s22  ;;  %s1421_s29 = sshll.u32 %s1724_s9, 4  ;;  %s1422_s29 = int_to_ptr.vmem [resolvable:$false] %s1421_s29 }
  0x9b   : > { %s1423_s14 = scalar_lea.vmem %s1422_s29, 128  ;;  %p1424_p5 = scmp.lt.s32.totalorder %s2012_s28, %s1422_s29 }
  0x9c   : > { %p1419_p2 = pnand %p1417_p12, %p2353_p0  ;;  %p1425_p6 = scmp.lt.s32.totalorder %s1423_s14, %s1416_s22 }
  0x9e   : > { %p1420_p8 = pneg %p1419_p2  ;;  %p1426_p13 = por %p1425_p6, %p1424_p5 }
  0xa0   : > { %p1427_p11 = pnand %p1426_p13, %p1420_p8 }
  0xa2   : > { %1430 = shalt.err (!%p1427_p11)
}
  0xa3   : > { %1181 = dma.hbm_to_vmem [thread:$0]  (!%p2000_p3), %s2010_s10, 64, %s2012_s28, %s2014_s26  }
  0xa4   : > { %s1725_s17 = smov [#allocation10]   ;;  %s1726_s5 = smov [#allocation13]  }
  0xa5   : > { %s310_s2 = sshll.u32 %s1725_s17, 4  ;;  %s334_s7 = sshll.u32 %s1726_s5, 4  ;;  %s311_s2 = int_to_ptr.vmem [resolvable:$true] %s310_s2  ;;  %s335_s7 = int_to_ptr.vmem [resolvable:$true] %s334_s7 }
  0xa6   : > { %s1431_s29 = scalar_lea.hbm %s2329_s4, 16 }
  0xa7   : > { %p1432_p5 = scmp.ne.s32.totalorder %s2329_s4, %s1431_s29  ;;  %p1438_p10 = scmp.lt.u32.totalorder %s1431_s29, %s2329_s4 }
  0xa9   : > { %p1434_p8 = pnand %p1432_p5, %p1870_p7 }
  0xab   : > { %p1435_p9 = pneg %p1434_p8 }
  0xad   : > { %p1440_p1 = pnand %p1438_p10, %p1435_p9 }
  0xaf   : > { %1443 = shalt.err (!%p1440_p1)
}
  0xb0   : > { %s1444_s10 = scalar_lea.vmem %s311_s2, 16  ;;  %s1451_s28 = scalar_lea.vmem %s311_s2, 32 }
  0xb1   : > { %p1445_p4 = scmp.ne.s32.totalorder %s311_s2, %s1444_s10  ;;  %p1452_p6 = scmp.lt.s32.totalorder %s311_s2, %s311_s2 }
  0xb2   : > { %p1453_p13 = scmp.lt.s32.totalorder %s1451_s28, %s1444_s10 }
  0xb3   : > { %p1447_p12 = pnand %p1445_p4, %p1870_p7 }
  0xb4   : > { %p1454_p11 = por %p1453_p13, %p1452_p6 }
  0xb5   : > { %p1448_p2 = pneg %p1447_p12 }
  0xb7   : > { %p1455_p0 = pnand %p1454_p11, %p1448_p2 }
  0xb9   : > { %1458 = shalt.err (!%p1455_p0)
}
  0xba   : > { %p2388_p5 = scmp.ne.s32.totalorder %s2372_s24, 0  ;;  %s1459_s11 = scalar_lea.hbm %s2331_s6, 16 }
  0xbb   : > { %p1460_p8 = scmp.ne.s32.totalorder %s2331_s6, %s1459_s11  ;;  %p1466_p0 = scmp.lt.u32.totalorder %s1459_s11, %s2331_s6 }
  0xbc   : > { %1162 = dma.hbm_to_vmem [thread:$0]  (!%p2388_p5), %s2329_s4, 16, %s311_s2, [#allocation9]  }
  0xbd   : > { %p1462_p9 = pnand %p1460_p8, %p1870_p7 }
  0xbf   : > { %p1463_p10 = pneg %p1462_p9 }
  0xc1   : > { %p1468_p1 = pnand %p1466_p0, %p1463_p10 }
  0xc3   : > { %1471 = shalt.err (!%p1468_p1)
}
  0xc4   : > { %s1472_s10 = scalar_lea.vmem %s335_s7, 16  ;;  %s1479_s2 = scalar_lea.vmem %s335_s7, 32 }
  0xc5   : > { %p1473_p4 = scmp.ne.s32.totalorder %s335_s7, %s1472_s10  ;;  %p1480_p6 = scmp.lt.s32.totalorder %s335_s7, %s335_s7 }
  0xc6   : > { %p1481_p13 = scmp.lt.s32.totalorder %s1479_s2, %s1472_s10 }
  0xc7   : > { %p1475_p12 = pnand %p1473_p4, %p1870_p7 }
  0xc8   : > { %p1482_p11 = por %p1481_p13, %p1480_p6 }
  0xc9   : > { %p1476_p2 = pneg %p1475_p12 }
  0xcb   : > { %p1483_p3 = pnand %p1482_p11, %p1476_p2 }
  0xcd   : > { %1486 = shalt.err (!%p1483_p3)
}
  0xce   : > { %1168 = dma.hbm_to_vmem [thread:$0]  (!%p2388_p5), %s2331_s6, 16, %s335_s7, [#allocation12]  }
  0xcf   : > { %s1727_s5 = smov [#allocation16]   ;;  %s1032_s27 = sshll.u32 %s1987_s23, 3 }
  0xd0   : > { %s358_s1 = sshll.u32 %s1727_s5, 4  ;;  %s1487_s29 = scalar_lea.hbm %s2333_s8, 16  ;;  %s359_s1 = int_to_ptr.vmem [resolvable:$true] %s358_s1 }
  0xd1   : > { %p1488_p3 = scmp.ne.s32.totalorder %s2333_s8, %s1487_s29  ;;  %p1494_p10 = scmp.lt.u32.totalorder %s1487_s29, %s2333_s8 }
  0xd3   : > { %p1490_p8 = pnand %p1488_p3, %p1870_p7 }
  0xd5   : > { %p1491_p9 = pneg %p1490_p8 }
  0xd7   : > { %p1496_p0 = pnand %p1494_p10, %p1491_p9 }
  0xd9   : > { %1499 = shalt.err (!%p1496_p0)
}
  0xda   : > { %s1500_s7 = scalar_lea.vmem %s359_s1, 16  ;;  %s1507_s28 = scalar_lea.vmem %s359_s1, 32 }
  0xdb   : > { %p1501_p1 = scmp.ne.s32.totalorder %s359_s1, %s1500_s7  ;;  %p1508_p2 = scmp.lt.s32.totalorder %s359_s1, %s359_s1 }
  0xdc   : > { %p1509_p6 = scmp.lt.s32.totalorder %s1507_s28, %s1500_s7 }
  0xdd   : > { %p1503_p4 = pnand %p1501_p1, %p1870_p7 }
  0xde   : > { %p1510_p13 = por %p1509_p6, %p1508_p2 }
  0xdf   : > { %p1504_p12 = pneg %p1503_p4 }
  0xe1   : > { %p1511_p11 = pnand %p1510_p13, %p1504_p12 }
  0xe3   : > { %1514 = shalt.err (!%p1511_p11)
}
  0xe4   : > { %1174 = dma.hbm_to_vmem [thread:$0]  (!%p2388_p5), %s2333_s8, 16, %s359_s1, [#allocation15]  }
  0xe5   : > { %s1034_s11 = sshll.u32 %s1994_s30, 7  ;;  %s373_s22 = scalar_lea.vmem [#allocation2], %s1032_s27 }
  0xe6   : > { %s2101_s29 = scalar_lea.hbm %s2325_s0, %s1034_s11  ;;  %s382_s14 = sshll.u32 %s373_s22, 4  ;;  %s383_s14 = int_to_ptr.vmem [resolvable:$true] %s382_s14 }
  0xe7   : > { %s370_s24 = scalar_lea.sflag [#allocation3], %s1987_s23  ;;  %s1515_s10 = scalar_lea.hbm %s2101_s29, 128 }
  0xe8   : > { %p1516_p7 = scmp.ne.s32.totalorder %s2101_s29, %s1515_s10  ;;  %p2389_p3 = scmp.ne.s32.totalorder %s2386_s3, 0 }
  0xe9   : > { %s1520_s2 = scalar_lea.hbm %s2325_s0, 512  ;;  %p1521_p10 = scmp.lt.u32.totalorder %s2101_s29, %s2325_s0 }
  0xea   : > { %p2390_p8 = pneg %p2389_p3  ;;  %p1522_p0 = scmp.lt.u32.totalorder %s1520_s2, %s1515_s10 }
  0xeb   : > { %p1524_p4 = scmp.lt.u32.totalorder %s1515_s10, %s2101_s29 }
  0xec   : > { %p1518_p9 = pnand %p1516_p7, %p2390_p8  ;;  %p1523_p1 = por %p1522_p0, %p1521_p10 }
  0xee   : > { %p1519_p5 = pneg %p1518_p9  ;;  %p1525_p12 = por %p1524_p4, %p1523_p1 }
  0xf0   : > { %p1526_p2 = pnand %p1525_p12, %p1519_p5 }
  0xf2   : > { %1529 = shalt.err (!%p1526_p2)
}
  0xf3   : > { %s1530_s23 = scalar_lea.vmem %s383_s14, 128  ;;  %p2391_p13 = pmov %p2390_p8 }
  0xf4   : > { %p1531_p6 = scmp.ne.s32.totalorder %s383_s14, %s1530_s23  ;;  %s1728_s27 = smov [#allocation2]  }
  0xf5   : > { %s1535_s17 = sshll.u32 %s1728_s27, 4  ;;  %s1536_s17 = int_to_ptr.vmem [resolvable:$false] %s1535_s17 }
  0xf6   : > { %p1533_p11 = pnand %p1531_p6, %p2391_p13  ;;  %s1537_s5 = scalar_lea.vmem %s1536_s17, 256 }
  0xf7   : > { %p1538_p8 = scmp.lt.s32.totalorder %s383_s14, %s1536_s17  ;;  %p1539_p9 = scmp.lt.s32.totalorder %s1537_s5, %s1530_s23 }
  0xf8   : > { %p1534_p7 = pneg %p1533_p11 }
  0xf9   : > { %p1540_p0 = por %p1539_p9, %p1538_p8 }
  0xfb   : > { %p1541_p10 = pnand %p1540_p0, %p1534_p7 }
  0xfd   : > { %1544 = shalt.err (!%p1541_p10)
}
  0xfe   : > { %s2392_s11 = sld [smem:[#allocation27_spill]]  ;;  %s2393_s9 = sld [smem:[#allocation26_spill]] }
  0xff   : > { %s2394_s21 = sld [smem:[#allocation25_spill]]  ;;  %p2395_p5 = scmp.eq.s32.totalorder %s1977_s25, 0 }
 0x100   : > { %1178 = dma.hbm_to_vmem [thread:$0]  (!%p2389_p3), %s2101_s29, 128, %s383_s14, %s370_s24  }
 0x101   : > { %s1039_s30 = sshll.u32 %s1713_s18, 7  ;;  %p2396_p12 = scmp.eq.s32.totalorder %s1717_s19, 0 }
 0x102   : > { %p2397_p6 = scmp.eq.s32.totalorder %s1839_s20, 0  ;;  %s2399_s23 = sld [smem:[#allocation38_spill]] }
 0x103   : > { %p2400_p3 = scmp.lt.s32.totalorder %s1717_s19, 4 }
 0x104   : > { %s106_s22 = sadd.s32 1, %s2392_s11  ;;  %p113_p1 = scmp.ne.s32.totalorder %s2392_s11, %s2393_s9 }
 0x105   : > { %s2127_s10 = scalar_select %p2395_p5, %s2392_s11, %s106_s22  }
 0x106   : > { %p119_p4 = scmp.ne.s32.totalorder %s2393_s9, %s2394_s21  ;;  %s411_s3 = sand.u32 1, %s2392_s11  }
 0x107   : > { %p115_p2 = por %p113_p1, %p2396_p12  ;;  %s1038_s2 = sshll.u32 %s411_s3, 3 }
 0x108   : > { %p2139_p13 = por %p119_p4, %p2397_p6  ;;  %s2146_s29 = scalar_lea.hbm %s2399_s23, %s1039_s30 }
 0x109   : > { %p2150_p11 = pnand %p2400_p3, %p115_p2  ;;  %s413_s14 = scalar_lea.vmem [#allocation7], %s1038_s2 }
 0x10a   : > { %s2398_s1 = scalar_select %p2139_p13, 1, 0 }
 0x10b   : > { %s420_s24 = sshll.u32 %s413_s14, 4  ;;  %s1545_s27 = scalar_lea.hbm %s2146_s29, 128  ;;  %s421_s24 = int_to_ptr.vmem [resolvable:$true] %s420_s24 }
 0x10c   : > { %p1546_p7 = scmp.ne.s32.totalorder %s2146_s29, %s1545_s27  ;;  %p1547_p8 = pneg %p2150_p11 }
 0x10d   : > { %s1550_s11 = scalar_lea.hbm %s2399_s23, 256  ;;  %p1551_p10 = scmp.lt.u32.totalorder %s2146_s29, %s2399_s23 }
 0x10e   : > { %p1548_p9 = pnand %p1547_p8, %p1546_p7  ;;  %p1552_p5 = scmp.lt.u32.totalorder %s1550_s11, %s1545_s27 }
 0x10f   : > { %p1554_p4 = scmp.lt.u32.totalorder %s1545_s27, %s2146_s29 }
 0x110   : > { %p1549_p0 = pneg %p1548_p9  ;;  %p1553_p1 = por %p1552_p5, %p1551_p10 }
 0x112   : > { %p1555_p12 = por %p1554_p4, %p1553_p1 }
 0x114   : > { %p1556_p2 = pnand %p1555_p12, %p1549_p0 }
 0x116   : > { %1559 = shalt.err (!%p1556_p2)
}
 0x117   : > { %s1560_s22 = scalar_lea.vmem %s421_s24, 128  ;;  %s1729_s3 = smov [#allocation7]  }
 0x118   : > { %p1561_p6 = scmp.ne.s32.totalorder %s421_s24, %s1560_s22  ;;  %s1565_s30 = sshll.u32 %s1729_s3, 4  ;;  %s1566_s30 = int_to_ptr.vmem [resolvable:$false] %s1565_s30 }
 0x119   : > { %s1567_s2 = scalar_lea.vmem %s1566_s30, 256  ;;  %p1568_p9 = scmp.lt.s32.totalorder %s421_s24, %s1566_s30 }
 0x11a   : > { %p1563_p3 = pnand %p1561_p6, %p1547_p8  ;;  %p1569_p13 = scmp.lt.s32.totalorder %s1567_s2, %s1560_s22 }
 0x11c   : > { %p1564_p7 = pneg %p1563_p3  ;;  %p1570_p5 = por %p1569_p13, %p1568_p9 }
 0x11e   : > { %p1571_p10 = pnand %p1570_p5, %p1564_p7 }
 0x120   : > { %1574 = shalt.err (!%p1571_p10)
}
 0x121   : > { %1184 = dma.hbm_to_vmem [thread:$0]  (!%p2150_p11), %s2146_s29, 128, %s421_s24, %s2014_s26  }
 0x122   : > { %s2402_s7 = sld [smem:[#allocation32_spill]] }
 0x128   : > { %p2403_p0 = scmp.ne.s32.totalorder %s2402_s7, 0 }
 0x129   : > { %s2179_s28 = sand.u32 (!%p2403_p0), 1, %s1693_s13   ;;  %p2404_p13 = scmp.ne.s32.totalorder (!%p2403_p0), %s2381_s15, 0 }
 0x12a   : > { %429 = sbr.rel (%p2403_p0) target bundleno = 1345 (0x541), region = 56  ;;  %s1041_s14 = sshll.u32 (!%p2403_p0), %s2179_s28, 3 }
 0x12b   : > { %s432_s27 = scalar_lea.sflag (!%p2403_p0), [#allocation3], %s2179_s28  ;;  %s2185_s17 = scalar_lea.vmem (!%p2403_p0), [#allocation2], %s1041_s14 }
 0x131   : > { %1648 = dma.done.wait (%p2404_p13), %s432_s27, 128  }
 0x132   : > { %1650 = vsyncadd (%p2404_p13), %s432_s27, 4294967168  ;;  %s440_s26 = sand.u32 1, %s1839_s20   ;;  %s1042_s29 = sshll.u32 %s2179_s28, 2 }
 0x133   : > { %s441_s25 = scalar_lea.sflag [#allocation6], %s440_s26  ;;  %s444_s24 = scalar_lea.vmem [#allocation5], %s1042_s29 }
 0x134   : > { %1652 = dma.done.wait (%p2404_p13), %s441_s25, 64  }
 0x135   : > { %1654 = vsyncadd (%p2404_p13), %s441_s25, 4294967232  ;;  %s2405_s5 = sld [smem:[#allocation26_spill]]  ;;  %p2406_p11 = scmp.ne.s32.totalorder %s2398_s1, 0 }
 0x13b   : > { %s451_s11 = sand.u32 1, %s2405_s5  }
 0x13c   : > { %s2198_s9 = sshll.u32 %s451_s11, 3 }
 0x13d   : > { %s453_s21 = scalar_lea.vmem [#allocation7], %s2198_s9 }
 0x13e   : > { %1656 = dma.done.wait (%p2406_p11), %s441_s25, 128  }
 0x13f   : > { %1658 = vsyncadd (%p2406_p11), %s441_s25, 4294967168  ;;  %p2407_p8 = scmp.eq.s32.totalorder %s1839_s20, 0 }
 0x141   : > { %1660 = dma.done.wait (%p2407_p8), [#allocation9], 272   ;;  %p2408_p1 = pmov %p2407_p8 }
 0x143   : > { %1662 = vsyncadd (%p2408_p1), [#allocation9], 4294967024  ;;  %p2409_p4 = pmov %p2408_p1 }
 0x144   : > { %p2410_p12 = pmov %p2408_p1 }
 0x145   : > { %1664 = dma.done.wait (%p2409_p4), [#allocation12], 272  }
 0x146   : > { %1666 = vsyncadd (%p2410_p12), [#allocation12], 4294967024  ;;  %p2411_p2 = pmov %p2408_p1 }
 0x147   : > { %p2412_p6 = pmov %p2408_p1 }
 0x148   : > { %1668 = dma.done.wait (%p2411_p2), [#allocation15], 1040  }
 0x149   : > { %1670 = vsyncadd (%p2412_p6), [#allocation15], 4294966256  ;;  %v1730_v0 = vmov 0.0   ;;  %vm1731_vm0 = vmmov 0   ;;  %v1301_v1 = vld [vmem:[#allocation8] sm:$0xff]   ;;  %v1302_v2 = vld [vmem:[#allocation8 + $0x8] sm:$0xff]   ;;  %v593_v4 = vlaneseq }
 0x14a   : > { %1088 = vmatprep.subr.bf16.mxu1 %v1730_v0  ;;  %1092 = vmatprep.mubr.msk.bf16.mxu1 %vm1731_vm0, %v1730_v0  ;;  %vm549_vm1 = vcmask 261120   ;;  %v525_v3 = vld [vmem:[%s444_s24] sm:$0xf]  ;;  %v2228_v7 = vld [vmem:[%s453_s21] sm:$0x3f]  ;;  %v523_v14 = vld [vmem:[%s2185_s17] sm:$0xff] }
 0x14b   : > { %1104 = vmatprep.subr.bf16.mxu0 %v1730_v0  ;;  %1120 = vmatprep.mubr.msk.bf16.mxu0 %vm1731_vm0, %v1730_v0  ;;  %v2225_v5 = vshrl.u32 %v593_v4, 7  ;;  %v1051_v8 = vld [vmem:[#allocation10] ss:$0 sm:$0xff]  ;;  %v1303_v24 = vld [vmem:[#allocation11] sm:$0xff]   ;;  %v1304_v25 = vld [vmem:[#allocation11 + $0x8] sm:$0xff]   ;;  %v613_v30 = vadd.f32 1.0, %v2228_v7 }
 0x14c   : > { %1089 = vmatpush3.bf16.msra.mxu1 %v1301_v1  ;;  %v1305_v26 = vld [vmem:[#allocation14] sm:$0xff]   ;;  %v1306_v40 = vld [vmem:[#allocation14 + $0x8] sm:$0xff]   ;;  %v1307_v41 = vld [vmem:[#allocation14 + $0x10] sm:$0xff]   ;;  %s2413_s20 = sld [smem:[#allocation30_spill]]  ;;  %s2414_s15 = sld [smem:[#allocation29_spill]] }
 0x14d   : > { %1090 = vmatprep.subr.bf16.mxu1 %v1730_v0  ;;  %v595_v6 = vsub.s32 2, %v2225_v5  ;;  %1105 = vmatpush3.bf16.msra.mxu0 %v1305_v26  ;;  %v616_v31 = vsub.s32 4, %v2225_v5  ;;  %v621_v32 = vsub.s32 3, %v2225_v5  ;;  %v1308_v42 = vld [vmem:[#allocation14 + $0x18] sm:$0xff]   ;;  %v1309_v43 = vld [vmem:[#allocation14 + $0x20] sm:$0xff]   ;;  %v1310_v44 = vld [vmem:[#allocation14 + $0x28] sm:$0xff]  }
 0x14e   : > { %1106 = vmatprep.subr.bf16.mxu0 %v1730_v0  ;;  %v1311_v45 = vld [vmem:[#allocation14 + $0x30] sm:$0xff]   ;;  %v1312_v46 = vld [vmem:[#allocation14 + $0x38] sm:$0xff]   ;;  %v814_v63 = vsub.s32 5, %v2225_v5  ;;  %s521_s30 = scalar_lea.vmem [#allocation17], %s1041_s14  ;;  %s2415_s17 = sld [smem:[#allocation42_spill]] }
 0x14f   : > { %v596_v9 = vrot.slane %v2228_v7, %v595_v6  ;;  %v617_v33 = vrot.slane %v613_v30, %v616_v31  ;;  %v622_v35 = vrot.slane %v2228_v7, %v621_v32  ;;  %v1055_v47 = vld [vmem:[#allocation13] ss:$0 sm:$0xff]  ;;  %s835_s2 = sshll.u32 %s521_s30, 4  ;;  %s820_s25 = scalar_lea.sflag [#allocation4], %s2179_s28  ;;  %s2263_s2 = int_to_ptr.vmem [resolvable:$true] %s835_s2 }
 0x150   : > { %1091 = vmatpush3.bf16.msra.mxu1 %v1302_v2  ;;  %v815_v1 = vrot.slane %v2228_v7, %v814_v63  ;;  %s1575_s24 = scalar_lea.vmem %s2263_s2, 128  ;;  %p2417_p7 = scmp.ne.s32.totalorder %s2382_s16, 0 }
 0x151   : > { %1096 = vmatprep.subr.bf16.mxu1 %v1730_v0  ;;  %1107 = vmatpush3.bf16.msra.mxu0 %v1306_v40  ;;  %p1576_p3 = scmp.ne.s32.totalorder %s2263_s2, %s1575_s24  ;;  %s1732_s14 = smov [#allocation17]  }
 0x152   : > { %1108 = vmatprep.subr.bf16.mxu0 %v1730_v0  ;;  %s1069_s1 = sshll.u32 %s2413_s20, 1  ;;  %s1579_s5 = sshll.u32 %s1732_s14, 4  ;;  %s1580_s5 = int_to_ptr.vmem [resolvable:$false] %s1579_s5 }
 0x153   : > { %1093 = vmatmul.mubr.msk.bf16.vlgmr.msra.gmra.mrb[0].mxu1 %vm549_vm1, %v525_v3  ;;  %s831_s22 = sadd.s32 %s2414_s15, %s1069_s1  ;;  %p1577_p9 = pnand %p1576_p3, %p2417_p7 }
 0x154   : > { %1100 = vmatprep.mubr.msk.bf16.mxu1 %vm1731_vm0, %v1730_v0  ;;  %1097 = vmatpush3.bf16.msra.mxu1 %v1303_v24  ;;  %s1070_s3 = sshll.u32 %s831_s22, 7  ;;  %s2416_s26 = smov %s2415_s17 }
 0x155   : > { %1098 = vmatprep.subr.bf16.mxu1 %v1730_v0  ;;  %1109 = vmatpush3.bf16.msra.mxu0 %v1307_v41  ;;  %s2261_s29 = scalar_lea.hbm %s2415_s17, %s1070_s3  ;;  %p1578_p5 = pneg %p1577_p9 }
 0x156   : > { %1110 = vmatprep.subr.bf16.mxu0 %v1730_v0  ;;  %s1581_s11 = scalar_lea.vmem %s1580_s5, 256  ;;  %p1582_p10 = scmp.lt.s32.totalorder %s2263_s2, %s1580_s5 }
 0x157   : > { %p1583_p0 = scmp.lt.s32.totalorder %s1581_s11, %s1575_s24 }
 0x158   : > { %1099 = vmatpush3.bf16.msra.mxu1 %v1304_v25 }
 0x159   : > { %1111 = vmatpush3.bf16.msra.mxu0 %v1308_v42  ;;  %p1584_p13 = por %p1583_p0, %p1582_p10 }
 0x15a   : > { %1112 = vmatprep.subr.bf16.mxu0 %v1730_v0 }
 0x15b   : > { %p1585_p11 = pnand %p1584_p13, %p1578_p5 }
 0x15d   : > { %1113 = vmatpush3.bf16.msra.mxu0 %v1309_v43 }
 0x15e   : > { %1114 = vmatprep.subr.bf16.mxu0 %v1730_v0 }
 0x161   : > { %1115 = vmatpush3.bf16.msra.mxu0 %v1310_v44 }
 0x162   : > { %1116 = vmatprep.subr.bf16.mxu0 %v1730_v0 }
 0x165   : > { %1117 = vmatpush3.bf16.msra.mxu0 %v1311_v45 }
 0x166   : > { %1118 = vmatprep.subr.bf16.mxu0 %v1730_v0  ;;  %v1059_v0 = vld [vmem:[#allocation16] ss:$0 sm:$0xff] }
 0x169   : > { %1119 = vmatpush3.bf16.msra.mxu0 %v1312_v46 }
 0x226   : > { %v587_v10 = vpop.f32.mrb[0].mxu1 }
 0x227   : > { %v588_v11 = vadd.f32 %v1051_v8, %v587_v10  ;;  %v1094_v12 = vpop.f32.mrb[1].mxu1 }
 0x228   : > { %v590_v13 = vpop.f32.mrb[2].mxu1 }
 0x229   : > { %v597_v15 = vmul.f32 %v596_v9, %v588_v11  ;;  %v1095_v16 = vpop.f32.mrb[3].mxu1 }
 0x22b   : > { %v2232_v17 = vadd.f32 %v597_v15, %v523_v14 }
 0x22d   : > { %v599_v18 = vsel %vm549_vm1, %v2232_v17, 0.0 }
 0x22e   : > { %600 = vadd.xlane.f32.xlu0 %v599_v18 }
 0x2bb   : > { %v601_v19 = vpop.xlane.xlu0 %600 }
 0x2bc   : > { %v603_v20 = vmul.f32 0.03125, %v601_v19 }
 0x2be   : > { %v604_v21 = vsub.f32 %v2232_v17, %v603_v20 }
 0x2c0   : > { %v605_v22 = vmul.f32 %v604_v21, %v604_v21 }
 0x2c2   : > { %v606_v23 = vsel %vm549_vm1, %v605_v22, 0.0 }
 0x2c3   : > { %607 = vadd.xlane.f32.xlu0 %v606_v23 }
 0x350   : > { %v608_v27 = vpop.xlane.xlu0 %607 }
 0x351   : > { %v609_v28 = vmul.f32 0.03125, %v608_v27 }
 0x353   : > { %v610_v29 = vadd.f32 1e-06, %v609_v28 }
 0x355   : > { %1313 = vrsqrt.f32 %v610_v29 }
 0x35f   : > { %v1314_v34 = vpop.eup %1313 }
 0x360   : > { %v612_v36 = vmul.f32 %v1314_v34, %v604_v21 }
 0x362   : > { %v618_v37 = vmul.f32 %v617_v33, %v612_v36 }
 0x364   : > { %v623_v38 = vadd.f32 %v622_v35, %v618_v37 }
 0x366   : > { %v624_v39 = vpack.c.bf16 %v623_v38, %v623_v38 }
 0x368   : > { %1101 = vmatmul.mubr.msk.bf16.vlgmr.msra.gmra.mrb[4].mxu1 %vm549_vm1, %v624_v39 }
 0x43b   : > { %v685_v48 = vpop.f32.mrb[4].mxu1 }
 0x43c   : > { %v686_v49 = vadd.f32 %v1055_v47, %v685_v48  ;;  %v1102_v50 = vpop.f32.mrb[5].mxu1 }
 0x43d   : > { %v688_v51 = vpop.f32.mrb[6].mxu1 }
 0x43e   : > { %v692_v52 = vmul.f32 0.044715, %v686_v49  ;;  %v1103_v53 = vpop.f32.mrb[7].mxu1  ;;  %v691_v59 = vmul.f32 0.5, %v686_v49 }
 0x440   : > { %v693_v54 = vmul.f32 %v692_v52, %v686_v49 }
 0x442   : > { %v694_v55 = vmul.f32 %v693_v54, %v686_v49 }
 0x444   : > { %v695_v56 = vadd.f32 %v694_v55, %v686_v49 }
 0x446   : > { %v696_v57 = vmul.f32 0.7978846, %v695_v56 }
 0x448   : > { %1315 = vtanh.f32 %v696_v57 }
 0x452   : > { %v1316_v58 = vpop.eup %1315 }
 0x453   : > { %v698_v60 = vadd.f32 1.0, %v1316_v58 }
 0x455   : > { %v699_v61 = vmul.f32 %v698_v60, %v691_v59 }
 0x457   : > { %v700_v62 = vpack.c.bf16 %v699_v61, %v699_v61 }
 0x459   : > { %1121 = vmatmul.mubr.bf16.vlgmr.msra.gmra.mrb[0].mxu0 %v700_v62 }
 0x52c   : > { %v806_v2 = vpop.f32.mrb[0].mxu0 }
 0x52d   : > { %v807_v3 = vadd.f32 %v1059_v0, %v806_v2  ;;  %v1122_v4 = vpop.f32.mrb[1].mxu0 }
 0x52e   : > { %v809_v6 = vpop.f32.mrb[2].mxu0 }
 0x52f   : > { %v816_v8 = vmul.f32 %v815_v1, %v807_v3  ;;  %v1123_v9 = vpop.f32.mrb[3].mxu0 }
 0x531   : > { %v817_v10 = vadd.f32 %v816_v8, %v2232_v17 }
 0x533   : > { %818 = vst.msk [vmem:[%s521_s30] sm:$0xff] %vm549_vm1, %v817_v10 }
 0x534   : > { %1588 = shalt.err (!%p1585_p11)
}
 0x535   : > { %s1589_s28 = scalar_lea.hbm %s2261_s29, 128  ;;  %s1593_s20 = scalar_lea.hbm %s2416_s26, 512 }
 0x536   : > { %p1590_p8 = scmp.ne.s32.totalorder %s2261_s29, %s1589_s28  ;;  %p1594_p12 = scmp.lt.u32.totalorder %s2261_s29, %s2416_s26 }
 0x537   : > { %p1595_p2 = scmp.lt.u32.totalorder %s1593_s20, %s1589_s28  ;;  %p1597_p3 = scmp.lt.u32.totalorder %s1589_s28, %s2261_s29 }
 0x538   : > { %p1591_p1 = pnand %p1590_p8, %p2417_p7 }
 0x539   : > { %p1596_p6 = por %p1595_p2, %p1594_p12 }
 0x53a   : > { %p1592_p4 = pneg %p1591_p1 }
 0x53b   : > { %p1598_p9 = por %p1597_p3, %p1596_p6 }
 0x53d   : > { %p1599_p5 = pnand %p1598_p9, %p1592_p4 }
 0x53f   : > { %1602 = shalt.err (!%p1599_p5)
}
 0x540   : > { %1154 = dma.vmem_to_hbm [thread:$0]  (%p2417_p7), %s2263_s2, 128, %s2261_s29, %s820_s25  }
 0x541 PF: > { %s2418_s22 = sld [smem:[#allocation35_spill]]  ;;  %p1202_p10 = scmp.ge.s32.totalorder %s1717_s19, 2 }
 0x542   : > { %s847_s3 = sand.u32 1, %s1689_s12  }
 0x543   : > { %s848_s30 = scalar_lea.sflag [#allocation4], %s847_s3 }
 0x547   : > { %p2419_p0 = scmp.ne.s32.totalorder %s2418_s22, 0 }
 0x549   : > { %p1186_p13 = pnand %p1202_p10, %p2419_p0 }
 0x54b   : > { %1672 = dma.done.wait (!%p1186_p13), %s848_s30, 128  }
 0x54c   : > { %1674 = vsyncadd (!%p1186_p13), %s848_s30, 4294967168  ;;  %s31_s19 = sadd.s32 1, %s1717_s19   ;;  %s2420_s30 = sld [smem:[#allocation26_spill]] }
 0x54d   : > { %p28_p11 = scmp.ge.s32.totalorder %s31_s19, 6   ;;  %s2421_s7 = sld [smem:[#allocation27_spill]] }
 0x54e   : > { %s2422_s16 = smov %s2127_s10  ;;  %s2423_s27 = sld [smem:[#allocation28_spill]] }
 0x54f   : > { %s2424_s14 = sld [smem:[#allocation36_spill]]  ;;  %s2425_s15 = sld [smem:[#allocation31_spill]] }
 0x550   : > { %s2426_s17 = sld [smem:[#allocation33_spill]]  ;;  %s2427_s2 = sld [smem:[#allocation34_spill]] }
 0x551   : > { %s2429_s11 = smov %s2422_s16  ;;  %s2430_s12 = smov %s1693_s13 }
 0x552   : > { %s2432_s16 = smov %s1713_s18  ;;  %30 = sbr.rel (!%p28_p11) target bundleno = 21 (0x15), region = 149 }
 0x553   : > { %s2428_s10 = smov %s2421_s7 }
 0x554   : > { %s2431_s13 = smov %s2423_s27 }
 0x556   : > { %s2433_s18 = smov %s2427_s2 }
 0x559   :  { %853 = vsyncpa [#allocation3], 1 }
 0x55a   :  { %855 = vsyncpa [#allocation3 + $0x1], 1 }
 0x55b   :  { %856 = vsyncpa [#allocation6], 1 }
 0x55c   :  { %858 = vsyncpa [#allocation6 + $0x1], 1 }
 0x55d   :  { %859 = vsyncpa [#allocation9], 1 }
 0x55e   :  { %860 = vsyncpa [#allocation12], 1 }
 0x55f   :  { %861 = vsyncpa [#allocation15], 1 }
 0x560   :  { %862 = vsyncpa [#allocation4], 1 }
 0x561   :  { %864 = vsyncpa [#allocation4 + $0x1], 1 }

// kernel: joint_transformer_block.11
= control target key start
LH: loop header
LB: loop body
LE: loop exit
PB: predicated region body
PF: predicated region fallthrough
CT: control target
= control target key end

     0   :  { %s2144_s0 = inlined_call_operand.hbm [shape: f32[2,8,32], index: 0, kind: input, shape index: {}, may-alias: {0,9}]   ;;  %s2145_s1 = inlined_call_operand.hbm [shape: bf16[2,8,32], index: 1, kind: input, shape index: {}]   ;;  %s2146_s2 = inlined_call_operand.hbm [shape: f32[2,6,32], index: 2, kind: input, shape index: {}]   ;;  %s2147_s3 = inlined_call_operand.hbm [shape: bf16[32,32], index: 3, kind: input, shape index: {}]   ;;  %s2148_s4 = inlined_call_operand.hbm [shape: f32[1,32], index: 4, kind: input, shape index: {}]   ;;  %s2149_s5 = inlined_call_operand.hbm [shape: bf16[32,128], index: 5, kind: input, shape index: {}]   ;;  %s2150_s6 = inlined_call_operand.hbm [shape: f32[1,128], index: 6, kind: input, shape index: {}]   ;;  %s2151_s7 = inlined_call_operand.hbm [shape: bf16[128,32], index: 7, kind: input, shape index: {}]   ;;  %s2152_s8 = inlined_call_operand.hbm [shape: f32[1,32], index: 8, kind: input, shape index: {}]   ;;  %s2153_s9 = inlined_call_operand.hbm [shape: f32[2,8,32], index: 9, kind: output, shape index: {}, may-alias: {0,9}]  }
   0x1   :  { %2170 = sst [smem:[#allocation29_spill]] %s2145_s1 }
   0x2   :  { %2171 = sst [smem:[#allocation30_spill]] %s2147_s3 }
   0x3   :  { %2172 = sst [smem:[#allocation31_spill]] %s2149_s5 }
   0x4   :  { %2173 = sst [smem:[#allocation32_spill]] %s2151_s7 }
   0x5   :  { %2174 = sst [smem:[#allocation33_spill]] %s2153_s9 }
   0x6   :  { %14 = vsyncpa [#allocation3], 0 }
   0x7   :  { %16 = vsyncpa [#allocation3 + $0x1], 0 }
   0x8   :  { %17 = vsyncpa [#allocation6], 0 }
   0x9   :  { %19 = vsyncpa [#allocation6 + $0x1], 0 }
   0xa   :  { %20 = vsyncpa [#allocation9], 0 }
   0xb   :  { %21 = vsyncpa [#allocation12], 0 }
   0xc   :  { %22 = vsyncpa [#allocation15], 0 }
   0xd   :  { %23 = vsyncpa [#allocation4], 0 }
   0xe   :  { %25 = vsyncpa [#allocation4 + $0x1], 0  ;;  %s1687_s30 = smov 0   ;;  %s1689_s10 = smov 0  }
   0xf   :  { %s1691_s11 = smov 0   ;;  %s1693_s12 = smov 0  }
  0x10   :  { %s1695_s13 = smov 0   ;;  %s1697_s14 = smov 0  }
  0x11 LB: > { %2175 = sst [smem:[#allocation24_spill]] %s1609_s11  ;;  %s1718_s15 = sadd.s32 4294967295, %s1621_s14   ;;  %s1621_s14 = sphi %s1697_s14, %s31_s14   ;;  %s1617_s13 = sphi %s1695_s13, %s2218_s13   ;;  %s1613_s12 = sphi %s1693_s12, %s2217_s12   ;;  %s1609_s11 = sphi %s1691_s11, %s2213_s11   ;;  %s1605_s10 = sphi %s1689_s10, %s2216_s10   ;;  %s1601_s30 = sphi %s1687_s30, %s2215_s30  }
  0x12   : > { %2176 = sst [smem:[#allocation25_spill]] %s1613_s12  ;;  %p1015_p0 = scmp.ge.s32.totalorder %s1621_s14, 1 }
  0x13   : > { %p2156_p1 = scmp.eq.s32.totalorder %s1718_s15, 0  ;;  %p284_p2 = scmp.lt.s32.totalorder %s1621_s14, 3 }
  0x14   : > { %s1623_s17 = smov [#allocation8]   ;;  %s1624_s20 = smov [#allocation11]  }
  0x15   : > { %p1723_p3 = pnand %p1015_p0, %p284_p2  ;;  %s296_s18 = sshll.u32 %s1623_s17, 4  ;;  %s1727_s18 = int_to_ptr.vmem [resolvable:$true] %s296_s18 }
  0x16   : > { %s320_s21 = sshll.u32 %s1624_s20, 4  ;;  %s1625_s22 = smov [#allocation14]   ;;  %s1738_s21 = int_to_ptr.vmem [resolvable:$true] %s320_s21 }
  0x17   : > { %s2177_s16 = scalar_select %p1723_p3, 1, 0 }
  0x18   : > { %p1144_p4 = pneg %p1723_p3  ;;  %s1740_s23 = sshll.u32 %s1625_s22, 4  ;;  %s345_s23 = int_to_ptr.vmem [resolvable:$true] %s1740_s23 }
  0x19   : > { %2178 = sst [smem:[#allocation26_spill]] %s2177_s16 }
  0x1a   : > { %p1734_p6 = pnand %p1144_p4, %p2156_p1  ;;  %s2180_s3 = sld [smem:[#allocation30_spill]] }
  0x1c   : > { %s2179_s19 = scalar_select %p1734_p6, 1, 0 }
  0x1d   : > { %p1750_p8 = pneg %p1734_p6 }
  0x1f   : > { %s2181_s29 = scalar_select %p1750_p8, 1, 0 }
  0x20   : > { %s1265_s26 = scalar_lea.hbm %s2180_s3, 256 }
  0x21   : > { %p1266_p7 = scmp.ne.s32.totalorder %s2180_s3, %s1265_s26  ;;  %p1272_p11 = scmp.lt.u32.totalorder %s1265_s26, %s2180_s3 }
  0x23   : > { %p1268_p9 = pnand %p1750_p8, %p1266_p7 }
  0x25   : > { %p1269_p10 = pneg %p1268_p9 }
  0x27   : > { %p1274_p12 = pnand %p1272_p11, %p1269_p10 }
  0x29   : > { %1277 = shalt.err (!%p1274_p12)
}
  0x2a   : > { %s1278_s22 = scalar_lea.vmem %s1727_s18, 256  ;;  %p1286_p4 = scmp.lt.s32.totalorder %s1727_s18, %s1727_s18 }
  0x2b   : > { %p1279_p13 = scmp.ne.s32.totalorder %s1727_s18, %s1278_s22  ;;  %p1287_p5 = scmp.lt.s32.totalorder %s1278_s22, %s1278_s22 }
  0x2d   : > { %p1281_p0 = pnand %p1279_p13, %p1750_p8  ;;  %p1288_p7 = por %p1287_p5, %p1286_p4 }
  0x2f   : > { %p1282_p2 = pneg %p1281_p0 }
  0x31   : > { %p1289_p9 = pnand %p1288_p7, %p1282_p2 }
  0x33   : > { %1292 = shalt.err (!%p1289_p9)
}
  0x34   : > { %s1626_s24 = smov 64   ;;  %s1627_s25 = smov 4  }
  0x35   : > { %1147 = dma.hbm_to_vmem [thread:$0]  (!%p1734_p6), %s2180_s3, 256, %s1727_s18, [#allocation9], %s1626_s24, %s1626_s24, %s1627_s25  }
  0x36   : > { %s2182_s5 = sld [smem:[#allocation31_spill]] }
  0x3c   : > { %s1293_s20 = scalar_lea.hbm %s2182_s5, 256 }
  0x3d   : > { %p1294_p5 = scmp.ne.s32.totalorder %s2182_s5, %s1293_s20  ;;  %p1300_p12 = scmp.lt.u32.totalorder %s1293_s20, %s2182_s5 }
  0x3f   : > { %p1296_p10 = pnand %p1294_p5, %p1750_p8 }
  0x41   : > { %p1297_p11 = pneg %p1296_p10 }
  0x43   : > { %p1302_p13 = pnand %p1300_p12, %p1297_p11 }
  0x45   : > { %1305 = shalt.err (!%p1302_p13)
}
  0x46   : > { %s1306_s18 = scalar_lea.vmem %s1738_s21, 256  ;;  %p1314_p7 = scmp.lt.s32.totalorder %s1738_s21, %s1738_s21 }
  0x47   : > { %p1307_p0 = scmp.ne.s32.totalorder %s1738_s21, %s1306_s18  ;;  %p1315_p9 = scmp.lt.s32.totalorder %s1306_s18, %s1306_s18 }
  0x49   : > { %p1309_p2 = pnand %p1307_p0, %p1750_p8  ;;  %p1316_p5 = por %p1315_p9, %p1314_p7 }
  0x4b   : > { %p1310_p4 = pneg %p1309_p2 }
  0x4d   : > { %p1317_p10 = pnand %p1316_p5, %p1310_p4 }
  0x4f   : > { %1320 = shalt.err (!%p1317_p10)
}
  0x50   : > { %1153 = dma.hbm_to_vmem [thread:$0]  (!%p1734_p6), %s2182_s5, 256, %s1738_s21, [#allocation12], %s1626_s24, %s1626_s24, %s1627_s25  }
  0x51   : > { %s2183_s7 = sld [smem:[#allocation32_spill]] }
  0x57   : > { %s1321_s27 = scalar_lea.hbm %s2183_s7, 1024 }
  0x58   : > { %p1322_p11 = scmp.ne.s32.totalorder %s2183_s7, %s1321_s27  ;;  %p1328_p0 = scmp.lt.u32.totalorder %s1321_s27, %s2183_s7 }
  0x5a   : > { %p1324_p12 = pnand %p1322_p11, %p1750_p8 }
  0x5c   : > { %p1325_p13 = pneg %p1324_p12 }
  0x5e   : > { %p1330_p2 = pnand %p1328_p0, %p1325_p13 }
  0x60   : > { %1333 = shalt.err (!%p1330_p2)
}
  0x61   : > { %s1334_s18 = scalar_lea.vmem %s345_s23, 1024  ;;  %p1342_p5 = scmp.lt.s32.totalorder %s345_s23, %s345_s23 }
  0x62   : > { %p1335_p4 = scmp.ne.s32.totalorder %s345_s23, %s1334_s18  ;;  %p1343_p10 = scmp.lt.s32.totalorder %s1334_s18, %s1334_s18 }
  0x64   : > { %p1337_p7 = pnand %p1335_p4, %p1750_p8  ;;  %p1344_p1 = por %p1343_p10, %p1342_p5 }
  0x66   : > { %p1338_p9 = pneg %p1337_p7 }
  0x68   : > { %p1345_p3 = pnand %p1344_p1, %p1338_p9 }
  0x6a   : > { %1348 = shalt.err (!%p1345_p3)
}
  0x6b   : > { %1159 = dma.hbm_to_vmem [thread:$0]  (!%p1734_p6), %s2183_s7, 1024, %s345_s23, [#allocation15], %s1626_s24, %s1626_s24, %s1627_s25  }
  0x6c   : > { %s1014_s12 = sadd.s32 4294967294, %s1621_s14   ;;  %s43_s16 = sadd.s32 1, %s1617_s13 }
  0x6d   : > { %s52_s26 = sadd.s32 1, %s1609_s11  ;;  %p45_p1 = scmp.ge.s32.totalorder %s43_s16, 2 }
  0x6e   : > { %p59_p3 = scmp.ne.s32.totalorder %s1609_s11, %s1605_s10  ;;  %p60_p11 = scmp.eq.s32.totalorder %s1621_s14, 0 }
  0x6f   : > { %p65_p12 = scmp.ne.s32.totalorder %s1605_s10, %s1601_s30  ;;  %s2220_s16 = smov (%p45_p1, %s43_s16), 0 }
  0x70   : > { %2184 = sst [smem:[#allocation27_spill]] %s2220_s16  ;;  %p61_p13 = por %p60_p11, %p59_p3 }
  0x71   : > { %p2185_p0 = scmp.eq.s32.totalorder %s1718_s15, 0  ;;  %s47_s23 = ssub.s32 %s1617_s13, %s2220_s16 }
  0x72   : > { %p271_p4 = scmp.eq.s32.totalorder %s1718_s15, 1  ;;  %p50_p7 = scmp.eq.s32.totalorder %s47_s23, 0 }
  0x73   : > { %p1834_p2 = por %p2185_p0, %p65_p12  ;;  %p277_p9 = scmp.eq.s32.totalorder %s1014_s12, 1 }
  0x74   : > { %p1841_p5 = por %p271_p4, %p59_p3  ;;  %p1183_p10 = scmp.lt.s32.totalorder %s1621_s14, 2 }
  0x75   : > { %s2186_s27 = scalar_select %p1834_p2, 1, 0 }
  0x76   : > { %s2187_s24 = scalar_select %p1841_p5, 1, 0 }
  0x77   : > { %s1847_s25 = scalar_select %p50_p7, %s1609_s11, %s52_s26  }
  0x78   : > { %p1849_p1 = por %p277_p9, %p65_p12  ;;  %s1854_s17 = sand.u32 1, %s1609_s11  }
  0x79   : > { %2188 = sst [smem:[#allocation28_spill]] %s1847_s25  ;;  %p1856_p11 = pnand %p1183_p10, %p61_p13 }
  0x7a   : > { %s2189_s28 = scalar_select %p1849_p1, 1, 0 }
  0x7b   : > { %s2190_s20 = scalar_select %p1856_p11, 1, 0 }
  0x7c   : > { %s388_s22 = sand.u32 1, %s1621_s14   ;;  %s1025_s18 = sshll.u32 %s1854_s17, 2 }
  0x7d   : > { %s1026_s21 = sshll.u32 %s1617_s13, 6  ;;  %s392_s9 = scalar_lea.vmem [#allocation5], %s1025_s18 }
  0x7e   : > { %s400_s12 = sshll.u32 %s392_s9, 4  ;;  %s2191_s1 = sld [smem:[#allocation29_spill]]  ;;  %s1868_s12 = int_to_ptr.vmem [resolvable:$true] %s400_s12 }
  0x7f   : > { %s1870_s5 = scalar_lea.sflag [#allocation6], %s388_s22  ;;  %p1876_p12 = pneg %p1856_p11 }
  0x81   : > { %s2192_s16 = scalar_select %p1876_p12, 1, 0 }
  0x84   : > { %s1866_s3 = scalar_lea.hbm %s2191_s1, %s1026_s21  ;;  %s1354_s9 = scalar_lea.hbm %s2191_s1, 128 }
  0x85   : > { %s1349_s7 = scalar_lea.hbm %s1866_s3, 64  ;;  %p1355_p4 = scmp.lt.u32.totalorder %s1866_s3, %s2191_s1 }
  0x86   : > { %p1350_p3 = scmp.ne.s32.totalorder %s1866_s3, %s1349_s7  ;;  %p1356_p7 = scmp.lt.u32.totalorder %s1354_s9, %s1349_s7 }
  0x87   : > { %p1358_p10 = scmp.lt.u32.totalorder %s1349_s7, %s1866_s3 }
  0x88   : > { %p1352_p13 = pnand %p1876_p12, %p1350_p3  ;;  %p1357_p9 = por %p1356_p7, %p1355_p4 }
  0x8a   : > { %p1353_p0 = pneg %p1352_p13  ;;  %p1359_p1 = por %p1358_p10, %p1357_p9 }
  0x8c   : > { %p1360_p5 = pnand %p1359_p1, %p1353_p0 }
  0x8e   : > { %1363 = shalt.err (!%p1360_p5)
}
  0x8f   : > { %s1364_s22 = scalar_lea.vmem %s1868_s12, 64  ;;  %s1628_s18 = smov [#allocation5]  }
  0x90   : > { %p1365_p3 = scmp.ne.s32.totalorder %s1868_s12, %s1364_s22  ;;  %s1369_s21 = sshll.u32 %s1628_s18, 4  ;;  %s1370_s21 = int_to_ptr.vmem [resolvable:$false] %s1369_s21 }
  0x91   : > { %s1371_s23 = scalar_lea.vmem %s1370_s21, 128  ;;  %p1372_p6 = scmp.lt.s32.totalorder %s1868_s12, %s1370_s21 }
  0x92   : > { %p1367_p13 = pnand %p1365_p3, %p1876_p12  ;;  %p1373_p8 = scmp.lt.s32.totalorder %s1371_s23, %s1364_s22 }
  0x94   : > { %p1368_p2 = pneg %p1367_p13  ;;  %p1374_p4 = por %p1373_p8, %p1372_p6 }
  0x96   : > { %p1375_p7 = pnand %p1374_p4, %p1368_p2 }
  0x98   : > { %1378 = shalt.err (!%p1375_p7)
}
  0x99   : > { %1169 = dma.hbm_to_vmem [thread:$0]  (!%p1856_p11), %s1866_s3, 64, %s1868_s12, %s1870_s5  }
  0x9a   : > { %s1629_s7 = smov [#allocation10]   ;;  %s1630_s26 = smov [#allocation13]  }
  0x9b   : > { %s310_s9 = sshll.u32 %s1629_s7, 4  ;;  %s334_s1 = sshll.u32 %s1630_s26, 4  ;;  %s311_s9 = int_to_ptr.vmem [resolvable:$true] %s310_s9  ;;  %s1900_s1 = int_to_ptr.vmem [resolvable:$true] %s334_s1 }
  0x9c   : > { %s1379_s22 = scalar_lea.hbm %s2148_s4, 16  ;;  %p2193_p8 = scmp.ne.s32.totalorder %s2181_s29, 0 }
  0x9d   : > { %p1380_p6 = scmp.ne.s32.totalorder %s2148_s4, %s1379_s22  ;;  %p1386_p1 = scmp.lt.u32.totalorder %s1379_s22, %s2148_s4 }
  0x9f   : > { %p1382_p2 = pnand %p1380_p6, %p2193_p8 }
  0xa1   : > { %p1383_p5 = pneg %p1382_p2 }
  0xa3   : > { %p1388_p0 = pnand %p1386_p1, %p1383_p5 }
  0xa5   : > { %1391 = shalt.err (!%p1388_p0)
}
  0xa6   : > { %s1392_s12 = scalar_lea.vmem %s311_s9, 16  ;;  %s1399_s7 = scalar_lea.vmem %s311_s9, 32 }
  0xa7   : > { %p1393_p9 = scmp.ne.s32.totalorder %s311_s9, %s1392_s12  ;;  %p1400_p13 = scmp.lt.s32.totalorder %s311_s9, %s311_s9 }
  0xa8   : > { %p1401_p4 = scmp.lt.s32.totalorder %s1399_s7, %s1392_s12 }
  0xa9   : > { %p1395_p10 = pnand %p1393_p9, %p2193_p8 }
  0xaa   : > { %p1402_p7 = por %p1401_p4, %p1400_p13 }
  0xab   : > { %p1396_p3 = pneg %p1395_p10 }
  0xad   : > { %p1403_p11 = pnand %p1402_p7, %p1396_p3 }
  0xaf   : > { %1406 = shalt.err (!%p1403_p11)
}
  0xb0   : > { %p2194_p6 = scmp.ne.s32.totalorder %s2179_s19, 0  ;;  %s1407_s21 = scalar_lea.hbm %s2150_s6, 16 }
  0xb1   : > { %p1408_p2 = scmp.ne.s32.totalorder %s2150_s6, %s1407_s21  ;;  %p1414_p11 = scmp.lt.u32.totalorder %s1407_s21, %s2150_s6 }
  0xb2   : > { %1150 = dma.hbm_to_vmem [thread:$0]  (!%p2194_p6), %s2148_s4, 16, %s311_s9, [#allocation9]  }
  0xb3   : > { %p1410_p5 = pnand %p1408_p2, %p2193_p8 }
  0xb5   : > { %p1411_p1 = pneg %p1410_p5 }
  0xb7   : > { %p1416_p0 = pnand %p1414_p11, %p1411_p1 }
  0xb9   : > { %1419 = shalt.err (!%p1416_p0)
}
  0xba   : > { %s1420_s9 = scalar_lea.vmem %s1900_s1, 16  ;;  %s1427_s7 = scalar_lea.vmem %s1900_s1, 32 }
  0xbb   : > { %p1421_p9 = scmp.ne.s32.totalorder %s1900_s1, %s1420_s9  ;;  %p1428_p13 = scmp.lt.s32.totalorder %s1900_s1, %s1900_s1 }
  0xbc   : > { %p1429_p4 = scmp.lt.s32.totalorder %s1427_s7, %s1420_s9 }
  0xbd   : > { %p1423_p10 = pnand %p1421_p9, %p2193_p8 }
  0xbe   : > { %p1430_p7 = por %p1429_p4, %p1428_p13 }
  0xbf   : > { %p1424_p3 = pneg %p1423_p10 }
  0xc1   : > { %p1431_p2 = pnand %p1430_p7, %p1424_p3 }
  0xc3   : > { %1434 = shalt.err (!%p1431_p2)
}
  0xc4   : > { %1156 = dma.hbm_to_vmem [thread:$0]  (!%p2194_p6), %s2150_s6, 16, %s1900_s1, [#allocation12]  }
  0xc5   : > { %s1631_s11 = smov [#allocation16]   ;;  %s1023_s21 = sshll.u32 %s1854_s17, 3 }
  0xc6   : > { %s358_s18 = sshll.u32 %s1631_s11, 4  ;;  %s1435_s3 = scalar_lea.hbm %s2152_s8, 16  ;;  %s359_s18 = int_to_ptr.vmem [resolvable:$true] %s358_s18 }
  0xc7   : > { %p1436_p5 = scmp.ne.s32.totalorder %s2152_s8, %s1435_s3  ;;  %p1442_p0 = scmp.lt.u32.totalorder %s1435_s3, %s2152_s8 }
  0xc9   : > { %p1438_p1 = pnand %p1436_p5, %p2193_p8 }
  0xcb   : > { %p1439_p11 = pneg %p1438_p1 }
  0xcd   : > { %p1444_p9 = pnand %p1442_p0, %p1439_p11 }
  0xcf   : > { %1447 = shalt.err (!%p1444_p9)
}
  0xd0   : > { %s1448_s1 = scalar_lea.vmem %s359_s18, 16  ;;  %s1455_s26 = scalar_lea.vmem %s359_s18, 32 }
  0xd1   : > { %p1449_p10 = scmp.ne.s32.totalorder %s359_s18, %s1448_s1  ;;  %p1456_p4 = scmp.lt.s32.totalorder %s359_s18, %s359_s18 }
  0xd2   : > { %p1457_p7 = scmp.lt.s32.totalorder %s1455_s26, %s1448_s1 }
  0xd3   : > { %p1451_p3 = pnand %p1449_p10, %p2193_p8 }
  0xd4   : > { %p1458_p2 = por %p1457_p7, %p1456_p4 }
  0xd5   : > { %p1452_p13 = pneg %p1451_p3 }
  0xd7   : > { %p1459_p12 = pnand %p1458_p2, %p1452_p13 }
  0xd9   : > { %1462 = shalt.err (!%p1459_p12)
}
  0xda   : > { %1162 = dma.hbm_to_vmem [thread:$0]  (!%p2194_p6), %s2152_s8, 16, %s359_s18, [#allocation15]  }
  0xdb   : > { %s1024_s29 = sshll.u32 %s1617_s13, 7  ;;  %s373_s23 = scalar_lea.vmem [#allocation2], %s1023_s21 }
  0xdc   : > { %s381_s3 = sshll.u32 %s373_s23, 4  ;;  %s1971_s7 = scalar_lea.hbm %s2144_s0, %s1024_s29  ;;  %s382_s3 = int_to_ptr.vmem [resolvable:$true] %s381_s3 }
  0xdd   : > { %s370_s19 = scalar_lea.sflag [#allocation3], %s1854_s17  ;;  %s1463_s25 = scalar_lea.hbm %s1971_s7, 128 }
  0xde   : > { %p1464_p12 = scmp.ne.s32.totalorder %s1971_s7, %s1463_s25  ;;  %p2195_p8 = scmp.ne.s32.totalorder %s2192_s16, 0 }
  0xdf   : > { %s1468_s26 = scalar_lea.hbm %s2144_s0, 256  ;;  %p1469_p1 = scmp.lt.u32.totalorder %s1971_s7, %s2144_s0 }
  0xe0   : > { %p1466_p6 = pnand %p1464_p12, %p2195_p8  ;;  %p1470_p11 = scmp.lt.u32.totalorder %s1468_s26, %s1463_s25 }
  0xe1   : > { %p1472_p9 = scmp.lt.u32.totalorder %s1463_s25, %s1971_s7 }
  0xe2   : > { %p1467_p5 = pneg %p1466_p6  ;;  %p1471_p0 = por %p1470_p11, %p1469_p1 }
  0xe4   : > { %p1473_p10 = por %p1472_p9, %p1471_p0 }
  0xe6   : > { %p1474_p3 = pnand %p1473_p10, %p1467_p5 }
  0xe8   : > { %1477 = shalt.err (!%p1474_p3)
}
  0xe9   : > { %s1478_s23 = scalar_lea.vmem %s382_s3, 128  ;;  %s1632_s12 = smov [#allocation2]  }
  0xea   : > { %p1479_p13 = scmp.ne.s32.totalorder %s382_s3, %s1478_s23  ;;  %s1483_s9 = sshll.u32 %s1632_s12, 4  ;;  %s1484_s9 = int_to_ptr.vmem [resolvable:$false] %s1483_s9 }
  0xeb   : > { %s1485_s18 = scalar_lea.vmem %s1484_s9, 256  ;;  %p1486_p2 = scmp.lt.s32.totalorder %s382_s3, %s1484_s9 }
  0xec   : > { %p1481_p4 = pnand %p1479_p13, %p2195_p8  ;;  %p1487_p12 = scmp.lt.s32.totalorder %s1485_s18, %s1478_s23 }
  0xee   : > { %p1482_p7 = pneg %p1481_p4  ;;  %p1488_p6 = por %p1487_p12, %p1486_p2 }
  0xf0   : > { %p1489_p1 = pnand %p1488_p6, %p1482_p7 }
  0xf2   : > { %1492 = shalt.err (!%p1489_p1)
}
  0xf3   : > { %p2196_p11 = scmp.ne.s32.totalorder %s2190_s20, 0  ;;  %s1996_s26 = scalar_lea.hbm %s2146_s2, %s1024_s29 }
  0xf4   : > { %s411_s11 = scalar_lea.vmem [#allocation7], %s1023_s21  ;;  %s1493_s23 = scalar_lea.hbm %s1996_s26, 128 }
  0xf5   : > { %1166 = dma.hbm_to_vmem [thread:$0]  (!%p2196_p11), %s1971_s7, 128, %s382_s3, %s370_s19  }
  0xf6   : > { %s418_s22 = sshll.u32 %s411_s11, 4  ;;  %p1494_p5 = scmp.ne.s32.totalorder %s1996_s26, %s1493_s23  ;;  %s419_s22 = int_to_ptr.vmem [resolvable:$true] %s418_s22 }
  0xf7   : > { %s1498_s19 = scalar_lea.hbm %s2146_s2, 256  ;;  %p1499_p10 = scmp.lt.u32.totalorder %s1996_s26, %s2146_s2 }
  0xf8   : > { %p1496_p0 = pnand %p1494_p5, %p2195_p8  ;;  %p1500_p3 = scmp.lt.u32.totalorder %s1498_s19, %s1493_s23 }
  0xf9   : > { %p1502_p4 = scmp.lt.u32.totalorder %s1493_s23, %s1996_s26 }
  0xfa   : > { %p1497_p9 = pneg %p1496_p0  ;;  %p1501_p13 = por %p1500_p3, %p1499_p10 }
  0xfc   : > { %p1503_p7 = por %p1502_p4, %p1501_p13 }
  0xfe   : > { %p1504_p2 = pnand %p1503_p7, %p1497_p9 }
 0x100   : > { %1507 = shalt.err (!%p1504_p2)
}
 0x101   : > { %s1508_s17 = scalar_lea.vmem %s419_s22, 128  ;;  %s1633_s21 = smov [#allocation7]  }
 0x102   : > { %p1509_p12 = scmp.ne.s32.totalorder %s419_s22, %s1508_s17  ;;  %s1513_s9 = sshll.u32 %s1633_s21, 4  ;;  %s1514_s9 = int_to_ptr.vmem [resolvable:$false] %s1513_s9 }
 0x103   : > { %s1515_s18 = scalar_lea.vmem %s1514_s9, 256  ;;  %p1516_p5 = scmp.lt.s32.totalorder %s419_s22, %s1514_s9 }
 0x104   : > { %p1511_p6 = pnand %p1509_p12, %p2195_p8  ;;  %p1517_p0 = scmp.lt.s32.totalorder %s1515_s18, %s1508_s17 }
 0x106   : > { %p1512_p1 = pneg %p1511_p6  ;;  %p1518_p11 = por %p1517_p0, %p1516_p5 }
 0x108   : > { %p1519_p3 = pnand %p1518_p11, %p1512_p1 }
 0x10a   : > { %1522 = shalt.err (!%p1519_p3)
}
 0x10b   : > { %p2197_p10 = scmp.ne.s32.totalorder %s2190_s20, 0  ;;  %s2198_s25 = sld [smem:[#allocation26_spill]] }
 0x10d   : > { %1172 = dma.hbm_to_vmem [thread:$0]  (!%p2197_p10), %s1996_s26, 128, %s419_s22, %s1870_s5  }
 0x111   : > { %p2199_p9 = scmp.ne.s32.totalorder %s2198_s25, 0 }
 0x112   : > { %s2021_s16 = sand.u32 (!%p2199_p9), 1, %s1605_s10   ;;  %p2200_p8 = scmp.ne.s32.totalorder (!%p2199_p9), %s2186_s27, 0 }
 0x113   : > { %427 = sbr.rel (%p2199_p9) target bundleno = 1311 (0x51f), region = 56  ;;  %s2024_s1 = sshll.u32 (!%p2199_p9), %s2021_s16, 3 }
 0x114   : > { %s430_s11 = scalar_lea.sflag (!%p2199_p9), [#allocation3], %s2021_s16  ;;  %s433_s23 = scalar_lea.vmem (!%p2199_p9), [#allocation2], %s2024_s1 }
 0x11a   : > { %1576 = dma.done.wait (%p2200_p8), %s430_s11, 128  }
 0x11b   : > { %1578 = vsyncadd (%p2200_p8), %s430_s11, 4294967168  ;;  %s438_s5 = sand.u32 1, %s1718_s15   ;;  %s1031_s20 = sshll.u32 %s2021_s16, 2 }
 0x11c   : > { %s439_s26 = scalar_lea.sflag [#allocation6], %s438_s5  ;;  %s442_s22 = scalar_lea.vmem [#allocation5], %s1031_s20 }
 0x11d   : > { %1580 = dma.done.wait (%p2200_p8), %s439_s26, 192  }
 0x11e   : > { %1582 = vsyncadd (%p2200_p8), %s439_s26, 4294967104  ;;  %s451_s3 = scalar_lea.vmem [#allocation7], %s2024_s1  ;;  %p2201_p11 = scmp.eq.s32.totalorder %s1718_s15, 0 }
 0x120   : > { %1584 = dma.done.wait (%p2201_p11), [#allocation9], 272   ;;  %p2202_p13 = pmov %p2201_p11 }
 0x121   : > { %p2203_p4 = pmov %p2201_p11 }
 0x122   : > { %1586 = vsyncadd (%p2202_p13), [#allocation9], 4294967024 }
 0x123   : > { %1588 = dma.done.wait (%p2203_p4), [#allocation12], 272   ;;  %p2204_p7 = pmov %p2203_p4 }
 0x124   : > { %p2205_p2 = pmov %p2203_p4 }
 0x125   : > { %1590 = vsyncadd (%p2204_p7), [#allocation12], 4294967024 }
 0x126   : > { %1592 = dma.done.wait (%p2205_p2), [#allocation15], 1040   ;;  %p2206_p12 = pmov %p2205_p2 }
 0x127   : > { %v1634_v0 = vmov 0.0   ;;  %vm1635_vm0 = vmmov 0   ;;  %v1249_v1 = vld [vmem:[#allocation8] sm:$0xff]   ;;  %v1250_v2 = vld [vmem:[#allocation8 + $0x8] sm:$0xff]   ;;  %vm547_vm1 = vcmask 261120   ;;  %v591_v4 = vlaneseq  ;;  %v1251_v24 = vld [vmem:[#allocation11] sm:$0xff]  }
 0x128   : > { %1594 = vsyncadd (%p2206_p12), [#allocation15], 4294966256  ;;  %1076 = vmatprep.subr.bf16.mxu1 %v1634_v0  ;;  %1080 = vmatprep.mubr.msk.bf16.mxu1 %vm1635_vm0, %v1634_v0  ;;  %v523_v3 = vld [vmem:[%s442_s22] sm:$0xf]  ;;  %v2062_v7 = vld [vmem:[%s451_s3] sm:$0x3f] }
 0x129   : > { %1092 = vmatprep.subr.bf16.mxu0 %v1634_v0  ;;  %1108 = vmatprep.mubr.msk.bf16.mxu0 %vm1635_vm0, %v1634_v0  ;;  %v2059_v5 = vshrl.u32 %v591_v4, 7  ;;  %v1040_v8 = vld [vmem:[#allocation10] ss:$0 sm:$0xff]  ;;  %v521_v14 = vld [vmem:[%s433_s23] sm:$0xff]  ;;  %v611_v30 = vadd.f32 1.0, %v2062_v7  ;;  %s2207_s15 = sld [smem:[#allocation25_spill]] }
 0x12a   : > { %1077 = vmatpush3.bf16.msra.mxu1 %v1249_v1  ;;  %v1252_v25 = vld [vmem:[#allocation11 + $0x8] sm:$0xff]   ;;  %v1253_v26 = vld [vmem:[#allocation14] sm:$0xff]   ;;  %v1254_v40 = vld [vmem:[#allocation14 + $0x8] sm:$0xff]   ;;  %s519_s7 = scalar_lea.vmem [#allocation17], %s2024_s1  ;;  %s2208_s17 = sld [smem:[#allocation33_spill]] }
 0x12b   : > { %1078 = vmatprep.subr.bf16.mxu1 %v1634_v0  ;;  %v593_v6 = vsub.s32 2, %v2059_v5  ;;  %1093 = vmatpush3.bf16.msra.mxu0 %v1253_v26  ;;  %v614_v31 = vsub.s32 4, %v2059_v5  ;;  %v619_v32 = vsub.s32 3, %v2059_v5  ;;  %v1255_v41 = vld [vmem:[#allocation14 + $0x10] sm:$0xff]   ;;  %v1256_v42 = vld [vmem:[#allocation14 + $0x18] sm:$0xff]   ;;  %v1257_v43 = vld [vmem:[#allocation14 + $0x20] sm:$0xff]  }
 0x12c   : > { %1094 = vmatprep.subr.bf16.mxu0 %v1634_v0  ;;  %v1258_v44 = vld [vmem:[#allocation14 + $0x28] sm:$0xff]   ;;  %v1259_v45 = vld [vmem:[#allocation14 + $0x30] sm:$0xff]   ;;  %v1260_v46 = vld [vmem:[#allocation14 + $0x38] sm:$0xff]   ;;  %v812_v63 = vsub.s32 5, %v2059_v5  ;;  %s832_s19 = sshll.u32 %s519_s7, 4  ;;  %s818_s9 = scalar_lea.sflag [#allocation4], %s2021_s16  ;;  %s2096_s19 = int_to_ptr.vmem [resolvable:$true] %s832_s19 }
 0x12d   : > { %v594_v9 = vrot.slane %v2062_v7, %v593_v6  ;;  %v615_v33 = vrot.slane %v611_v30, %v614_v31  ;;  %v620_v35 = vrot.slane %v2062_v7, %v619_v32  ;;  %v1044_v47 = vld [vmem:[#allocation13] ss:$0 sm:$0xff]  ;;  %s1523_s18 = scalar_lea.vmem %s2096_s19, 128  ;;  %p2209_p1 = scmp.ne.s32.totalorder %s2187_s24, 0 }
 0x12e   : > { %1079 = vmatpush3.bf16.msra.mxu1 %v1250_v2  ;;  %v813_v1 = vrot.slane %v2062_v7, %v812_v63  ;;  %p1524_p6 = scmp.ne.s32.totalorder %s2096_s19, %s1523_s18  ;;  %s1636_s25 = smov [#allocation17]  }
 0x12f   : > { %1084 = vmatprep.subr.bf16.mxu1 %v1634_v0  ;;  %1095 = vmatpush3.bf16.msra.mxu0 %v1254_v40  ;;  %s1058_s27 = sshll.u32 %s2207_s15, 7  ;;  %s1527_s1 = sshll.u32 %s1636_s25, 4  ;;  %s1528_s1 = int_to_ptr.vmem [resolvable:$false] %s1527_s1 }
 0x130   : > { %1096 = vmatprep.subr.bf16.mxu0 %v1634_v0  ;;  %s2094_s21 = scalar_lea.hbm %s2208_s17, %s1058_s27  ;;  %p1525_p5 = pnand %p1524_p6, %p2209_p1 }
 0x131   : > { %1081 = vmatmul.mubr.msk.bf16.vlgmr.msra.gmra.mrb[0].mxu1 %vm547_vm1, %v523_v3  ;;  %s1529_s11 = scalar_lea.vmem %s1528_s1, 256  ;;  %p1530_p3 = scmp.lt.s32.totalorder %s2096_s19, %s1528_s1 }
 0x132   : > { %1088 = vmatprep.mubr.msk.bf16.mxu1 %vm1635_vm0, %v1634_v0  ;;  %1085 = vmatpush3.bf16.msra.mxu1 %v1251_v24  ;;  %p1526_p0 = pneg %p1525_p5  ;;  %p1531_p10 = scmp.lt.s32.totalorder %s1529_s11, %s1523_s18 }
 0x133   : > { %1086 = vmatprep.subr.bf16.mxu1 %v1634_v0  ;;  %1097 = vmatpush3.bf16.msra.mxu0 %v1255_v41 }
 0x134   : > { %1098 = vmatprep.subr.bf16.mxu0 %v1634_v0  ;;  %p1532_p9 = por %p1531_p10, %p1530_p3 }
 0x136   : > { %1087 = vmatpush3.bf16.msra.mxu1 %v1252_v25  ;;  %p1533_p8 = pnand %p1532_p9, %p1526_p0 }
 0x137   : > { %1099 = vmatpush3.bf16.msra.mxu0 %v1256_v42 }
 0x138   : > { %1100 = vmatprep.subr.bf16.mxu0 %v1634_v0 }
 0x13b   : > { %1101 = vmatpush3.bf16.msra.mxu0 %v1257_v43 }
 0x13c   : > { %1102 = vmatprep.subr.bf16.mxu0 %v1634_v0 }
 0x13f   : > { %1103 = vmatpush3.bf16.msra.mxu0 %v1258_v44 }
 0x140   : > { %1104 = vmatprep.subr.bf16.mxu0 %v1634_v0 }
 0x143   : > { %1105 = vmatpush3.bf16.msra.mxu0 %v1259_v45 }
 0x144   : > { %1106 = vmatprep.subr.bf16.mxu0 %v1634_v0  ;;  %v1048_v0 = vld [vmem:[#allocation16] ss:$0 sm:$0xff] }
 0x147   : > { %1107 = vmatpush3.bf16.msra.mxu0 %v1260_v46 }
 0x204   : > { %v585_v10 = vpop.f32.mrb[0].mxu1 }
 0x205   : > { %v586_v11 = vadd.f32 %v1040_v8, %v585_v10  ;;  %v1082_v12 = vpop.f32.mrb[1].mxu1 }
 0x206   : > { %v588_v13 = vpop.f32.mrb[2].mxu1 }
 0x207   : > { %v595_v15 = vmul.f32 %v594_v9, %v586_v11  ;;  %v1083_v16 = vpop.f32.mrb[3].mxu1 }
 0x209   : > { %v2067_v17 = vadd.f32 %v595_v15, %v521_v14 }
 0x20b   : > { %v597_v18 = vsel %vm547_vm1, %v2067_v17, 0.0 }
 0x20c   : > { %598 = vadd.xlane.f32.xlu0 %v597_v18 }
 0x299   : > { %v599_v19 = vpop.xlane.xlu0 %598 }
 0x29a   : > { %v601_v20 = vmul.f32 0.03125, %v599_v19 }
 0x29c   : > { %v602_v21 = vsub.f32 %v2067_v17, %v601_v20 }
 0x29e   : > { %v603_v22 = vmul.f32 %v602_v21, %v602_v21 }
 0x2a0   : > { %v604_v23 = vsel %vm547_vm1, %v603_v22, 0.0 }
 0x2a1   : > { %605 = vadd.xlane.f32.xlu0 %v604_v23 }
 0x32e   : > { %v606_v27 = vpop.xlane.xlu0 %605 }
 0x32f   : > { %v607_v28 = vmul.f32 0.03125, %v606_v27 }
 0x331   : > { %v608_v29 = vadd.f32 1e-06, %v607_v28 }
 0x333   : > { %1261 = vrsqrt.f32 %v608_v29 }
 0x33d   : > { %v1262_v34 = vpop.eup %1261 }
 0x33e   : > { %v610_v36 = vmul.f32 %v1262_v34, %v602_v21 }
 0x340   : > { %v616_v37 = vmul.f32 %v615_v33, %v610_v36 }
 0x342   : > { %v621_v38 = vadd.f32 %v620_v35, %v616_v37 }
 0x344   : > { %v622_v39 = vpack.c.bf16 %v621_v38, %v621_v38 }
 0x346   : > { %1089 = vmatmul.mubr.msk.bf16.vlgmr.msra.gmra.mrb[4].mxu1 %vm547_vm1, %v622_v39 }
 0x419   : > { %v683_v48 = vpop.f32.mrb[4].mxu1 }
 0x41a   : > { %v684_v49 = vadd.f32 %v1044_v47, %v683_v48  ;;  %v1090_v50 = vpop.f32.mrb[5].mxu1 }
 0x41b   : > { %v686_v51 = vpop.f32.mrb[6].mxu1 }
 0x41c   : > { %v690_v52 = vmul.f32 0.044715, %v684_v49  ;;  %v1091_v53 = vpop.f32.mrb[7].mxu1  ;;  %v689_v59 = vmul.f32 0.5, %v684_v49 }
 0x41e   : > { %v691_v54 = vmul.f32 %v690_v52, %v684_v49 }
 0x420   : > { %v692_v55 = vmul.f32 %v691_v54, %v684_v49 }
 0x422   : > { %v693_v56 = vadd.f32 %v692_v55, %v684_v49 }
 0x424   : > { %v694_v57 = vmul.f32 0.7978846, %v693_v56 }
 0x426   : > { %1263 = vtanh.f32 %v694_v57 }
 0x430   : > { %v1264_v58 = vpop.eup %1263 }
 0x431   : > { %v696_v60 = vadd.f32 1.0, %v1264_v58 }
 0x433   : > { %v697_v61 = vmul.f32 %v696_v60, %v689_v59 }
 0x435   : > { %v698_v62 = vpack.c.bf16 %v697_v61, %v697_v61 }
 0x437   : > { %1109 = vmatmul.mubr.bf16.vlgmr.msra.gmra.mrb[0].mxu0 %v698_v62 }
 0x50a   : > { %v804_v2 = vpop.f32.mrb[0].mxu0 }
 0x50b   : > { %v805_v3 = vadd.f32 %v1048_v0, %v804_v2  ;;  %v1110_v4 = vpop.f32.mrb[1].mxu0 }
 0x50c   : > { %v807_v6 = vpop.f32.mrb[2].mxu0 }
 0x50d   : > { %v814_v8 = vmul.f32 %v813_v1, %v805_v3  ;;  %v1111_v9 = vpop.f32.mrb[3].mxu0 }
 0x50f   : > { %v815_v10 = vadd.f32 %v814_v8, %v2067_v17 }
 0x511   : > { %816 = vst.msk [vmem:[%s519_s7] sm:$0xff] %vm547_vm1, %v815_v10 }
 0x512   : > { %1536 = shalt.err (!%p1533_p8)
}
 0x513   : > { %s1537_s16 = scalar_lea.hbm %s2094_s21, 128  ;;  %s1541_s20 = scalar_lea.hbm %s2208_s17, 256 }
 0x514   : > { %p1538_p11 = scmp.ne.s32.totalorder %s2094_s21, %s1537_s16  ;;  %p1542_p7 = scmp.lt.u32.totalorder %s2094_s21, %s2208_s17 }
 0x515   : > { %p1543_p2 = scmp.lt.u32.totalorder %s1541_s20, %s1537_s16  ;;  %p1545_p6 = scmp.lt.u32.totalorder %s1537_s16, %s2094_s21 }
 0x516   : > { %p1539_p13 = pnand %p1538_p11, %p2209_p1 }
 0x517   : > { %p1544_p12 = por %p1543_p2, %p1542_p7 }
 0x518   : > { %p1540_p4 = pneg %p1539_p13 }
 0x519   : > { %p1546_p5 = por %p1545_p6, %p1544_p12 }
 0x51b   : > { %p1547_p0 = pnand %p1546_p5, %p1540_p4 }
 0x51d   : > { %1550 = shalt.err (!%p1547_p0)
}
 0x51e   : > { %1142 = dma.vmem_to_hbm [thread:$0]  (%p2209_p1), %s2096_s19, 128, %s2094_s21, %s818_s9  }
 0x51f PF: > { %s844_s3 = sand.u32 1, %s1601_s30   ;;  %p2210_p3 = scmp.ne.s32.totalorder %s2189_s28, 0 }
 0x520   : > { %p2211_p10 = scmp.ge.s32.totalorder %s1621_s14, 2  ;;  %s845_s15 = scalar_lea.sflag [#allocation4], %s844_s3 }
 0x522   : > { %p1174_p9 = pnand %p2211_p10, %p2210_p3 }
 0x524   : > { %1596 = dma.done.wait (!%p1174_p9), %s845_s15, 128  }
 0x525   : > { %1598 = vsyncadd (!%p1174_p9), %s845_s15, 4294967168  ;;  %s31_s14 = sadd.s32 1, %s1621_s14   ;;  %s2212_s27 = sld [smem:[#allocation24_spill]] }
 0x526   : > { %p28_p8 = scmp.ge.s32.totalorder %s31_s14, 4   ;;  %s2213_s11 = sld [smem:[#allocation28_spill]] }
 0x527   : > { %s2214_s24 = sld [smem:[#allocation27_spill]]  ;;  %s2215_s30 = smov %s1605_s10 }
 0x528   : > { %s2217_s12 = smov %s1617_s13  ;;  %30 = sbr.rel (!%p28_p8) target bundleno = 17 (0x11), region = 149 }
 0x52b   : > { %s2216_s10 = smov %s2212_s27 }
 0x52d   : > { %s2218_s13 = smov %s2214_s24 }
 0x52f   :  { %850 = vsyncpa [#allocation3], 1 }
 0x530   :  { %852 = vsyncpa [#allocation3 + $0x1], 1 }
 0x531   :  { %853 = vsyncpa [#allocation6], 1 }
 0x532   :  { %855 = vsyncpa [#allocation6 + $0x1], 1 }
 0x533   :  { %856 = vsyncpa [#allocation9], 1 }
 0x534   :  { %857 = vsyncpa [#allocation12], 1 }
 0x535   :  { %858 = vsyncpa [#allocation15], 1 }
 0x536   :  { %859 = vsyncpa [#allocation4], 1 }
 0x537   :  { %861 = vsyncpa [#allocation4 + $0x1], 1 }

</bundles_post_ra>
